<compile_context>
chip_gen: v7x
topology: tpu7x:2x2x1
jax: 0.10.0
libtpu: 0.0.40
codegen_flags: <defaults>
</compile_context>

<pallas_src>
import functools

import jax
import jax.numpy as jnp
from jax import lax
from jax.experimental import pallas as pl
from jax.experimental.pallas import tpu as pltpu

# ---------------- model config (small demo scale, lane-dense dims) ----------
PATCH = 4
D_MODEL = 128                 # multiple of 128 -> lane-dense activations
N_HEADS = 4
HEAD_DIM = D_MODEL // N_HEADS
MLP_DIM = 256
N_LAYERS = 2
READOUT_HIDDEN = 128
NUM_OUT = 128                 # stand-in for num_out_features=1024 at demo scale
NEG_SLOPE = 0.01              # LeakyReLU (PyTorch default negative_slope)
EPS = 1e-5
ATTN_SCALE = 1.0 / (HEAD_DIM ** 0.5)


def _bf16(x):
    return x.astype(jnp.bfloat16)


# ---------------- in-kernel helpers ----------------
def _layernorm(x, g, b):
    mu = jnp.mean(x, axis=-1, keepdims=True)
    var = jnp.mean((x - mu) ** 2, axis=-1, keepdims=True)
    return (x - mu) * lax.rsqrt(var + EPS) * g + b


# ---------------- fused forward kernel ----------------
def fused_encoder_kernel(B, S,
                         x_ref, pos_ref, wp_ref, bp_ref,
                         ln1g_ref, ln1b_ref, wqkv_ref, bqkv_ref, wo_ref, bo_ref,
                         ln2g_ref, ln2b_ref, w1_ref, b1_ref, w2_ref, b2_ref,
                         lnfg_ref, lnfb_ref, wr1_ref, br1_ref, wr2_ref, br2_ref,
                         o_ref):
    # ---- patch embedding + positional embedding (bf16 matmul, f32 acc) ----
    tok = jnp.dot(x_ref[...], wp_ref[...],
                  preferred_element_type=jnp.float32) + bp_ref[...]      # (B*S, D)
    # broadcast the (S, D) pos-embed over the batch inside VMEM (no HBM tile)
    tok = (tok.reshape(B, S, D_MODEL) + pos_ref[...]).reshape(B * S, D_MODEL)

    # ---- transformer blocks (unrolled; weights stacked along layer axis) ----
    for l in range(N_LAYERS):
        # -- multi-head self-attention (pre-LN), dense parts flattened --
        h = _layernorm(tok, ln1g_ref[l], ln1b_ref[l])                    # f32
        qkv = jnp.dot(_bf16(h), wqkv_ref[l],
                      preferred_element_type=jnp.float32) + bqkv_ref[l]  # (B*S, 3D)
        q = qkv[:, 0 * D_MODEL:1 * D_MODEL].reshape(B, S, D_MODEL)
        k = qkv[:, 1 * D_MODEL:2 * D_MODEL].reshape(B, S, D_MODEL)
        v = qkv[:, 2 * D_MODEL:3 * D_MODEL].reshape(B, S, D_MODEL)

        head_outs = []
        for hd in range(N_HEADS):
            sl = slice(hd * HEAD_DIM, (hd + 1) * HEAD_DIM)
            qh, kh, vh = q[..., sl], k[..., sl], v[..., sl]              # (B, S, HD)
            s = jnp.einsum('bqd,bkd->bqk', _bf16(qh), _bf16(kh),
                           preferred_element_type=jnp.float32) * ATTN_SCALE
            s = s - jnp.max(s, axis=-1, keepdims=True)                   # f32 softmax
            p = jnp.exp(s)
            p = p * pl.reciprocal(jnp.sum(p, axis=-1, keepdims=True), approx=True)
            head_outs.append(
                jnp.einsum('bqk,bkd->bqd', _bf16(p), _bf16(vh),
                           preferred_element_type=jnp.float32))
        attn = jnp.concatenate(head_outs, axis=-1).reshape(B * S, D_MODEL)
        attn = jnp.dot(_bf16(attn), wo_ref[l],
                       preferred_element_type=jnp.float32) + bo_ref[l]
        tok = tok + attn

        # -- MLP (pre-LN) --
        h2 = _layernorm(tok, ln2g_ref[l], ln2b_ref[l])
        m = jnp.dot(_bf16(h2), w1_ref[l],
                    preferred_element_type=jnp.float32) + b1_ref[l]
        # TODO(synk): PyTorch nn.GELU defaults to exact erf; tanh approx used here.
        m = jax.nn.gelu(m, approximate=True)
        m = jnp.dot(_bf16(m), w2_ref[l],
                    preferred_element_type=jnp.float32) + b2_ref[l]
        tok = tok + m

    # ---- final LN + mean-pool + readout MLP ----
    xf = _layernorm(tok, lnfg_ref[...], lnfb_ref[...])                   # (B*S, D)
    pooled = jnp.mean(xf.reshape(B, S, D_MODEL), axis=1)                 # (B, D)
    hh = jnp.dot(_bf16(pooled), wr1_ref[...],
                 preferred_element_type=jnp.float32) + br1_ref[...]
    hh = jnp.where(hh > 0, hh, NEG_SLOPE * hh)                           # LeakyReLU
    o_ref[...] = jnp.dot(_bf16(hh), wr2_ref[...],
                         preferred_element_type=jnp.float32) + br2_ref[...]


# ---------------- glue ----------------
def im2col(x, p):
    B, C, H, W = x.shape
    x = x.reshape(B, C, H // p, p, W // p, p)
    x = x.transpose(0, 2, 4, 1, 3, 5)            # (B, Hp, Wp, C, p, p)
    return x.reshape(B, (H // p) * (W // p), C * p * p)


def init_params(key, in_ch, img_hw):
    s = (img_hw // PATCH) ** 2
    cpp = in_ch * PATCH * PATCH
    keys = iter(jax.random.split(key, 8))
    std = 0.02

    def rnd(shape):
        return (std * jax.random.normal(next(keys), shape)).astype(jnp.float32)

    L = N_LAYERS
    return {
        "w_patch": rnd((cpp, D_MODEL)),
        "b_patch": jnp.zeros((1, D_MODEL), jnp.float32),
        "pos": rnd((s, D_MODEL)),
        # per-layer weights stacked along a leading layer axis
        "ln1_g": jnp.ones((L, 1, D_MODEL), jnp.float32),
        "ln1_b": jnp.zeros((L, 1, D_MODEL), jnp.float32),
        "wqkv": rnd((L, D_MODEL, 3 * D_MODEL)),
        "bqkv": jnp.zeros((L, 1, 3 * D_MODEL), jnp.float32),
        "wo": rnd((L, D_MODEL, D_MODEL)),
        "bo": jnp.zeros((L, 1, D_MODEL), jnp.float32),
        "ln2_g": jnp.ones((L, 1, D_MODEL), jnp.float32),
        "ln2_b": jnp.zeros((L, 1, D_MODEL), jnp.float32),
        "w1": rnd((L, D_MODEL, MLP_DIM)),
        "b1": jnp.zeros((L, 1, MLP_DIM), jnp.float32),
        "w2": rnd((L, MLP_DIM, D_MODEL)),
        "b2": jnp.zeros((L, 1, D_MODEL), jnp.float32),
        # final LN + readout
        "lnf_g": jnp.ones((1, D_MODEL), jnp.float32),
        "lnf_b": jnp.zeros((1, D_MODEL), jnp.float32),
        "wr1": rnd((D_MODEL, READOUT_HIDDEN)),
        "br1": jnp.zeros((1, READOUT_HIDDEN), jnp.float32),
        "wr2": rnd((READOUT_HIDDEN, NUM_OUT)),
        "br2": jnp.zeros((1, NUM_OUT), jnp.float32),
    }


@jax.jit
def image_encoder_forward(x, params):
    B = x.shape[0]
    patches = im2col(x, PATCH)                           # (B, S, C*P*P)
    S = patches.shape[1]
    x2d = _bf16(patches.reshape(B * S, patches.shape[2]))

    kernel = functools.partial(fused_encoder_kernel, B, S)

    # Single fused pallas_call: ~0.3 MB of weights + 16 KB of activations all
    # fit in VMEM on every TPU generation, so no grid / no in_specs needed —
    # every operand is loaded whole, once, and the whole forward runs in one
    # program with activations resident in VMEM/vregs.
    out = pl.pallas_call(
        kernel,
        out_shape=jax.ShapeDtypeStruct((B, NUM_OUT), jnp.float32),
    )(
        x2d, params["pos"],
        _bf16(params["w_patch"]), params["b_patch"],
        params["ln1_g"], params["ln1_b"],
        _bf16(params["wqkv"]), params["bqkv"],
        _bf16(params["wo"]), params["bo"],
        params["ln2_g"], params["ln2_b"],
        _bf16(params["w1"]), params["b1"],
        _bf16(params["w2"]), params["b2"],
        params["lnf_g"], params["lnf_b"],
        _bf16(params["wr1"]), params["br1"],
        _bf16(params["wr2"]), params["br2"],
    )
    return out                                            # (B, NUM_OUT)


if __name__ == "__main__":
    key = jax.random.PRNGKey(0)
    k_img, k_par = jax.random.split(key)

    B, C, H, W = 2, 4, 16, 16                             # NCHW, like PyTorch conv
    x = jax.random.normal(k_img, (B, C, H, W), jnp.float32)
    params = init_params(k_par, in_ch=C, img_hw=H)

    enc = image_encoder_forward(x, params)
    enc = jax.block_until_ready(enc)
    assert enc.shape == (B, NUM_OUT) and enc.dtype == jnp.float32
    assert bool(jnp.all(jnp.isfinite(enc)))
    print("KERNEL_OK")
</pallas_src>

<mosaic_0001>
module attributes {stable_mosaic.version = 11 : i64} {
  func.func @fused_encoder_kernel(%arg0: memref<32x64xbf16, #tpu.memory_space<vmem>>, %arg1: memref<16x128xf32, #tpu.memory_space<vmem>>, %arg2: memref<64x128xbf16, #tpu.memory_space<vmem>>, %arg3: memref<1x128xf32, #tpu.memory_space<vmem>>, %arg4: memref<2x1x128xf32, #tpu.memory_space<vmem>>, %arg5: memref<2x1x128xf32, #tpu.memory_space<vmem>>, %arg6: memref<2x128x384xbf16, #tpu.memory_space<vmem>>, %arg7: memref<2x1x384xf32, #tpu.memory_space<vmem>>, %arg8: memref<2x128x128xbf16, #tpu.memory_space<vmem>>, %arg9: memref<2x1x128xf32, #tpu.memory_space<vmem>>, %arg10: memref<2x1x128xf32, #tpu.memory_space<vmem>>, %arg11: memref<2x1x128xf32, #tpu.memory_space<vmem>>, %arg12: memref<2x128x256xbf16, #tpu.memory_space<vmem>>, %arg13: memref<2x1x256xf32, #tpu.memory_space<vmem>>, %arg14: memref<2x256x128xbf16, #tpu.memory_space<vmem>>, %arg15: memref<2x1x128xf32, #tpu.memory_space<vmem>>, %arg16: memref<1x128xf32, #tpu.memory_space<vmem>>, %arg17: memref<1x128xf32, #tpu.memory_space<vmem>>, %arg18: memref<128x128xbf16, #tpu.memory_space<vmem>>, %arg19: memref<1x128xf32, #tpu.memory_space<vmem>>, %arg20: memref<128x128xbf16, #tpu.memory_space<vmem>>, %arg21: memref<1x128xf32, #tpu.memory_space<vmem>>, %arg22: memref<2x128xf32, #tpu.memory_space<vmem>>) attributes {dimension_semantics = [], scalar_prefetch = 0 : i64, scratch_operands = 0 : i64, tpu.core_type = #tpu.core_type<tc>} {
    %c0 = arith.constant 0 : index
    %c0_0 = arith.constant 0 : index
    %0 = vector.load %arg0[%c0, %c0_0] : memref<32x64xbf16, #tpu.memory_space<vmem>>, vector<32x64xbf16>
    %c0_1 = arith.constant 0 : index
    %c0_2 = arith.constant 0 : index
    %1 = vector.load %arg2[%c0_1, %c0_2] : memref<64x128xbf16, #tpu.memory_space<vmem>>, vector<64x128xbf16>
    %cst = arith.constant dense<0.000000e+00> : vector<32x128xf32>
    %2 = tpu.matmul %0, %1, %cst {dimension_numbers = #tpu.dot_dimension_numbers<[1], [0], [0], [1], [0, 0, 1, 1], [], []>} : vector<32x64xbf16>, vector<64x128xbf16>, vector<32x128xf32> -> vector<32x128xf32>
    %c0_3 = arith.constant 0 : index
    %c0_4 = arith.constant 0 : index
    %3 = vector.load %arg3[%c0_3, %c0_4] : memref<1x128xf32, #tpu.memory_space<vmem>>, vector<1x128xf32>
    %4 = vector.broadcast %3 : vector<1x128xf32> to vector<32x128xf32>
    %5 = arith.addf %2, %4 : vector<32x128xf32>
    %6 = vector.shape_cast %5 : vector<32x128xf32> to vector<2x16x128xf32>
    %c0_5 = arith.constant 0 : index
    %c0_6 = arith.constant 0 : index
    %7 = vector.load %arg1[%c0_5, %c0_6] : memref<16x128xf32, #tpu.memory_space<vmem>>, vector<16x128xf32>
    %8 = vector.shape_cast %7 : vector<16x128xf32> to vector<1x16x128xf32>
    %9 = vector.broadcast %8 : vector<1x16x128xf32> to vector<2x16x128xf32>
    %10 = arith.addf %6, %9 : vector<2x16x128xf32>
    %11 = vector.shape_cast %10 : vector<2x16x128xf32> to vector<32x128xf32>
    %c0_7 = arith.constant 0 : index
    %c0_8 = arith.constant 0 : index
    %c0_9 = arith.constant 0 : index
    %12 = vector.load %arg4[%c0_7, %c0_8, %c0_9] : memref<2x1x128xf32, #tpu.memory_space<vmem>>, vector<1x1x128xf32>
    %13 = vector.shape_cast %12 : vector<1x1x128xf32> to vector<1x128xf32>
    %c0_10 = arith.constant 0 : index
    %c0_11 = arith.constant 0 : index
    %c0_12 = arith.constant 0 : index
    %14 = vector.load %arg5[%c0_10, %c0_11, %c0_12] : memref<2x1x128xf32, #tpu.memory_space<vmem>>, vector<1x1x128xf32>
    %15 = vector.shape_cast %14 : vector<1x1x128xf32> to vector<1x128xf32>
    %cst_13 = arith.constant dense<0.000000e+00> : vector<32xf32>
    %16 = vector.multi_reduction <add>, %11, %cst_13 [1] : vector<32x128xf32> to vector<32xf32>
    %17 = vector.shape_cast %16 : vector<32xf32> to vector<32x1xf32>
    %cst_14 = arith.constant 1.280000e+02 : f32
    %18 = vector.broadcast %cst_14 : f32 to vector<32x1xf32>
    %19 = arith.divf %17, %18 : vector<32x1xf32>
    %20 = vector.broadcast %19 : vector<32x1xf32> to vector<32x128xf32>
    %21 = arith.subf %11, %20 : vector<32x128xf32>
    %22 = arith.mulf %21, %21 : vector<32x128xf32>
    %cst_15 = arith.constant dense<0.000000e+00> : vector<32xf32>
    %23 = vector.multi_reduction <add>, %22, %cst_15 [1] : vector<32x128xf32> to vector<32xf32>
    %24 = vector.shape_cast %23 : vector<32xf32> to vector<32x1xf32>
    %cst_16 = arith.constant 1.280000e+02 : f32
    %25 = vector.broadcast %cst_16 : f32 to vector<32x1xf32>
    %26 = arith.divf %24, %25 : vector<32x1xf32>
    %27 = vector.broadcast %19 : vector<32x1xf32> to vector<32x128xf32>
    %28 = arith.subf %11, %27 : vector<32x128xf32>
    %cst_17 = arith.constant 9.99999974E-6 : f32
    %29 = vector.broadcast %cst_17 : f32 to vector<32x1xf32>
    %30 = arith.addf %26, %29 : vector<32x1xf32>
    %31 = math.rsqrt %30 : vector<32x1xf32>
    %32 = vector.broadcast %31 : vector<32x1xf32> to vector<32x128xf32>
    %33 = arith.mulf %28, %32 : vector<32x128xf32>
    %34 = vector.broadcast %13 : vector<1x128xf32> to vector<32x128xf32>
    %35 = arith.mulf %33, %34 : vector<32x128xf32>
    %36 = vector.broadcast %15 : vector<1x128xf32> to vector<32x128xf32>
    %37 = arith.addf %35, %36 : vector<32x128xf32>
    %38 = arith.truncf %37 : vector<32x128xf32> to vector<32x128xbf16>
    %c0_18 = arith.constant 0 : index
    %c0_19 = arith.constant 0 : index
    %c0_20 = arith.constant 0 : index
    %39 = vector.load %arg6[%c0_18, %c0_19, %c0_20] : memref<2x128x384xbf16, #tpu.memory_space<vmem>>, vector<1x128x384xbf16>
    %40 = vector.shape_cast %39 : vector<1x128x384xbf16> to vector<128x384xbf16>
    %cst_21 = arith.constant dense<0.000000e+00> : vector<32x384xf32>
    %41 = tpu.matmul %38, %40, %cst_21 {dimension_numbers = #tpu.dot_dimension_numbers<[1], [0], [0], [1], [0, 0, 1, 1], [], []>} : vector<32x128xbf16>, vector<128x384xbf16>, vector<32x384xf32> -> vector<32x384xf32>
    %c0_22 = arith.constant 0 : index
    %c0_23 = arith.constant 0 : index
    %c0_24 = arith.constant 0 : index
    %42 = vector.load %arg7[%c0_22, %c0_23, %c0_24] : memref<2x1x384xf32, #tpu.memory_space<vmem>>, vector<1x1x384xf32>
    %43 = vector.shape_cast %42 : vector<1x1x384xf32> to vector<1x384xf32>
    %44 = vector.broadcast %43 : vector<1x384xf32> to vector<32x384xf32>
    %45 = arith.addf %41, %44 : vector<32x384xf32>
    %46 = vector.extract_strided_slice %45 {offsets = [0, 0], sizes = [32, 128], strides = [1, 1]} : vector<32x384xf32> to vector<32x128xf32>
    %47 = vector.shape_cast %46 : vector<32x128xf32> to vector<2x16x128xf32>
    %48 = vector.extract_strided_slice %45 {offsets = [0, 128], sizes = [32, 128], strides = [1, 1]} : vector<32x384xf32> to vector<32x128xf32>
    %49 = vector.shape_cast %48 : vector<32x128xf32> to vector<2x16x128xf32>
    %50 = vector.extract_strided_slice %45 {offsets = [0, 256], sizes = [32, 128], strides = [1, 1]} : vector<32x384xf32> to vector<32x128xf32>
    %51 = vector.shape_cast %50 : vector<32x128xf32> to vector<2x16x128xf32>
    %52 = vector.extract_strided_slice %47 {offsets = [0, 0, 0], sizes = [2, 16, 32], strides = [1, 1, 1]} : vector<2x16x128xf32> to vector<2x16x32xf32>
    %53 = vector.extract_strided_slice %49 {offsets = [0, 0, 0], sizes = [2, 16, 32], strides = [1, 1, 1]} : vector<2x16x128xf32> to vector<2x16x32xf32>
    %54 = vector.extract_strided_slice %51 {offsets = [0, 0, 0], sizes = [2, 16, 32], strides = [1, 1, 1]} : vector<2x16x128xf32> to vector<2x16x32xf32>
    %55 = arith.truncf %52 : vector<2x16x32xf32> to vector<2x16x32xbf16>
    %56 = arith.truncf %53 : vector<2x16x32xf32> to vector<2x16x32xbf16>
    "tpu.trace_start"() <{level = 10 : i32, message = "bqd,bkd->bqk"}> : () -> ()
    %cst_25 = arith.constant dense<0.000000e+00> : vector<2x16x16xf32>
    %57 = tpu.matmul %55, %56, %cst_25 {dimension_numbers = #tpu.dot_dimension_numbers<[2], [2], [1], [1], [0, 0, 0, 1, 1, 1], [0], [0]>} : vector<2x16x32xbf16>, vector<2x16x32xbf16>, vector<2x16x16xf32> -> vector<2x16x16xf32>
    "tpu.trace_stop"() : () -> ()
    %cst_26 = arith.constant 0.176776692 : f32
    %58 = vector.broadcast %cst_26 : f32 to vector<2x16x16xf32>
    %59 = arith.mulf %57, %58 : vector<2x16x16xf32>
    %cst_27 = arith.constant dense<0xFF800000> : vector<2x16xf32>
    %60 = vector.multi_reduction <maximumf>, %59, %cst_27 [2] : vector<2x16x16xf32> to vector<2x16xf32>
    %61 = vector.shape_cast %60 : vector<2x16xf32> to vector<2x16x1xf32>
    %62 = vector.broadcast %61 : vector<2x16x1xf32> to vector<2x16x16xf32>
    %63 = arith.subf %59, %62 : vector<2x16x16xf32>
    %64 = math.exp %63 : vector<2x16x16xf32>
    %cst_28 = arith.constant dense<0.000000e+00> : vector<2x16xf32>
    %65 = vector.multi_reduction <add>, %64, %cst_28 [2] : vector<2x16x16xf32> to vector<2x16xf32>
    %66 = vector.shape_cast %65 : vector<2x16xf32> to vector<2x16x1xf32>
    %67 = tpu.reciprocal %66 {approx = true} : vector<2x16x1xf32> -> vector<2x16x1xf32>
    %68 = vector.broadcast %67 : vector<2x16x1xf32> to vector<2x16x16xf32>
    %69 = arith.mulf %64, %68 : vector<2x16x16xf32>
    %70 = arith.truncf %69 : vector<2x16x16xf32> to vector<2x16x16xbf16>
    %71 = arith.truncf %54 : vector<2x16x32xf32> to vector<2x16x32xbf16>
    "tpu.trace_start"() <{level = 10 : i32, message = "bqk,bkd->bqd"}> : () -> ()
    %cst_29 = arith.constant dense<0.000000e+00> : vector<2x16x32xf32>
    %72 = tpu.matmul %70, %71, %cst_29 {dimension_numbers = #tpu.dot_dimension_numbers<[2], [1], [1], [2], [0, 0, 0, 1, 1, 2], [0], [0]>} : vector<2x16x16xbf16>, vector<2x16x32xbf16>, vector<2x16x32xf32> -> vector<2x16x32xf32>
    "tpu.trace_stop"() : () -> ()
    %73 = vector.extract_strided_slice %47 {offsets = [0, 0, 32], sizes = [2, 16, 32], strides = [1, 1, 1]} : vector<2x16x128xf32> to vector<2x16x32xf32>
    %74 = vector.extract_strided_slice %49 {offsets = [0, 0, 32], sizes = [2, 16, 32], strides = [1, 1, 1]} : vector<2x16x128xf32> to vector<2x16x32xf32>
    %75 = vector.extract_strided_slice %51 {offsets = [0, 0, 32], sizes = [2, 16, 32], strides = [1, 1, 1]} : vector<2x16x128xf32> to vector<2x16x32xf32>
    %76 = arith.truncf %73 : vector<2x16x32xf32> to vector<2x16x32xbf16>
    %77 = arith.truncf %74 : vector<2x16x32xf32> to vector<2x16x32xbf16>
    "tpu.trace_start"() <{level = 10 : i32, message = "bqd,bkd->bqk"}> : () -> ()
    %cst_30 = arith.constant dense<0.000000e+00> : vector<2x16x16xf32>
    %78 = tpu.matmul %76, %77, %cst_30 {dimension_numbers = #tpu.dot_dimension_numbers<[2], [2], [1], [1], [0, 0, 0, 1, 1, 1], [0], [0]>} : vector<2x16x32xbf16>, vector<2x16x32xbf16>, vector<2x16x16xf32> -> vector<2x16x16xf32>
    "tpu.trace_stop"() : () -> ()
    %cst_31 = arith.constant 0.176776692 : f32
    %79 = vector.broadcast %cst_31 : f32 to vector<2x16x16xf32>
    %80 = arith.mulf %78, %79 : vector<2x16x16xf32>
    %cst_32 = arith.constant dense<0xFF800000> : vector<2x16xf32>
    %81 = vector.multi_reduction <maximumf>, %80, %cst_32 [2] : vector<2x16x16xf32> to vector<2x16xf32>
    %82 = vector.shape_cast %81 : vector<2x16xf32> to vector<2x16x1xf32>
    %83 = vector.broadcast %82 : vector<2x16x1xf32> to vector<2x16x16xf32>
    %84 = arith.subf %80, %83 : vector<2x16x16xf32>
    %85 = math.exp %84 : vector<2x16x16xf32>
    %cst_33 = arith.constant dense<0.000000e+00> : vector<2x16xf32>
    %86 = vector.multi_reduction <add>, %85, %cst_33 [2] : vector<2x16x16xf32> to vector<2x16xf32>
    %87 = vector.shape_cast %86 : vector<2x16xf32> to vector<2x16x1xf32>
    %88 = tpu.reciprocal %87 {approx = true} : vector<2x16x1xf32> -> vector<2x16x1xf32>
    %89 = vector.broadcast %88 : vector<2x16x1xf32> to vector<2x16x16xf32>
    %90 = arith.mulf %85, %89 : vector<2x16x16xf32>
    %91 = arith.truncf %90 : vector<2x16x16xf32> to vector<2x16x16xbf16>
    %92 = arith.truncf %75 : vector<2x16x32xf32> to vector<2x16x32xbf16>
    "tpu.trace_start"() <{level = 10 : i32, message = "bqk,bkd->bqd"}> : () -> ()
    %cst_34 = arith.constant dense<0.000000e+00> : vector<2x16x32xf32>
    %93 = tpu.matmul %91, %92, %cst_34 {dimension_numbers = #tpu.dot_dimension_numbers<[2], [1], [1], [2], [0, 0, 0, 1, 1, 2], [0], [0]>} : vector<2x16x16xbf16>, vector<2x16x32xbf16>, vector<2x16x32xf32> -> vector<2x16x32xf32>
    "tpu.trace_stop"() : () -> ()
    %94 = vector.extract_strided_slice %47 {offsets = [0, 0, 64], sizes = [2, 16, 32], strides = [1, 1, 1]} : vector<2x16x128xf32> to vector<2x16x32xf32>
    %95 = vector.extract_strided_slice %49 {offsets = [0, 0, 64], sizes = [2, 16, 32], strides = [1, 1, 1]} : vector<2x16x128xf32> to vector<2x16x32xf32>
    %96 = vector.extract_strided_slice %51 {offsets = [0, 0, 64], sizes = [2, 16, 32], strides = [1, 1, 1]} : vector<2x16x128xf32> to vector<2x16x32xf32>
    %97 = arith.truncf %94 : vector<2x16x32xf32> to vector<2x16x32xbf16>
    %98 = arith.truncf %95 : vector<2x16x32xf32> to vector<2x16x32xbf16>
    "tpu.trace_start"() <{level = 10 : i32, message = "bqd,bkd->bqk"}> : () -> ()
    %cst_35 = arith.constant dense<0.000000e+00> : vector<2x16x16xf32>
    %99 = tpu.matmul %97, %98, %cst_35 {dimension_numbers = #tpu.dot_dimension_numbers<[2], [2], [1], [1], [0, 0, 0, 1, 1, 1], [0], [0]>} : vector<2x16x32xbf16>, vector<2x16x32xbf16>, vector<2x16x16xf32> -> vector<2x16x16xf32>
    "tpu.trace_stop"() : () -> ()
    %cst_36 = arith.constant 0.176776692 : f32
    %100 = vector.broadcast %cst_36 : f32 to vector<2x16x16xf32>
    %101 = arith.mulf %99, %100 : vector<2x16x16xf32>
    %cst_37 = arith.constant dense<0xFF800000> : vector<2x16xf32>
    %102 = vector.multi_reduction <maximumf>, %101, %cst_37 [2] : vector<2x16x16xf32> to vector<2x16xf32>
    %103 = vector.shape_cast %102 : vector<2x16xf32> to vector<2x16x1xf32>
    %104 = vector.broadcast %103 : vector<2x16x1xf32> to vector<2x16x16xf32>
    %105 = arith.subf %101, %104 : vector<2x16x16xf32>
    %106 = math.exp %105 : vector<2x16x16xf32>
    %cst_38 = arith.constant dense<0.000000e+00> : vector<2x16xf32>
    %107 = vector.multi_reduction <add>, %106, %cst_38 [2] : vector<2x16x16xf32> to vector<2x16xf32>
    %108 = vector.shape_cast %107 : vector<2x16xf32> to vector<2x16x1xf32>
    %109 = tpu.reciprocal %108 {approx = true} : vector<2x16x1xf32> -> vector<2x16x1xf32>
    %110 = vector.broadcast %109 : vector<2x16x1xf32> to vector<2x16x16xf32>
    %111 = arith.mulf %106, %110 : vector<2x16x16xf32>
    %112 = arith.truncf %111 : vector<2x16x16xf32> to vector<2x16x16xbf16>
    %113 = arith.truncf %96 : vector<2x16x32xf32> to vector<2x16x32xbf16>
    "tpu.trace_start"() <{level = 10 : i32, message = "bqk,bkd->bqd"}> : () -> ()
    %cst_39 = arith.constant dense<0.000000e+00> : vector<2x16x32xf32>
    %114 = tpu.matmul %112, %113, %cst_39 {dimension_numbers = #tpu.dot_dimension_numbers<[2], [1], [1], [2], [0, 0, 0, 1, 1, 2], [0], [0]>} : vector<2x16x16xbf16>, vector<2x16x32xbf16>, vector<2x16x32xf32> -> vector<2x16x32xf32>
    "tpu.trace_stop"() : () -> ()
    %115 = vector.extract_strided_slice %47 {offsets = [0, 0, 96], sizes = [2, 16, 32], strides = [1, 1, 1]} : vector<2x16x128xf32> to vector<2x16x32xf32>
    %116 = vector.extract_strided_slice %49 {offsets = [0, 0, 96], sizes = [2, 16, 32], strides = [1, 1, 1]} : vector<2x16x128xf32> to vector<2x16x32xf32>
    %117 = vector.extract_strided_slice %51 {offsets = [0, 0, 96], sizes = [2, 16, 32], strides = [1, 1, 1]} : vector<2x16x128xf32> to vector<2x16x32xf32>
    %118 = arith.truncf %115 : vector<2x16x32xf32> to vector<2x16x32xbf16>
    %119 = arith.truncf %116 : vector<2x16x32xf32> to vector<2x16x32xbf16>
    "tpu.trace_start"() <{level = 10 : i32, message = "bqd,bkd->bqk"}> : () -> ()
    %cst_40 = arith.constant dense<0.000000e+00> : vector<2x16x16xf32>
    %120 = tpu.matmul %118, %119, %cst_40 {dimension_numbers = #tpu.dot_dimension_numbers<[2], [2], [1], [1], [0, 0, 0, 1, 1, 1], [0], [0]>} : vector<2x16x32xbf16>, vector<2x16x32xbf16>, vector<2x16x16xf32> -> vector<2x16x16xf32>
    "tpu.trace_stop"() : () -> ()
    %cst_41 = arith.constant 0.176776692 : f32
    %121 = vector.broadcast %cst_41 : f32 to vector<2x16x16xf32>
    %122 = arith.mulf %120, %121 : vector<2x16x16xf32>
    %cst_42 = arith.constant dense<0xFF800000> : vector<2x16xf32>
    %123 = vector.multi_reduction <maximumf>, %122, %cst_42 [2] : vector<2x16x16xf32> to vector<2x16xf32>
    %124 = vector.shape_cast %123 : vector<2x16xf32> to vector<2x16x1xf32>
    %125 = vector.broadcast %124 : vector<2x16x1xf32> to vector<2x16x16xf32>
    %126 = arith.subf %122, %125 : vector<2x16x16xf32>
    %127 = math.exp %126 : vector<2x16x16xf32>
    %cst_43 = arith.constant dense<0.000000e+00> : vector<2x16xf32>
    %128 = vector.multi_reduction <add>, %127, %cst_43 [2] : vector<2x16x16xf32> to vector<2x16xf32>
    %129 = vector.shape_cast %128 : vector<2x16xf32> to vector<2x16x1xf32>
    %130 = tpu.reciprocal %129 {approx = true} : vector<2x16x1xf32> -> vector<2x16x1xf32>
    %131 = vector.broadcast %130 : vector<2x16x1xf32> to vector<2x16x16xf32>
    %132 = arith.mulf %127, %131 : vector<2x16x16xf32>
    %133 = arith.truncf %132 : vector<2x16x16xf32> to vector<2x16x16xbf16>
    %134 = arith.truncf %117 : vector<2x16x32xf32> to vector<2x16x32xbf16>
    "tpu.trace_start"() <{level = 10 : i32, message = "bqk,bkd->bqd"}> : () -> ()
    %cst_44 = arith.constant dense<0.000000e+00> : vector<2x16x32xf32>
    %135 = tpu.matmul %133, %134, %cst_44 {dimension_numbers = #tpu.dot_dimension_numbers<[2], [1], [1], [2], [0, 0, 0, 1, 1, 2], [0], [0]>} : vector<2x16x16xbf16>, vector<2x16x32xbf16>, vector<2x16x32xf32> -> vector<2x16x32xf32>
    "tpu.trace_stop"() : () -> ()
    %136 = tpu.concatenate %72, %93, %114, %135 in 2 : vector<2x16x32xf32>, vector<2x16x32xf32>, vector<2x16x32xf32>, vector<2x16x32xf32> -> vector<2x16x128xf32>
    %137 = vector.shape_cast %136 : vector<2x16x128xf32> to vector<32x128xf32>
    %138 = arith.truncf %137 : vector<32x128xf32> to vector<32x128xbf16>
    %c0_45 = arith.constant 0 : index
    %c0_46 = arith.constant 0 : index
    %c0_47 = arith.constant 0 : index
    %139 = vector.load %arg8[%c0_45, %c0_46, %c0_47] : memref<2x128x128xbf16, #tpu.memory_space<vmem>>, vector<1x128x128xbf16>
    %140 = vector.shape_cast %139 : vector<1x128x128xbf16> to vector<128x128xbf16>
    %cst_48 = arith.constant dense<0.000000e+00> : vector<32x128xf32>
    %141 = tpu.matmul %138, %140, %cst_48 {dimension_numbers = #tpu.dot_dimension_numbers<[1], [0], [0], [1], [0, 0, 1, 1], [], []>} : vector<32x128xbf16>, vector<128x128xbf16>, vector<32x128xf32> -> vector<32x128xf32>
    %c0_49 = arith.constant 0 : index
    %c0_50 = arith.constant 0 : index
    %c0_51 = arith.constant 0 : index
    %142 = vector.load %arg9[%c0_49, %c0_50, %c0_51] : memref<2x1x128xf32, #tpu.memory_space<vmem>>, vector<1x1x128xf32>
    %143 = vector.shape_cast %142 : vector<1x1x128xf32> to vector<1x128xf32>
    %144 = vector.broadcast %143 : vector<1x128xf32> to vector<32x128xf32>
    %145 = arith.addf %141, %144 : vector<32x128xf32>
    %146 = arith.addf %11, %145 : vector<32x128xf32>
    %c0_52 = arith.constant 0 : index
    %c0_53 = arith.constant 0 : index
    %c0_54 = arith.constant 0 : index
    %147 = vector.load %arg10[%c0_52, %c0_53, %c0_54] : memref<2x1x128xf32, #tpu.memory_space<vmem>>, vector<1x1x128xf32>
    %148 = vector.shape_cast %147 : vector<1x1x128xf32> to vector<1x128xf32>
    %c0_55 = arith.constant 0 : index
    %c0_56 = arith.constant 0 : index
    %c0_57 = arith.constant 0 : index
    %149 = vector.load %arg11[%c0_55, %c0_56, %c0_57] : memref<2x1x128xf32, #tpu.memory_space<vmem>>, vector<1x1x128xf32>
    %150 = vector.shape_cast %149 : vector<1x1x128xf32> to vector<1x128xf32>
    %cst_58 = arith.constant dense<0.000000e+00> : vector<32xf32>
    %151 = vector.multi_reduction <add>, %146, %cst_58 [1] : vector<32x128xf32> to vector<32xf32>
    %152 = vector.shape_cast %151 : vector<32xf32> to vector<32x1xf32>
    %cst_59 = arith.constant 1.280000e+02 : f32
    %153 = vector.broadcast %cst_59 : f32 to vector<32x1xf32>
    %154 = arith.divf %152, %153 : vector<32x1xf32>
    %155 = vector.broadcast %154 : vector<32x1xf32> to vector<32x128xf32>
    %156 = arith.subf %146, %155 : vector<32x128xf32>
    %157 = arith.mulf %156, %156 : vector<32x128xf32>
    %cst_60 = arith.constant dense<0.000000e+00> : vector<32xf32>
    %158 = vector.multi_reduction <add>, %157, %cst_60 [1] : vector<32x128xf32> to vector<32xf32>
    %159 = vector.shape_cast %158 : vector<32xf32> to vector<32x1xf32>
    %cst_61 = arith.constant 1.280000e+02 : f32
    %160 = vector.broadcast %cst_61 : f32 to vector<32x1xf32>
    %161 = arith.divf %159, %160 : vector<32x1xf32>
    %162 = vector.broadcast %154 : vector<32x1xf32> to vector<32x128xf32>
    %163 = arith.subf %146, %162 : vector<32x128xf32>
    %cst_62 = arith.constant 9.99999974E-6 : f32
    %164 = vector.broadcast %cst_62 : f32 to vector<32x1xf32>
    %165 = arith.addf %161, %164 : vector<32x1xf32>
    %166 = math.rsqrt %165 : vector<32x1xf32>
    %167 = vector.broadcast %166 : vector<32x1xf32> to vector<32x128xf32>
    %168 = arith.mulf %163, %167 : vector<32x128xf32>
    %169 = vector.broadcast %148 : vector<1x128xf32> to vector<32x128xf32>
    %170 = arith.mulf %168, %169 : vector<32x128xf32>
    %171 = vector.broadcast %150 : vector<1x128xf32> to vector<32x128xf32>
    %172 = arith.addf %170, %171 : vector<32x128xf32>
    %173 = arith.truncf %172 : vector<32x128xf32> to vector<32x128xbf16>
    %c0_63 = arith.constant 0 : index
    %c0_64 = arith.constant 0 : index
    %c0_65 = arith.constant 0 : index
    %174 = vector.load %arg12[%c0_63, %c0_64, %c0_65] : memref<2x128x256xbf16, #tpu.memory_space<vmem>>, vector<1x128x256xbf16>
    %175 = vector.shape_cast %174 : vector<1x128x256xbf16> to vector<128x256xbf16>
    %cst_66 = arith.constant dense<0.000000e+00> : vector<32x256xf32>
    %176 = tpu.matmul %173, %175, %cst_66 {dimension_numbers = #tpu.dot_dimension_numbers<[1], [0], [0], [1], [0, 0, 1, 1], [], []>} : vector<32x128xbf16>, vector<128x256xbf16>, vector<32x256xf32> -> vector<32x256xf32>
    %c0_67 = arith.constant 0 : index
    %c0_68 = arith.constant 0 : index
    %c0_69 = arith.constant 0 : index
    %177 = vector.load %arg13[%c0_67, %c0_68, %c0_69] : memref<2x1x256xf32, #tpu.memory_space<vmem>>, vector<1x1x256xf32>
    %178 = vector.shape_cast %177 : vector<1x1x256xf32> to vector<1x256xf32>
    %179 = vector.broadcast %178 : vector<1x256xf32> to vector<32x256xf32>
    %180 = arith.addf %176, %179 : vector<32x256xf32>
    %181 = arith.mulf %180, %180 : vector<32x256xf32>
    %182 = arith.mulf %180, %181 : vector<32x256xf32>
    %cst_70 = arith.constant 4.471500e-02 : f32
    %183 = vector.broadcast %cst_70 : f32 to vector<32x256xf32>
    %184 = arith.mulf %183, %182 : vector<32x256xf32>
    %185 = arith.addf %180, %184 : vector<32x256xf32>
    %cst_71 = arith.constant 0.797884583 : f32
    %186 = vector.broadcast %cst_71 : f32 to vector<32x256xf32>
    %187 = arith.mulf %186, %185 : vector<32x256xf32>
    %188 = math.tanh %187 : vector<32x256xf32>
    %cst_72 = arith.constant 1.000000e+00 : f32
    %189 = vector.broadcast %cst_72 : f32 to vector<32x256xf32>
    %190 = arith.addf %189, %188 : vector<32x256xf32>
    %cst_73 = arith.constant 5.000000e-01 : f32
    %191 = vector.broadcast %cst_73 : f32 to vector<32x256xf32>
    %192 = arith.mulf %191, %190 : vector<32x256xf32>
    %193 = arith.mulf %180, %192 : vector<32x256xf32>
    %194 = arith.truncf %193 : vector<32x256xf32> to vector<32x256xbf16>
    %c0_74 = arith.constant 0 : index
    %c0_75 = arith.constant 0 : index
    %c0_76 = arith.constant 0 : index
    %195 = vector.load %arg14[%c0_74, %c0_75, %c0_76] : memref<2x256x128xbf16, #tpu.memory_space<vmem>>, vector<1x256x128xbf16>
    %196 = vector.shape_cast %195 : vector<1x256x128xbf16> to vector<256x128xbf16>
    %cst_77 = arith.constant dense<0.000000e+00> : vector<32x128xf32>
    %197 = tpu.matmul %194, %196, %cst_77 {dimension_numbers = #tpu.dot_dimension_numbers<[1], [0], [0], [1], [0, 0, 1, 1], [], []>} : vector<32x256xbf16>, vector<256x128xbf16>, vector<32x128xf32> -> vector<32x128xf32>
    %c0_78 = arith.constant 0 : index
    %c0_79 = arith.constant 0 : index
    %c0_80 = arith.constant 0 : index
    %198 = vector.load %arg15[%c0_78, %c0_79, %c0_80] : memref<2x1x128xf32, #tpu.memory_space<vmem>>, vector<1x1x128xf32>
    %199 = vector.shape_cast %198 : vector<1x1x128xf32> to vector<1x128xf32>
    %200 = vector.broadcast %199 : vector<1x128xf32> to vector<32x128xf32>
    %201 = arith.addf %197, %200 : vector<32x128xf32>
    %202 = arith.addf %146, %201 : vector<32x128xf32>
    %c1 = arith.constant 1 : index
    %c0_81 = arith.constant 0 : index
    %c0_82 = arith.constant 0 : index
    %203 = vector.load %arg4[%c1, %c0_81, %c0_82] : memref<2x1x128xf32, #tpu.memory_space<vmem>>, vector<1x1x128xf32>
    %204 = vector.shape_cast %203 : vector<1x1x128xf32> to vector<1x128xf32>
    %c1_83 = arith.constant 1 : index
    %c0_84 = arith.constant 0 : index
    %c0_85 = arith.constant 0 : index
    %205 = vector.load %arg5[%c1_83, %c0_84, %c0_85] : memref<2x1x128xf32, #tpu.memory_space<vmem>>, vector<1x1x128xf32>
    %206 = vector.shape_cast %205 : vector<1x1x128xf32> to vector<1x128xf32>
    %cst_86 = arith.constant dense<0.000000e+00> : vector<32xf32>
    %207 = vector.multi_reduction <add>, %202, %cst_86 [1] : vector<32x128xf32> to vector<32xf32>
    %208 = vector.shape_cast %207 : vector<32xf32> to vector<32x1xf32>
    %cst_87 = arith.constant 1.280000e+02 : f32
    %209 = vector.broadcast %cst_87 : f32 to vector<32x1xf32>
    %210 = arith.divf %208, %209 : vector<32x1xf32>
    %211 = vector.broadcast %210 : vector<32x1xf32> to vector<32x128xf32>
    %212 = arith.subf %202, %211 : vector<32x128xf32>
    %213 = arith.mulf %212, %212 : vector<32x128xf32>
    %cst_88 = arith.constant dense<0.000000e+00> : vector<32xf32>
    %214 = vector.multi_reduction <add>, %213, %cst_88 [1] : vector<32x128xf32> to vector<32xf32>
    %215 = vector.shape_cast %214 : vector<32xf32> to vector<32x1xf32>
    %cst_89 = arith.constant 1.280000e+02 : f32
    %216 = vector.broadcast %cst_89 : f32 to vector<32x1xf32>
    %217 = arith.divf %215, %216 : vector<32x1xf32>
    %218 = vector.broadcast %210 : vector<32x1xf32> to vector<32x128xf32>
    %219 = arith.subf %202, %218 : vector<32x128xf32>
    %cst_90 = arith.constant 9.99999974E-6 : f32
    %220 = vector.broadcast %cst_90 : f32 to vector<32x1xf32>
    %221 = arith.addf %217, %220 : vector<32x1xf32>
    %222 = math.rsqrt %221 : vector<32x1xf32>
    %223 = vector.broadcast %222 : vector<32x1xf32> to vector<32x128xf32>
    %224 = arith.mulf %219, %223 : vector<32x128xf32>
    %225 = vector.broadcast %204 : vector<1x128xf32> to vector<32x128xf32>
    %226 = arith.mulf %224, %225 : vector<32x128xf32>
    %227 = vector.broadcast %206 : vector<1x128xf32> to vector<32x128xf32>
    %228 = arith.addf %226, %227 : vector<32x128xf32>
    %229 = arith.truncf %228 : vector<32x128xf32> to vector<32x128xbf16>
    %c1_91 = arith.constant 1 : index
    %c0_92 = arith.constant 0 : index
    %c0_93 = arith.constant 0 : index
    %230 = vector.load %arg6[%c1_91, %c0_92, %c0_93] : memref<2x128x384xbf16, #tpu.memory_space<vmem>>, vector<1x128x384xbf16>
    %231 = vector.shape_cast %230 : vector<1x128x384xbf16> to vector<128x384xbf16>
    %cst_94 = arith.constant dense<0.000000e+00> : vector<32x384xf32>
    %232 = tpu.matmul %229, %231, %cst_94 {dimension_numbers = #tpu.dot_dimension_numbers<[1], [0], [0], [1], [0, 0, 1, 1], [], []>} : vector<32x128xbf16>, vector<128x384xbf16>, vector<32x384xf32> -> vector<32x384xf32>
    %c1_95 = arith.constant 1 : index
    %c0_96 = arith.constant 0 : index
    %c0_97 = arith.constant 0 : index
    %233 = vector.load %arg7[%c1_95, %c0_96, %c0_97] : memref<2x1x384xf32, #tpu.memory_space<vmem>>, vector<1x1x384xf32>
    %234 = vector.shape_cast %233 : vector<1x1x384xf32> to vector<1x384xf32>
    %235 = vector.broadcast %234 : vector<1x384xf32> to vector<32x384xf32>
    %236 = arith.addf %232, %235 : vector<32x384xf32>
    %237 = vector.extract_strided_slice %236 {offsets = [0, 0], sizes = [32, 128], strides = [1, 1]} : vector<32x384xf32> to vector<32x128xf32>
    %238 = vector.shape_cast %237 : vector<32x128xf32> to vector<2x16x128xf32>
    %239 = vector.extract_strided_slice %236 {offsets = [0, 128], sizes = [32, 128], strides = [1, 1]} : vector<32x384xf32> to vector<32x128xf32>
    %240 = vector.shape_cast %239 : vector<32x128xf32> to vector<2x16x128xf32>
    %241 = vector.extract_strided_slice %236 {offsets = [0, 256], sizes = [32, 128], strides = [1, 1]} : vector<32x384xf32> to vector<32x128xf32>
    %242 = vector.shape_cast %241 : vector<32x128xf32> to vector<2x16x128xf32>
    %243 = vector.extract_strided_slice %238 {offsets = [0, 0, 0], sizes = [2, 16, 32], strides = [1, 1, 1]} : vector<2x16x128xf32> to vector<2x16x32xf32>
    %244 = vector.extract_strided_slice %240 {offsets = [0, 0, 0], sizes = [2, 16, 32], strides = [1, 1, 1]} : vector<2x16x128xf32> to vector<2x16x32xf32>
    %245 = vector.extract_strided_slice %242 {offsets = [0, 0, 0], sizes = [2, 16, 32], strides = [1, 1, 1]} : vector<2x16x128xf32> to vector<2x16x32xf32>
    %246 = arith.truncf %243 : vector<2x16x32xf32> to vector<2x16x32xbf16>
    %247 = arith.truncf %244 : vector<2x16x32xf32> to vector<2x16x32xbf16>
    "tpu.trace_start"() <{level = 10 : i32, message = "bqd,bkd->bqk"}> : () -> ()
    %cst_98 = arith.constant dense<0.000000e+00> : vector<2x16x16xf32>
    %248 = tpu.matmul %246, %247, %cst_98 {dimension_numbers = #tpu.dot_dimension_numbers<[2], [2], [1], [1], [0, 0, 0, 1, 1, 1], [0], [0]>} : vector<2x16x32xbf16>, vector<2x16x32xbf16>, vector<2x16x16xf32> -> vector<2x16x16xf32>
    "tpu.trace_stop"() : () -> ()
    %cst_99 = arith.constant 0.176776692 : f32
    %249 = vector.broadcast %cst_99 : f32 to vector<2x16x16xf32>
    %250 = arith.mulf %248, %249 : vector<2x16x16xf32>
    %cst_100 = arith.constant dense<0xFF800000> : vector<2x16xf32>
    %251 = vector.multi_reduction <maximumf>, %250, %cst_100 [2] : vector<2x16x16xf32> to vector<2x16xf32>
    %252 = vector.shape_cast %251 : vector<2x16xf32> to vector<2x16x1xf32>
    %253 = vector.broadcast %252 : vector<2x16x1xf32> to vector<2x16x16xf32>
    %254 = arith.subf %250, %253 : vector<2x16x16xf32>
    %255 = math.exp %254 : vector<2x16x16xf32>
    %cst_101 = arith.constant dense<0.000000e+00> : vector<2x16xf32>
    %256 = vector.multi_reduction <add>, %255, %cst_101 [2] : vector<2x16x16xf32> to vector<2x16xf32>
    %257 = vector.shape_cast %256 : vector<2x16xf32> to vector<2x16x1xf32>
    %258 = tpu.reciprocal %257 {approx = true} : vector<2x16x1xf32> -> vector<2x16x1xf32>
    %259 = vector.broadcast %258 : vector<2x16x1xf32> to vector<2x16x16xf32>
    %260 = arith.mulf %255, %259 : vector<2x16x16xf32>
    %261 = arith.truncf %260 : vector<2x16x16xf32> to vector<2x16x16xbf16>
    %262 = arith.truncf %245 : vector<2x16x32xf32> to vector<2x16x32xbf16>
    "tpu.trace_start"() <{level = 10 : i32, message = "bqk,bkd->bqd"}> : () -> ()
    %cst_102 = arith.constant dense<0.000000e+00> : vector<2x16x32xf32>
    %263 = tpu.matmul %261, %262, %cst_102 {dimension_numbers = #tpu.dot_dimension_numbers<[2], [1], [1], [2], [0, 0, 0, 1, 1, 2], [0], [0]>} : vector<2x16x16xbf16>, vector<2x16x32xbf16>, vector<2x16x32xf32> -> vector<2x16x32xf32>
    "tpu.trace_stop"() : () -> ()
    %264 = vector.extract_strided_slice %238 {offsets = [0, 0, 32], sizes = [2, 16, 32], strides = [1, 1, 1]} : vector<2x16x128xf32> to vector<2x16x32xf32>
    %265 = vector.extract_strided_slice %240 {offsets = [0, 0, 32], sizes = [2, 16, 32], strides = [1, 1, 1]} : vector<2x16x128xf32> to vector<2x16x32xf32>
    %266 = vector.extract_strided_slice %242 {offsets = [0, 0, 32], sizes = [2, 16, 32], strides = [1, 1, 1]} : vector<2x16x128xf32> to vector<2x16x32xf32>
    %267 = arith.truncf %264 : vector<2x16x32xf32> to vector<2x16x32xbf16>
    %268 = arith.truncf %265 : vector<2x16x32xf32> to vector<2x16x32xbf16>
    "tpu.trace_start"() <{level = 10 : i32, message = "bqd,bkd->bqk"}> : () -> ()
    %cst_103 = arith.constant dense<0.000000e+00> : vector<2x16x16xf32>
    %269 = tpu.matmul %267, %268, %cst_103 {dimension_numbers = #tpu.dot_dimension_numbers<[2], [2], [1], [1], [0, 0, 0, 1, 1, 1], [0], [0]>} : vector<2x16x32xbf16>, vector<2x16x32xbf16>, vector<2x16x16xf32> -> vector<2x16x16xf32>
    "tpu.trace_stop"() : () -> ()
    %cst_104 = arith.constant 0.176776692 : f32
    %270 = vector.broadcast %cst_104 : f32 to vector<2x16x16xf32>
    %271 = arith.mulf %269, %270 : vector<2x16x16xf32>
    %cst_105 = arith.constant dense<0xFF800000> : vector<2x16xf32>
    %272 = vector.multi_reduction <maximumf>, %271, %cst_105 [2] : vector<2x16x16xf32> to vector<2x16xf32>
    %273 = vector.shape_cast %272 : vector<2x16xf32> to vector<2x16x1xf32>
    %274 = vector.broadcast %273 : vector<2x16x1xf32> to vector<2x16x16xf32>
    %275 = arith.subf %271, %274 : vector<2x16x16xf32>
    %276 = math.exp %275 : vector<2x16x16xf32>
    %cst_106 = arith.constant dense<0.000000e+00> : vector<2x16xf32>
    %277 = vector.multi_reduction <add>, %276, %cst_106 [2] : vector<2x16x16xf32> to vector<2x16xf32>
    %278 = vector.shape_cast %277 : vector<2x16xf32> to vector<2x16x1xf32>
    %279 = tpu.reciprocal %278 {approx = true} : vector<2x16x1xf32> -> vector<2x16x1xf32>
    %280 = vector.broadcast %279 : vector<2x16x1xf32> to vector<2x16x16xf32>
    %281 = arith.mulf %276, %280 : vector<2x16x16xf32>
    %282 = arith.truncf %281 : vector<2x16x16xf32> to vector<2x16x16xbf16>
    %283 = arith.truncf %266 : vector<2x16x32xf32> to vector<2x16x32xbf16>
    "tpu.trace_start"() <{level = 10 : i32, message = "bqk,bkd->bqd"}> : () -> ()
    %cst_107 = arith.constant dense<0.000000e+00> : vector<2x16x32xf32>
    %284 = tpu.matmul %282, %283, %cst_107 {dimension_numbers = #tpu.dot_dimension_numbers<[2], [1], [1], [2], [0, 0, 0, 1, 1, 2], [0], [0]>} : vector<2x16x16xbf16>, vector<2x16x32xbf16>, vector<2x16x32xf32> -> vector<2x16x32xf32>
    "tpu.trace_stop"() : () -> ()
    %285 = vector.extract_strided_slice %238 {offsets = [0, 0, 64], sizes = [2, 16, 32], strides = [1, 1, 1]} : vector<2x16x128xf32> to vector<2x16x32xf32>
    %286 = vector.extract_strided_slice %240 {offsets = [0, 0, 64], sizes = [2, 16, 32], strides = [1, 1, 1]} : vector<2x16x128xf32> to vector<2x16x32xf32>
    %287 = vector.extract_strided_slice %242 {offsets = [0, 0, 64], sizes = [2, 16, 32], strides = [1, 1, 1]} : vector<2x16x128xf32> to vector<2x16x32xf32>
    %288 = arith.truncf %285 : vector<2x16x32xf32> to vector<2x16x32xbf16>
    %289 = arith.truncf %286 : vector<2x16x32xf32> to vector<2x16x32xbf16>
    "tpu.trace_start"() <{level = 10 : i32, message = "bqd,bkd->bqk"}> : () -> ()
    %cst_108 = arith.constant dense<0.000000e+00> : vector<2x16x16xf32>
    %290 = tpu.matmul %288, %289, %cst_108 {dimension_numbers = #tpu.dot_dimension_numbers<[2], [2], [1], [1], [0, 0, 0, 1, 1, 1], [0], [0]>} : vector<2x16x32xbf16>, vector<2x16x32xbf16>, vector<2x16x16xf32> -> vector<2x16x16xf32>
    "tpu.trace_stop"() : () -> ()
    %cst_109 = arith.constant 0.176776692 : f32
    %291 = vector.broadcast %cst_109 : f32 to vector<2x16x16xf32>
    %292 = arith.mulf %290, %291 : vector<2x16x16xf32>
    %cst_110 = arith.constant dense<0xFF800000> : vector<2x16xf32>
    %293 = vector.multi_reduction <maximumf>, %292, %cst_110 [2] : vector<2x16x16xf32> to vector<2x16xf32>
    %294 = vector.shape_cast %293 : vector<2x16xf32> to vector<2x16x1xf32>
    %295 = vector.broadcast %294 : vector<2x16x1xf32> to vector<2x16x16xf32>
    %296 = arith.subf %292, %295 : vector<2x16x16xf32>
    %297 = math.exp %296 : vector<2x16x16xf32>
    %cst_111 = arith.constant dense<0.000000e+00> : vector<2x16xf32>
    %298 = vector.multi_reduction <add>, %297, %cst_111 [2] : vector<2x16x16xf32> to vector<2x16xf32>
    %299 = vector.shape_cast %298 : vector<2x16xf32> to vector<2x16x1xf32>
    %300 = tpu.reciprocal %299 {approx = true} : vector<2x16x1xf32> -> vector<2x16x1xf32>
    %301 = vector.broadcast %300 : vector<2x16x1xf32> to vector<2x16x16xf32>
    %302 = arith.mulf %297, %301 : vector<2x16x16xf32>
    %303 = arith.truncf %302 : vector<2x16x16xf32> to vector<2x16x16xbf16>
    %304 = arith.truncf %287 : vector<2x16x32xf32> to vector<2x16x32xbf16>
    "tpu.trace_start"() <{level = 10 : i32, message = "bqk,bkd->bqd"}> : () -> ()
    %cst_112 = arith.constant dense<0.000000e+00> : vector<2x16x32xf32>
    %305 = tpu.matmul %303, %304, %cst_112 {dimension_numbers = #tpu.dot_dimension_numbers<[2], [1], [1], [2], [0, 0, 0, 1, 1, 2], [0], [0]>} : vector<2x16x16xbf16>, vector<2x16x32xbf16>, vector<2x16x32xf32> -> vector<2x16x32xf32>
    "tpu.trace_stop"() : () -> ()
    %306 = vector.extract_strided_slice %238 {offsets = [0, 0, 96], sizes = [2, 16, 32], strides = [1, 1, 1]} : vector<2x16x128xf32> to vector<2x16x32xf32>
    %307 = vector.extract_strided_slice %240 {offsets = [0, 0, 96], sizes = [2, 16, 32], strides = [1, 1, 1]} : vector<2x16x128xf32> to vector<2x16x32xf32>
    %308 = vector.extract_strided_slice %242 {offsets = [0, 0, 96], sizes = [2, 16, 32], strides = [1, 1, 1]} : vector<2x16x128xf32> to vector<2x16x32xf32>
    %309 = arith.truncf %306 : vector<2x16x32xf32> to vector<2x16x32xbf16>
    %310 = arith.truncf %307 : vector<2x16x32xf32> to vector<2x16x32xbf16>
    "tpu.trace_start"() <{level = 10 : i32, message = "bqd,bkd->bqk"}> : () -> ()
    %cst_113 = arith.constant dense<0.000000e+00> : vector<2x16x16xf32>
    %311 = tpu.matmul %309, %310, %cst_113 {dimension_numbers = #tpu.dot_dimension_numbers<[2], [2], [1], [1], [0, 0, 0, 1, 1, 1], [0], [0]>} : vector<2x16x32xbf16>, vector<2x16x32xbf16>, vector<2x16x16xf32> -> vector<2x16x16xf32>
    "tpu.trace_stop"() : () -> ()
    %cst_114 = arith.constant 0.176776692 : f32
    %312 = vector.broadcast %cst_114 : f32 to vector<2x16x16xf32>
    %313 = arith.mulf %311, %312 : vector<2x16x16xf32>
    %cst_115 = arith.constant dense<0xFF800000> : vector<2x16xf32>
    %314 = vector.multi_reduction <maximumf>, %313, %cst_115 [2] : vector<2x16x16xf32> to vector<2x16xf32>
    %315 = vector.shape_cast %314 : vector<2x16xf32> to vector<2x16x1xf32>
    %316 = vector.broadcast %315 : vector<2x16x1xf32> to vector<2x16x16xf32>
    %317 = arith.subf %313, %316 : vector<2x16x16xf32>
    %318 = math.exp %317 : vector<2x16x16xf32>
    %cst_116 = arith.constant dense<0.000000e+00> : vector<2x16xf32>
    %319 = vector.multi_reduction <add>, %318, %cst_116 [2] : vector<2x16x16xf32> to vector<2x16xf32>
    %320 = vector.shape_cast %319 : vector<2x16xf32> to vector<2x16x1xf32>
    %321 = tpu.reciprocal %320 {approx = true} : vector<2x16x1xf32> -> vector<2x16x1xf32>
    %322 = vector.broadcast %321 : vector<2x16x1xf32> to vector<2x16x16xf32>
    %323 = arith.mulf %318, %322 : vector<2x16x16xf32>
    %324 = arith.truncf %323 : vector<2x16x16xf32> to vector<2x16x16xbf16>
    %325 = arith.truncf %308 : vector<2x16x32xf32> to vector<2x16x32xbf16>
    "tpu.trace_start"() <{level = 10 : i32, message = "bqk,bkd->bqd"}> : () -> ()
    %cst_117 = arith.constant dense<0.000000e+00> : vector<2x16x32xf32>
    %326 = tpu.matmul %324, %325, %cst_117 {dimension_numbers = #tpu.dot_dimension_numbers<[2], [1], [1], [2], [0, 0, 0, 1, 1, 2], [0], [0]>} : vector<2x16x16xbf16>, vector<2x16x32xbf16>, vector<2x16x32xf32> -> vector<2x16x32xf32>
    "tpu.trace_stop"() : () -> ()
    %327 = tpu.concatenate %263, %284, %305, %326 in 2 : vector<2x16x32xf32>, vector<2x16x32xf32>, vector<2x16x32xf32>, vector<2x16x32xf32> -> vector<2x16x128xf32>
    %328 = vector.shape_cast %327 : vector<2x16x128xf32> to vector<32x128xf32>
    %329 = arith.truncf %328 : vector<32x128xf32> to vector<32x128xbf16>
    %c1_118 = arith.constant 1 : index
    %c0_119 = arith.constant 0 : index
    %c0_120 = arith.constant 0 : index
    %330 = vector.load %arg8[%c1_118, %c0_119, %c0_120] : memref<2x128x128xbf16, #tpu.memory_space<vmem>>, vector<1x128x128xbf16>
    %331 = vector.shape_cast %330 : vector<1x128x128xbf16> to vector<128x128xbf16>
    %cst_121 = arith.constant dense<0.000000e+00> : vector<32x128xf32>
    %332 = tpu.matmul %329, %331, %cst_121 {dimension_numbers = #tpu.dot_dimension_numbers<[1], [0], [0], [1], [0, 0, 1, 1], [], []>} : vector<32x128xbf16>, vector<128x128xbf16>, vector<32x128xf32> -> vector<32x128xf32>
    %c1_122 = arith.constant 1 : index
    %c0_123 = arith.constant 0 : index
    %c0_124 = arith.constant 0 : index
    %333 = vector.load %arg9[%c1_122, %c0_123, %c0_124] : memref<2x1x128xf32, #tpu.memory_space<vmem>>, vector<1x1x128xf32>
    %334 = vector.shape_cast %333 : vector<1x1x128xf32> to vector<1x128xf32>
    %335 = vector.broadcast %334 : vector<1x128xf32> to vector<32x128xf32>
    %336 = arith.addf %332, %335 : vector<32x128xf32>
    %337 = arith.addf %202, %336 : vector<32x128xf32>
    %c1_125 = arith.constant 1 : index
    %c0_126 = arith.constant 0 : index
    %c0_127 = arith.constant 0 : index
    %338 = vector.load %arg10[%c1_125, %c0_126, %c0_127] : memref<2x1x128xf32, #tpu.memory_space<vmem>>, vector<1x1x128xf32>
    %339 = vector.shape_cast %338 : vector<1x1x128xf32> to vector<1x128xf32>
    %c1_128 = arith.constant 1 : index
    %c0_129 = arith.constant 0 : index
    %c0_130 = arith.constant 0 : index
    %340 = vector.load %arg11[%c1_128, %c0_129, %c0_130] : memref<2x1x128xf32, #tpu.memory_space<vmem>>, vector<1x1x128xf32>
    %341 = vector.shape_cast %340 : vector<1x1x128xf32> to vector<1x128xf32>
    %cst_131 = arith.constant dense<0.000000e+00> : vector<32xf32>
    %342 = vector.multi_reduction <add>, %337, %cst_131 [1] : vector<32x128xf32> to vector<32xf32>
    %343 = vector.shape_cast %342 : vector<32xf32> to vector<32x1xf32>
    %cst_132 = arith.constant 1.280000e+02 : f32
    %344 = vector.broadcast %cst_132 : f32 to vector<32x1xf32>
    %345 = arith.divf %343, %344 : vector<32x1xf32>
    %346 = vector.broadcast %345 : vector<32x1xf32> to vector<32x128xf32>
    %347 = arith.subf %337, %346 : vector<32x128xf32>
    %348 = arith.mulf %347, %347 : vector<32x128xf32>
    %cst_133 = arith.constant dense<0.000000e+00> : vector<32xf32>
    %349 = vector.multi_reduction <add>, %348, %cst_133 [1] : vector<32x128xf32> to vector<32xf32>
    %350 = vector.shape_cast %349 : vector<32xf32> to vector<32x1xf32>
    %cst_134 = arith.constant 1.280000e+02 : f32
    %351 = vector.broadcast %cst_134 : f32 to vector<32x1xf32>
    %352 = arith.divf %350, %351 : vector<32x1xf32>
    %353 = vector.broadcast %345 : vector<32x1xf32> to vector<32x128xf32>
    %354 = arith.subf %337, %353 : vector<32x128xf32>
    %cst_135 = arith.constant 9.99999974E-6 : f32
    %355 = vector.broadcast %cst_135 : f32 to vector<32x1xf32>
    %356 = arith.addf %352, %355 : vector<32x1xf32>
    %357 = math.rsqrt %356 : vector<32x1xf32>
    %358 = vector.broadcast %357 : vector<32x1xf32> to vector<32x128xf32>
    %359 = arith.mulf %354, %358 : vector<32x128xf32>
    %360 = vector.broadcast %339 : vector<1x128xf32> to vector<32x128xf32>
    %361 = arith.mulf %359, %360 : vector<32x128xf32>
    %362 = vector.broadcast %341 : vector<1x128xf32> to vector<32x128xf32>
    %363 = arith.addf %361, %362 : vector<32x128xf32>
    %364 = arith.truncf %363 : vector<32x128xf32> to vector<32x128xbf16>
    %c1_136 = arith.constant 1 : index
    %c0_137 = arith.constant 0 : index
    %c0_138 = arith.constant 0 : index
    %365 = vector.load %arg12[%c1_136, %c0_137, %c0_138] : memref<2x128x256xbf16, #tpu.memory_space<vmem>>, vector<1x128x256xbf16>
    %366 = vector.shape_cast %365 : vector<1x128x256xbf16> to vector<128x256xbf16>
    %cst_139 = arith.constant dense<0.000000e+00> : vector<32x256xf32>
    %367 = tpu.matmul %364, %366, %cst_139 {dimension_numbers = #tpu.dot_dimension_numbers<[1], [0], [0], [1], [0, 0, 1, 1], [], []>} : vector<32x128xbf16>, vector<128x256xbf16>, vector<32x256xf32> -> vector<32x256xf32>
    %c1_140 = arith.constant 1 : index
    %c0_141 = arith.constant 0 : index
    %c0_142 = arith.constant 0 : index
    %368 = vector.load %arg13[%c1_140, %c0_141, %c0_142] : memref<2x1x256xf32, #tpu.memory_space<vmem>>, vector<1x1x256xf32>
    %369 = vector.shape_cast %368 : vector<1x1x256xf32> to vector<1x256xf32>
    %370 = vector.broadcast %369 : vector<1x256xf32> to vector<32x256xf32>
    %371 = arith.addf %367, %370 : vector<32x256xf32>
    %372 = arith.mulf %371, %371 : vector<32x256xf32>
    %373 = arith.mulf %371, %372 : vector<32x256xf32>
    %cst_143 = arith.constant 4.471500e-02 : f32
    %374 = vector.broadcast %cst_143 : f32 to vector<32x256xf32>
    %375 = arith.mulf %374, %373 : vector<32x256xf32>
    %376 = arith.addf %371, %375 : vector<32x256xf32>
    %cst_144 = arith.constant 0.797884583 : f32
    %377 = vector.broadcast %cst_144 : f32 to vector<32x256xf32>
    %378 = arith.mulf %377, %376 : vector<32x256xf32>
    %379 = math.tanh %378 : vector<32x256xf32>
    %cst_145 = arith.constant 1.000000e+00 : f32
    %380 = vector.broadcast %cst_145 : f32 to vector<32x256xf32>
    %381 = arith.addf %380, %379 : vector<32x256xf32>
    %cst_146 = arith.constant 5.000000e-01 : f32
    %382 = vector.broadcast %cst_146 : f32 to vector<32x256xf32>
    %383 = arith.mulf %382, %381 : vector<32x256xf32>
    %384 = arith.mulf %371, %383 : vector<32x256xf32>
    %385 = arith.truncf %384 : vector<32x256xf32> to vector<32x256xbf16>
    %c1_147 = arith.constant 1 : index
    %c0_148 = arith.constant 0 : index
    %c0_149 = arith.constant 0 : index
    %386 = vector.load %arg14[%c1_147, %c0_148, %c0_149] : memref<2x256x128xbf16, #tpu.memory_space<vmem>>, vector<1x256x128xbf16>
    %387 = vector.shape_cast %386 : vector<1x256x128xbf16> to vector<256x128xbf16>
    %cst_150 = arith.constant dense<0.000000e+00> : vector<32x128xf32>
    %388 = tpu.matmul %385, %387, %cst_150 {dimension_numbers = #tpu.dot_dimension_numbers<[1], [0], [0], [1], [0, 0, 1, 1], [], []>} : vector<32x256xbf16>, vector<256x128xbf16>, vector<32x128xf32> -> vector<32x128xf32>
    %c1_151 = arith.constant 1 : index
    %c0_152 = arith.constant 0 : index
    %c0_153 = arith.constant 0 : index
    %389 = vector.load %arg15[%c1_151, %c0_152, %c0_153] : memref<2x1x128xf32, #tpu.memory_space<vmem>>, vector<1x1x128xf32>
    %390 = vector.shape_cast %389 : vector<1x1x128xf32> to vector<1x128xf32>
    %391 = vector.broadcast %390 : vector<1x128xf32> to vector<32x128xf32>
    %392 = arith.addf %388, %391 : vector<32x128xf32>
    %393 = arith.addf %337, %392 : vector<32x128xf32>
    %c0_154 = arith.constant 0 : index
    %c0_155 = arith.constant 0 : index
    %394 = vector.load %arg16[%c0_154, %c0_155] : memref<1x128xf32, #tpu.memory_space<vmem>>, vector<1x128xf32>
    %c0_156 = arith.constant 0 : index
    %c0_157 = arith.constant 0 : index
    %395 = vector.load %arg17[%c0_156, %c0_157] : memref<1x128xf32, #tpu.memory_space<vmem>>, vector<1x128xf32>
    %cst_158 = arith.constant dense<0.000000e+00> : vector<32xf32>
    %396 = vector.multi_reduction <add>, %393, %cst_158 [1] : vector<32x128xf32> to vector<32xf32>
    %397 = vector.shape_cast %396 : vector<32xf32> to vector<32x1xf32>
    %cst_159 = arith.constant 1.280000e+02 : f32
    %398 = vector.broadcast %cst_159 : f32 to vector<32x1xf32>
    %399 = arith.divf %397, %398 : vector<32x1xf32>
    %400 = vector.broadcast %399 : vector<32x1xf32> to vector<32x128xf32>
    %401 = arith.subf %393, %400 : vector<32x128xf32>
    %402 = arith.mulf %401, %401 : vector<32x128xf32>
    %cst_160 = arith.constant dense<0.000000e+00> : vector<32xf32>
    %403 = vector.multi_reduction <add>, %402, %cst_160 [1] : vector<32x128xf32> to vector<32xf32>
    %404 = vector.shape_cast %403 : vector<32xf32> to vector<32x1xf32>
    %cst_161 = arith.constant 1.280000e+02 : f32
    %405 = vector.broadcast %cst_161 : f32 to vector<32x1xf32>
    %406 = arith.divf %404, %405 : vector<32x1xf32>
    %407 = vector.broadcast %399 : vector<32x1xf32> to vector<32x128xf32>
    %408 = arith.subf %393, %407 : vector<32x128xf32>
    %cst_162 = arith.constant 9.99999974E-6 : f32
    %409 = vector.broadcast %cst_162 : f32 to vector<32x1xf32>
    %410 = arith.addf %406, %409 : vector<32x1xf32>
    %411 = math.rsqrt %410 : vector<32x1xf32>
    %412 = vector.broadcast %411 : vector<32x1xf32> to vector<32x128xf32>
    %413 = arith.mulf %408, %412 : vector<32x128xf32>
    %414 = vector.broadcast %394 : vector<1x128xf32> to vector<32x128xf32>
    %415 = arith.mulf %413, %414 : vector<32x128xf32>
    %416 = vector.broadcast %395 : vector<1x128xf32> to vector<32x128xf32>
    %417 = arith.addf %415, %416 : vector<32x128xf32>
    %418 = vector.shape_cast %417 : vector<32x128xf32> to vector<2x16x128xf32>
    %cst_163 = arith.constant dense<0.000000e+00> : vector<2x128xf32>
    %419 = vector.multi_reduction <add>, %418, %cst_163 [1] : vector<2x16x128xf32> to vector<2x128xf32>
    %cst_164 = arith.constant 1.600000e+01 : f32
    %420 = vector.broadcast %cst_164 : f32 to vector<2x128xf32>
    %421 = arith.divf %419, %420 : vector<2x128xf32>
    %422 = arith.truncf %421 : vector<2x128xf32> to vector<2x128xbf16>
    %c0_165 = arith.constant 0 : index
    %c0_166 = arith.constant 0 : index
    %423 = vector.load %arg18[%c0_165, %c0_166] : memref<128x128xbf16, #tpu.memory_space<vmem>>, vector<128x128xbf16>
    %cst_167 = arith.constant dense<0.000000e+00> : vector<2x128xf32>
    %424 = tpu.matmul %422, %423, %cst_167 {dimension_numbers = #tpu.dot_dimension_numbers<[1], [0], [0], [1], [0, 0, 1, 1], [], []>} : vector<2x128xbf16>, vector<128x128xbf16>, vector<2x128xf32> -> vector<2x128xf32>
    %c0_168 = arith.constant 0 : index
    %c0_169 = arith.constant 0 : index
    %425 = vector.load %arg19[%c0_168, %c0_169] : memref<1x128xf32, #tpu.memory_space<vmem>>, vector<1x128xf32>
    %426 = vector.broadcast %425 : vector<1x128xf32> to vector<2x128xf32>
    %427 = arith.addf %424, %426 : vector<2x128xf32>
    %cst_170 = arith.constant 0.000000e+00 : f32
    %428 = vector.broadcast %cst_170 : f32 to vector<2x128xf32>
    %429 = arith.cmpf ogt, %427, %428 : vector<2x128xf32>
    %cst_171 = arith.constant 0.00999999977 : f32
    %430 = vector.broadcast %cst_171 : f32 to vector<2x128xf32>
    %431 = arith.mulf %430, %427 : vector<2x128xf32>
    %432 = arith.select %429, %427, %431 : vector<2x128xi1>, vector<2x128xf32>
    %433 = arith.truncf %432 : vector<2x128xf32> to vector<2x128xbf16>
    %c0_172 = arith.constant 0 : index
    %c0_173 = arith.constant 0 : index
    %434 = vector.load %arg20[%c0_172, %c0_173] : memref<128x128xbf16, #tpu.memory_space<vmem>>, vector<128x128xbf16>
    %cst_174 = arith.constant dense<0.000000e+00> : vector<2x128xf32>
    %435 = tpu.matmul %433, %434, %cst_174 {dimension_numbers = #tpu.dot_dimension_numbers<[1], [0], [0], [1], [0, 0, 1, 1], [], []>} : vector<2x128xbf16>, vector<128x128xbf16>, vector<2x128xf32> -> vector<2x128xf32>
    %c0_175 = arith.constant 0 : index
    %c0_176 = arith.constant 0 : index
    %436 = vector.load %arg21[%c0_175, %c0_176] : memref<1x128xf32, #tpu.memory_space<vmem>>, vector<1x128xf32>
    %437 = vector.broadcast %436 : vector<1x128xf32> to vector<2x128xf32>
    %438 = arith.addf %435, %437 : vector<2x128xf32>
    %c0_177 = arith.constant 0 : index
    %c0_178 = arith.constant 0 : index
    %439 = vector.load %arg22[%c0_177, %c0_178] : memref<2x128xf32, #tpu.memory_space<vmem>>, vector<2x128xf32>
    tpu.vector_store %arg22[%c0_177, %c0_178], %438 {strides = array<i32>} : memref<2x128xf32, #tpu.memory_space<vmem>>, vector<2x128xf32>,
    return
  }
}

</mosaic_0001>

<bundles_post_ra>
// kernel: image_encoder_forward.1
= control target key start
LH: loop header
LB: loop body
LE: loop exit
PB: predicated region body
PF: predicated region fallthrough
CT: control target
= control target key end

     0   :  { %s7213_s0 = inlined_call_operand.vmem [shape: bf16[32,64], index: 0, kind: input, shape index: {}]   ;;  %s7214_s1 = inlined_call_operand.vmem [shape: f32[16,128], index: 1, kind: input, shape index: {}]   ;;  %s7215_s2 = inlined_call_operand.vmem [shape: bf16[64,128], index: 2, kind: input, shape index: {}]   ;;  %s7216_s3 = inlined_call_operand.vmem [shape: f32[1,128], index: 3, kind: input, shape index: {}]   ;;  %s7217_s4 = inlined_call_operand.vmem [shape: f32[2,1,128], index: 4, kind: input, shape index: {}]   ;;  %s7218_s5 = inlined_call_operand.vmem [shape: f32[2,1,128], index: 5, kind: input, shape index: {}]   ;;  %s7219_s6 = inlined_call_operand.vmem [shape: bf16[2,128,384], index: 6, kind: input, shape index: {}]   ;;  %s7220_s7 = inlined_call_operand.vmem [shape: f32[2,1,384], index: 7, kind: input, shape index: {}]   ;;  %s7221_s8 = inlined_call_operand.vmem [shape: bf16[2,128,128], index: 8, kind: input, shape index: {}]   ;;  %s7222_s9 = inlined_call_operand.vmem [shape: f32[2,1,128], index: 9, kind: input, shape index: {}]   ;;  %s7223_s10 = inlined_call_operand.vmem [shape: f32[2,1,128], index: 10, kind: input, shape index: {}]   ;;  %s7224_s11 = inlined_call_operand.vmem [shape: f32[2,1,128], index: 11, kind: input, shape index: {}]   ;;  %s7225_s12 = inlined_call_operand.vmem [shape: bf16[2,128,256], index: 12, kind: input, shape index: {}]   ;;  %s7226_s13 = inlined_call_operand.vmem [shape: f32[2,1,256], index: 13, kind: input, shape index: {}]   ;;  %s7227_s14 = inlined_call_operand.vmem [shape: bf16[2,256,128], index: 14, kind: input, shape index: {}]   ;;  %s7228_s15 = inlined_call_operand.vmem [shape: f32[2,1,128], index: 15, kind: input, shape index: {}]   ;;  %s7229_s16 = inlined_call_operand.vmem [shape: f32[1,128], index: 16, kind: input, shape index: {}]   ;;  %s7230_s17 = inlined_call_operand.vmem [shape: f32[1,128], index: 17, kind: input, shape index: {}]   ;;  %s7231_s18 = inlined_call_operand.vmem [shape: bf16[128,128], index: 18, kind: input, shape index: {}]   ;;  %s7232_s19 = inlined_call_operand.vmem [shape: f32[1,128], index: 19, kind: input, shape index: {}]   ;;  %s7233_s20 = inlined_call_operand.vmem [shape: bf16[128,128], index: 20, kind: input, shape index: {}]   ;;  %s7234_s21 = inlined_call_operand.vmem [shape: f32[1,128], index: 21, kind: input, shape index: {}]   ;;  %s7235_s22 = inlined_call_operand.hbm [shape: f32[2,128], index: 22, kind: output, shape index: {}]  }
   0x1   :  { %7244 = sst [smem:[#allocation5_spill]] %s7213_s0 }
   0x2   :  { %7245 = sst [smem:[#allocation6_spill]] %s7214_s1 }
   0x3   :  { %7246 = sst [smem:[#allocation7_spill]] %s7215_s2 }
   0x4   :  { %7247 = sst [smem:[#allocation8_spill]] %s7216_s3 }
   0x5   :  { %7248 = sst [smem:[#allocation9_spill]] %s7217_s4 }
   0x6   :  { %7249 = sst [smem:[#allocation10_spill]] %s7218_s5 }
   0x7   :  { %7250 = sst [smem:[#allocation11_spill]] %s7219_s6 }
   0x8   :  { %s7251_s29 = sld [smem:[#allocation7_spill]]  ;;  %vm126_vm0 = vcmask 523264   ;;  %s7252_s24 = sld [smem:[#allocation5_spill]] }
   0xe   :  { %v5434_v0 = vld [vmem:[%s7251_s29] sm:$0xff]   ;;  %v5435_v1 = vld [vmem:[%s7251_s29 + $0x8] sm:$0xff]   ;;  %v5436_v2 = vld [vmem:[%s7251_s29 + $0x10] sm:$0xff]  }
   0xf   :  { %5043 = vmatprep.subr.bf16.mxu1 %v5434_v0  ;;  %v5438_v3 = vld [vmem:[%s7252_s24] sm:$0xff]   ;;  %v5437_v4 = vld [vmem:[%s7251_s29 + $0x18] sm:$0xff]   ;;  %v5439_v5 = vld [vmem:[%s7252_s24 + $0x8] sm:$0xff]  }
  0x10   :  { %5044 = vmatpush3.bf16.msra.mxu1 %v5434_v0  ;;  %5051 = vmatprep.mubr.msk.bf16.mxu1 %vm126_vm0, %v5438_v3 }
  0x11   :  { %5045 = vmatprep.subr.bf16.mxu1 %v5435_v1 }
  0x14   :  { %5046 = vmatpush3.bf16.msra.mxu1 %v5435_v1 }
  0x15   :  { %5047 = vmatprep.subr.bf16.mxu1 %v5436_v2 }
  0x18   :  { %5048 = vmatpush3.bf16.msra.mxu1 %v5436_v2 }
  0x19   :  { %5049 = vmatprep.subr.bf16.mxu1 %v5437_v4 }
  0x1c   :  { %5050 = vmatpush3.bf16.msra.mxu1 %v5437_v4 }
  0x1f   :  { %5052 = vmatmul.mubr.msk.bf16.vlgmr.msra.gmra.mrb[0].mxu1 %vm126_vm0, %v5439_v5 }
  0x20   :  { %27 = vsyncpa [#allocation3], 0  ;;  %s7253_s28 = sld [smem:[#allocation8_spill]]  ;;  %s7254_s4 = sld [smem:[#allocation6_spill]]  ;;  %v5840_v56 = vmov 0   ;;  %vm5842_vm1 = vmmov 0  }
  0x21   :  { %s7255_s24 = sld [smem:[#allocation11_spill]]  ;;  %466 = vmatprep.mubr.bf16.mxu1 %v5840_v56  ;;  %vm540_vm2 = vcmask 261120   ;;  %vm639_vm3 = vcmask 130048   ;;  %s5843_s1 = smov 96   ;;  %vm1576_vm4 = vcmask 785408   ;;  %vm4332_vm5 = vcmask 1041409  }
  0x22   :  { %s5844_s5 = smov 64   ;;  %s7242_s6 = smov 32  }
  0x26   :  { %v4554_v6 = vld [vmem:[%s7253_s28] ss:$0 sm:$0xff]  ;;  %v183_v17 = vld [vmem:[%s7254_s4 + $0x8] sm:$0xff]  ;;  %s7256_s28 = sld [smem:[#allocation9_spill]] }
  0x27   :  { %v182_v8 = vld [vmem:[%s7254_s4] sm:$0xff]  ;;  %v5445_v23 = vld [vmem:[%s7255_s24 + $0x1c] ss:$12 sps:$4 sm:$0xff]   ;;  %v5453_v45 = vld [vmem:[%s7255_s24 + $0x4c] ss:$12 sps:$4 sm:$0xff]   ;;  %s7257_s4 = sld [smem:[#allocation10_spill]] }
  0x28   :  { %v5440_v21 = vld [vmem:[%s7255_s24] ss:$12 sps:$4 sm:$0xff]   ;;  %v5442_v22 = vld [vmem:[%s7255_s24 + $0x4] ss:$12 sps:$4 sm:$0xff]   ;;  %v5446_v24 = vld [vmem:[%s7255_s24 + $0x8] ss:$12 sps:$4 sm:$0xff]  }
  0x29   :  { %434 = vmatprep.subr.bf16.mxu1 %v5442_v22  ;;  %v5443_v25 = vld [vmem:[%s7255_s24 + $0x18] ss:$12 sps:$4 sm:$0xff]   ;;  %5055 = vmatprep.subr.bf16.mxu0 %v5446_v24  ;;  %v5449_v42 = vld [vmem:[%s7255_s24 + $0x34] ss:$12 sps:$4 sm:$0xff]   ;;  %v5447_v44 = vld [vmem:[%s7255_s24 + $0x30] ss:$12 sps:$4 sm:$0xff]  }
  0x2a   :  { %435 = vmatpush1.bf16.msra.mxu1 %v5440_v21  ;;  %5056 = vmatpush3.bf16.msra.mxu0 %v5446_v24  ;;  %v5450_v43 = vld [vmem:[%s7255_s24 + $0x20] ss:$12 sps:$4 sm:$0xff]   ;;  %v5454_v46 = vld [vmem:[%s7255_s24 + $0x38] ss:$12 sps:$4 sm:$0xff]   ;;  %v5451_v47 = vld [vmem:[%s7255_s24 + $0x48] ss:$12 sps:$4 sm:$0xff]  }
  0x2b   :  { %436 = vmatprep.subr.bf16.mxu1 %v5445_v23  ;;  %5057 = vmatprep.subr.bf16.mxu0 %v5450_v43  ;;  %v5457_v48 = vld [vmem:[%s7255_s24 + $0x64] ss:$12 sps:$4 sm:$0xff]   ;;  %v5455_v50 = vld [vmem:[%s7255_s24 + $0x60] ss:$12 sps:$4 sm:$0xff]   ;;  %v5461_v51 = vld [vmem:[%s7255_s24 + $0x7c] ss:$12 sps:$4 sm:$0xff]  }
  0x2c   :  { %v5458_v49 = vld [vmem:[%s7255_s24 + $0x50] ss:$12 sps:$4 sm:$0xff]   ;;  %v5462_v52 = vld [vmem:[%s7255_s24 + $0x68] ss:$12 sps:$4 sm:$0xff]   ;;  %v5459_v53 = vld [vmem:[%s7255_s24 + $0x78] ss:$12 sps:$4 sm:$0xff]  }
  0x2d   :  { %v5465_v54 = vld [vmem:[%s7255_s24 + $0x94] ss:$12 sps:$4 sm:$0xff]   ;;  %v5463_v57 = vld [vmem:[%s7255_s24 + $0x90] ss:$12 sps:$4 sm:$0xff]   ;;  %v5469_v58 = vld [vmem:[%s7255_s24 + $0xac] ss:$12 sps:$4 sm:$0xff]  }
  0x2e   :  { %437 = vmatpush1.bf16.msra.mxu1 %v5443_v25  ;;  %5058 = vmatpush3.bf16.msra.mxu0 %v5450_v43  ;;  %v5466_v55 = vld [vmem:[%s7255_s24 + $0x80] ss:$12 sps:$4 sm:$0xff]   ;;  %v5470_v59 = vld [vmem:[%s7255_s24 + $0x98] ss:$12 sps:$4 sm:$0xff]   ;;  %v5467_v60 = vld [vmem:[%s7255_s24 + $0xa8] ss:$12 sps:$4 sm:$0xff]  }
  0x2f   :  { %438 = vmatprep.subr.bf16.mxu1 %v5449_v42  ;;  %5059 = vmatprep.subr.bf16.mxu0 %v5454_v46  ;;  %v5471_v61 = vld [vmem:[%s7255_s24 + $0xb0] ss:$12 sps:$4 sm:$0xff]   ;;  %v4564_v21 = vld [vmem:[%s7257_s4] ss:$0 sm:$0xff] }
  0x32   :  { %439 = vmatpush1.bf16.msra.mxu1 %v5447_v44  ;;  %5060 = vmatpush3.bf16.msra.mxu0 %v5454_v46 }
  0x33   :  { %440 = vmatprep.subr.bf16.mxu1 %v5453_v45  ;;  %5061 = vmatprep.subr.bf16.mxu0 %v5458_v49 }
  0x36   :  { %441 = vmatpush1.bf16.msra.mxu1 %v5451_v47  ;;  %5062 = vmatpush3.bf16.msra.mxu0 %v5458_v49 }
  0x37   :  { %442 = vmatprep.subr.bf16.mxu1 %v5457_v48  ;;  %5063 = vmatprep.subr.bf16.mxu0 %v5462_v52 }
  0x3a   :  { %443 = vmatpush1.bf16.msra.mxu1 %v5455_v50  ;;  %5064 = vmatpush3.bf16.msra.mxu0 %v5462_v52 }
  0x3b   :  { %444 = vmatprep.subr.bf16.mxu1 %v5461_v51  ;;  %5065 = vmatprep.subr.bf16.mxu0 %v5466_v55 }
  0x3e   :  { %445 = vmatpush1.bf16.msra.mxu1 %v5459_v53  ;;  %5066 = vmatpush3.bf16.msra.mxu0 %v5466_v55 }
  0x3f   :  { %446 = vmatprep.subr.bf16.mxu1 %v5465_v54  ;;  %5067 = vmatprep.subr.bf16.mxu0 %v5470_v59 }
  0x42   :  { %447 = vmatpush1.bf16.msra.mxu1 %v5463_v57  ;;  %5068 = vmatpush3.bf16.msra.mxu0 %v5470_v59 }
  0x43   :  { %448 = vmatprep.subr.bf16.mxu1 %v5469_v58  ;;  %5069 = vmatprep.subr.bf16.mxu0 %v5471_v61 }
  0x46   :  { %449 = vmatpush1.bf16.msra.mxu1 %v5467_v60  ;;  %5070 = vmatpush3.bf16.msra.mxu0 %v5471_v61 }
  0xf2   :  { %v5053_v7 = vpop.f32.mrb[0].mxu1 }
  0xf3   :  { %v176_v9 = vadd.f32 %v5053_v7, %v4554_v6  ;;  %v167_v10 = vpop.f32.mrb[1].mxu1 }
  0xf4   :  { %v168_v11 = vadd.f32 %v4554_v6, %v167_v10  ;;  %v5054_v12 = vpop.f32.mrb[2].mxu1 }
  0xf5   :  { %v5988_v13 = vadd.f32 %v182_v8, %v176_v9  ;;  %v179_v14 = vadd.f32 %v5054_v12, %v4554_v6  ;;  %v170_v15 = vpop.f32.mrb[3].mxu1  ;;  %v4563_v12 = vld [vmem:[%s7256_s28] ss:$0 sm:$0xff] }
  0xf6   :  { %v5990_v16 = vadd.f32 %v182_v8, %v168_v11  ;;  %v171_v18 = vadd.f32 %v4554_v6, %v170_v15 }
  0xf7   :  { %194 = vadd.xlane.f32.xlu1 %v5988_v13  ;;  %v5997_v19 = vadd.f32 %v183_v17, %v179_v14 }
  0xf8   :  { %190 = vadd.xlane.f32.xlu0 %v5990_v16  ;;  %v5999_v20 = vadd.f32 %v183_v17, %v171_v18 }
  0xfb   :  { %196 = vadd.xlane.f32.xlu1 %v5997_v19 }
  0xfc   :  { %192 = vadd.xlane.f32.xlu0 %v5999_v20 }
 0x184   :  { %v195_v26 = vpop.xlane.xlu1 %194 }
 0x185   :  { %v191_v27 = vpop.xlane.xlu0 %190  ;;  %v201_v28 = vmul.f32 0.0078125, %v195_v26 }
 0x186   :  { %v199_v29 = vmul.f32 0.0078125, %v191_v27 }
 0x187   :  { %v6024_v36 = vsub.f32 %v5988_v13, %v201_v28 }
 0x188   :  { %v197_v30 = vpop.xlane.xlu1 %196  ;;  %v6019_v31 = vsub.f32 %v5990_v16, %v199_v29 }
 0x189   :  { %v193_v32 = vpop.xlane.xlu0 %192  ;;  %v202_v33 = vmul.f32 0.0078125, %v197_v30  ;;  %v209_v38 = vmul.f32 %v6024_v36, %v6024_v36 }
 0x18a   :  { %v200_v34 = vmul.f32 0.0078125, %v193_v32  ;;  %v207_v35 = vmul.f32 %v6019_v31, %v6019_v31 }
 0x18b   :  { %v6034_v40 = vsub.f32 %v5997_v19, %v202_v33 }
 0x18c   :  { %211 = vadd.xlane.f32.xlu0 %v207_v35  ;;  %v6027_v37 = vsub.f32 %v5999_v20, %v200_v34  ;;  %v5841_v34 = vmov 0.0   ;;  %v291_v35 = vlaneseq }
 0x18d   :  { %v210_v41 = vmul.f32 %v6034_v40, %v6034_v40  ;;  %5075 = vmatprep.subr.bf16.mxu1 %v5841_v34  ;;  %5081 = vmatprep.subr.bf16.mxu0 %v5841_v34 }
 0x18e   :  { %v208_v39 = vmul.f32 %v6027_v37, %v6027_v37 }
 0x190   :  { %215 = vadd.xlane.f32.xlu0 %v209_v38  ;;  %213 = vadd.xlane.f32.xlu1 %v208_v39  ;;  %v289_v38 = vld [vmem:[%s7220_s7] sm:$0x7] }
 0x194   :  { %217 = vadd.xlane.f32.xlu1 %v210_v41 }
 0x219   :  { %v212_v62 = vpop.xlane.xlu0 %211 }
 0x21a   :  { %v219_v63 = vmul.f32 0.0078125, %v212_v62 }
 0x21c   :  { %v223_v0 = vadd.f32 1e-05, %v219_v63 }
 0x21d   :  { %v214_v1 = vpop.xlane.xlu1 %213  ;;  %v216_v2 = vpop.xlane.xlu0 %215 }
 0x21e   :  { %5616 = vrsqrt.f32 %v223_v0  ;;  %v220_v3 = vmul.f32 0.0078125, %v214_v1  ;;  %v221_v4 = vmul.f32 0.0078125, %v216_v2 }
 0x220   :  { %v224_v5 = vadd.f32 1e-05, %v220_v3  ;;  %v225_v6 = vadd.f32 1e-05, %v221_v4 }
 0x221   :  { %v218_v7 = vpop.xlane.xlu1 %217 }
 0x222   :  { %5618 = vrsqrt.f32 %v224_v5  ;;  %v222_v8 = vmul.f32 0.0078125, %v218_v7 }
 0x223   :  { %5620 = vrsqrt.f32 %v225_v6 }
 0x224   :  { %v226_v9 = vadd.f32 1e-05, %v222_v8 }
 0x226   :  { %5622 = vrsqrt.f32 %v226_v9 }
 0x228   :  { %v5617_v10 = vpop.eup %5616 }
 0x229   :  { %v231_v11 = vmul.f32 %v5617_v10, %v6019_v31 }
 0x22b   :  { %v241_v18 = vmul.f32 %v4563_v12, %v231_v11 }
 0x22c   :  { %v5619_v14 = vpop.eup %5618 }
 0x22d   :  { %v5621_v15 = vpop.eup %5620  ;;  %v232_v17 = vmul.f32 %v5619_v14, %v6027_v37  ;;  %v251_v25 = vadd.f32 %v4564_v21, %v241_v18 }
 0x22e   :  { %v233_v22 = vmul.f32 %v5621_v15, %v6024_v36  ;;  %v6113_v36 = vshrl.u32 %v291_v35, 7 }
 0x22f   :  { %v242_v23 = vmul.f32 %v4563_v12, %v232_v17 }
 0x230   :  { %v5623_v24 = vpop.eup %5622  ;;  %v243_v28 = vmul.f32 %v4563_v12, %v233_v22  ;;  %v6116_v37 = vsub.s32 0, %v6113_v36  ;;  %v6122_v39 = vsub.s32 1, %v6113_v36  ;;  %v301_v41 = vsub.s32 2, %v6113_v36 }
 0x231   :  { %v252_v26 = vadd.f32 %v4564_v21, %v242_v23  ;;  %v234_v27 = vmul.f32 %v5623_v24, %v6034_v40 }
 0x232   :  { %v253_v31 = vadd.f32 %v4564_v21, %v243_v28  ;;  %v294_v40 = vrot.slane %v289_v38, %v6116_v37  ;;  %v298_v43 = vrot.slane %v289_v38, %v6122_v39  ;;  %v302_v49 = vrot.slane %v289_v38, %v301_v41 }
 0x233   :  { %v255_v29 = vpack.c.bf16 %v252_v26, %v251_v25  ;;  %v244_v30 = vmul.f32 %v4563_v12, %v234_v27 }
 0x235   :  { %467 = vmatmul.mubr.bf16.vlgmr.msra.gmra.mrb[4].mxu1 %v255_v29  ;;  %5071 = vmatprep.mubr.bf16.mxu0 %v255_v29  ;;  %v254_v32 = vadd.f32 %v4564_v21, %v244_v30 }
 0x236   :  { %476 = vmatprep.mubr.bf16.mxu1 %v5840_v56 }
 0x237   :  { %v256_v33 = vpack.c.bf16 %v254_v32, %v253_v31 }
 0x239   :  { %5072 = vmatmul.mubr.bf16.vlgmr.msra.gmra.mrb[0].mxu0 %v256_v33 }
 0x23a   :  { %5083 = vmatprep.mubr.msk.bf16.mxu0 %vm5842_vm1, %v5841_v34 }
 0x23d   :  { %477 = vmatmul.mubr.bf16.gmra.mrb[8].mxu1 %v256_v33 }
 0x23e   :  { %5077 = vmatprep.mubr.msk.bf16.mxu1 %vm5842_vm1, %v5841_v34 }
 0x308   :  { %v468_v42 = vpop.f32.mrb[4].mxu1 }
 0x309   :  { %v470_v44 = vpop.f32.mrb[5].mxu1  ;;  %v469_v46 = vadd.f32 %v468_v42, %v294_v40 }
 0x30a   :  { %v472_v45 = vpop.f32.mrb[6].mxu1  ;;  %v471_v50 = vadd.f32 %v470_v44, %v298_v43 }
 0x30b   :  { %v473_v47 = vadd.f32 %v472_v45, %v294_v40  ;;  %v474_v48 = vpop.f32.mrb[7].mxu1 }
 0x30c   :  { %v475_v51 = vadd.f32 %v474_v48, %v298_v43  ;;  %v5073_v52 = vpop.f32.mrb[0].mxu0 }
 0x30d   :  { %v6129_v53 = vpack.c.bf16 %v473_v47, %v469_v46  ;;  %v521_v54 = vpop.f32.mrb[1].mxu0  ;;  %v530_v58 = vadd.f32 %v5073_v52, %v302_v49 }
 0x30e   :  { %v6131_v55 = vpack.c.bf16 %v475_v51, %v471_v50  ;;  %v5074_v57 = vpop.f32.mrb[2].mxu0  ;;  %v522_v61 = vadd.f32 %v521_v54, %v302_v49 }
 0x30f   :  { %v533_v59 = vadd.f32 %v5074_v57, %v302_v49  ;;  %v524_v60 = vpop.f32.mrb[3].mxu0 }
 0x310   :  { %v525_v62 = vadd.f32 %v524_v60, %v302_v49  ;;  %v478_v63 = vpop.f32.mrb[8].mxu1  ;;  %v545_v0 = vsel %vm540_vm2, %v6131_v55, 0 }
 0x311   :  { %v6135_v1 = vpack.c.bf16 %v533_v59, %v530_v58  ;;  %v480_v2 = vpop.f32.mrb[9].mxu1  ;;  %5076 = vmatpush3.bf16.xpose.msra.mxu1 %v545_v0  ;;  %v479_v5 = vadd.f32 %v478_v63, %v294_v40 }
 0x312   :  { %v6137_v3 = vpack.c.bf16 %v525_v62, %v522_v61  ;;  %v482_v4 = vpop.f32.mrb[10].mxu1  ;;  %5087 = vmatprep.subr.bf16.mxu1 %v5841_v34  ;;  %v481_v8 = vadd.f32 %v480_v2, %v298_v43 }
 0x313   :  { %v483_v6 = vadd.f32 %v482_v4, %v294_v40  ;;  %v484_v7 = vpop.f32.mrb[11].mxu1 }
 0x314   :  { %v485_v9 = vadd.f32 %v484_v7, %v298_v43 }
 0x315   :  { %v6140_v10 = vpack.c.bf16 %v483_v6, %v479_v5 }
 0x316   :  { %v6142_v11 = vpack.c.bf16 %v485_v9, %v481_v8 }
 0x318   :  { %5078 = vmatmul.mubr.msk.bf16.vlgmr.msra.gmra.mrb[12].mxu1 %vm540_vm2, %v6129_v53  ;;  %v592_v12 = vsel %vm540_vm2, %v6142_v11, 0 }
 0x319   :  { %5082 = vmatpush3.bf16.xpose.msra.mxu0 %v592_v12  ;;  %5088 = vmatpush3.bf16.msra.mxu1 %v6137_v3 }
 0x31a   :  { %5093 = vmatprep.subr.bf16.mxu0 %v5841_v34  ;;  %5089 = vmatprep.mubr.msk.bf16.mxu1 %vm5842_vm1, %v5841_v34 }
 0x31b   :  { %5099 = vmatprep.subr.bf16.mxu1 %v5841_v34 }
 0x320   :  { %5084 = vmatmul.mubr.msk.bf16.vlgmr.msra.gmra.mrb[4].mxu0 %vm540_vm2, %v6140_v10 }
 0x321   :  { %5094 = vmatpush3.bf16.msra.mxu0 %v6135_v1  ;;  %5095 = vmatprep.mubr.msk.bf16.mxu0 %vm5842_vm1, %v5841_v34 }
 0x322   :  { %5105 = vmatprep.subr.bf16.mxu0 %v5841_v34 }
 0x3eb   :  { %v581_v14 = vpop.f32.mrb[12].mxu1 }
 0x3ec   :  { %v635_v15 = vmul.f32 0.17677669, %v581_v14  ;;  %v5079_v17 = vpop.f32.mrb[13].mxu1 }
 0x3ed   :  { %v584_v18 = vpop.f32.mrb[14].mxu1 }
 0x3ee   :  { %v636_v21 = vmul.f32 0.17677669, %v584_v18  ;;  %v5080_v22 = vpop.f32.mrb[15].mxu1  ;;  %v640_v23 = vsel %vm639_vm3, %v635_v15, -inf }
 0x3ef   :  { %641 = vmax.xlane.f32.xlu0 %v640_v23 }
 0x3f0   :  { %v643_v24 = vsel %vm639_vm3, %v636_v21, -inf }
 0x3f1   :  { %644 = vmax.xlane.f32.xlu1 %v643_v24 }
 0x3f3   :  { %v628_v25 = vpop.f32.mrb[4].mxu0 }
 0x3f4   :  { %v637_v26 = vmul.f32 0.17677669, %v628_v25  ;;  %v5085_v27 = vpop.f32.mrb[5].mxu0 }
 0x3f5   :  { %v631_v28 = vpop.f32.mrb[6].mxu0 }
 0x3f6   :  { %v638_v29 = vmul.f32 0.17677669, %v631_v28  ;;  %v5086_v30 = vpop.f32.mrb[7].mxu0  ;;  %v646_v31 = vsel %vm639_vm3, %v637_v26, -inf }
 0x3f7   :  { %647 = vmax.xlane.f32.xlu0 %v646_v31 }
 0x3f8   :  { %v649_v32 = vsel %vm639_vm3, %v638_v29, -inf }
 0x3f9   :  { %650 = vmax.xlane.f32.xlu1 %v649_v32 }
 0x47c   :  { %v642_v33 = vpop.xlane.xlu0 %641 }
 0x47d   :  { %v652_v35 = vsub.f32 %v635_v15, %v642_v33 }
 0x47e   :  { %v645_v38 = vpop.xlane.xlu1 %644 }
 0x47f   :  { %v656_v40 = vmul.f32 1.442695, %v652_v35  ;;  %v653_v42 = vsub.f32 %v636_v21, %v645_v38 }
 0x481   :  { %5624 = vpow2.f32 %v656_v40  ;;  %v658_v43 = vmul.f32 1.442695, %v653_v42 }
 0x483   :  { %5626 = vpow2.f32 %v658_v43 }
 0x484   :  { %v648_v44 = vpop.xlane.xlu0 %647 }
 0x485   :  { %v654_v45 = vsub.f32 %v637_v26, %v648_v44 }
 0x486   :  { %v651_v54 = vpop.xlane.xlu1 %650 }
 0x487   :  { %v660_v46 = vmul.f32 1.442695, %v654_v45  ;;  %v655_v57 = vsub.f32 %v638_v29, %v651_v54 }
 0x489   :  { %5628 = vpow2.f32 %v660_v46  ;;  %v662_v58 = vmul.f32 1.442695, %v655_v57 }
 0x48b   :  { %v5625_v47 = vpop.eup %5624  ;;  %5630 = vpow2.f32 %v662_v58 }
 0x48c   :  { %v664_v48 = vsel %vm639_vm3, %v5625_v47, 0.0 }
 0x48d   :  { %v5627_v49 = vpop.eup %5626  ;;  %665 = vadd.xlane.f32.xlu0 %v664_v48 }
 0x48e   :  { %v667_v50 = vsel %vm639_vm3, %v5627_v49, 0.0 }
 0x48f   :  { %668 = vadd.xlane.f32.xlu1 %v667_v50 }
 0x493   :  { %v5629_v51 = vpop.eup %5628 }
 0x494   :  { %v670_v52 = vsel %vm639_vm3, %v5629_v51, 0.0 }
 0x495   :  { %671 = vadd.xlane.f32.xlu0 %v670_v52  ;;  %v5631_v59 = vpop.eup %5630 }
 0x496   :  { %v673_v60 = vsel %vm639_vm3, %v5631_v59, 0.0 }
 0x4a0   :  { %833 = vrot.lane.b32.xlu1 %v6142_v11, %s5843_s1 }
 0x4ab   :  { %780 = vrot.lane.b32.xlu0 %v6131_v55, %s5843_s1 }
 0x4c4   :  { %674 = vadd.xlane.f32.xlu1 %v673_v60 }
 0x4d5   :  { %777 = vrot.lane.b32.xlu1 %v6129_v53, %s5843_s1 }
 0x4d9   :  { %830 = vrot.lane.b32.xlu1 %v6140_v10, %s5843_s1 }
 0x51a   :  { %v666_v61 = vpop.xlane.xlu0 %665 }
 0x51b   :  { %5632 = vrcp.f32 %v666_v61 }
 0x51c   :  { %v669_v62 = vpop.xlane.xlu1 %668 }
 0x51d   :  { %5634 = vrcp.f32 %v669_v62 }
 0x520   :  { %v834_v9 = vpop.permute.xlu1 %833 }
 0x521   :  { %v839_v23 = vsel %vm540_vm2, %v834_v9, 0 }
 0x522   :  { %v672_v63 = vpop.xlane.xlu0 %671 }
 0x523   :  { %5636 = vrcp.f32 %v672_v63 }
 0x525   :  { %v5633_v0 = vpop.eup %5632 }
 0x526   :  { %v680_v4 = vmul.f32 %v5633_v0, %v5625_v47  ;;  %v781_v6 = vpop.permute.xlu0 %780 }
 0x527   :  { %v5635_v2 = vpop.eup %5634  ;;  %v786_v8 = vsel %vm540_vm2, %v781_v6, 0 }
 0x528   :  { %v681_v5 = vmul.f32 %v5635_v2, %v5627_v49 }
 0x52a   :  { %v684_v7 = vpack.c.bf16 %v681_v5, %v680_v4 }
 0x52c   :  { %5090 = vmatmul.mubr.msk.bf16.vlgmr.msra.gmra.mrb[16].mxu1 %vm639_vm3, %v684_v7 }
 0x52d   :  { %5100 = vmatpush3.bf16.xpose.msra.mxu1 %v786_v8  ;;  %5101 = vmatprep.mubr.msk.bf16.mxu1 %vm5842_vm1, %v5841_v34  ;;  %v5637_v15 = vpop.eup %5636 }
 0x52e   :  { %5111 = vmatprep.subr.bf16.mxu1 %v5841_v34  ;;  %v682_v18 = vmul.f32 %v5637_v15, %v5629_v51 }
 0x551   :  { %v675_v12 = vpop.xlane.xlu1 %674 }
 0x552   :  { %5638 = vrcp.f32 %v675_v12 }
 0x555   :  { %v778_v14 = vpop.permute.xlu1 %777 }
 0x556   :  { %5102 = vmatmul.mubr.msk.bf16.vlgmr.msra.gmra.mrb[20].mxu1 %vm540_vm2, %v778_v14 }
 0x557   :  { %5113 = vmatprep.mubr.msk.bf16.mxu1 %vm5842_vm1, %v5841_v34 }
 0x559   :  { %v831_v24 = vpop.permute.xlu1 %830 }
 0x55c   :  { %v5639_v17 = vpop.eup %5638 }
 0x55d   :  { %v683_v21 = vmul.f32 %v5639_v17, %v5631_v59 }
 0x55f   :  { %v685_v22 = vpack.c.bf16 %v683_v21, %v682_v18 }
 0x561   :  { %5096 = vmatmul.mubr.msk.bf16.vlgmr.msra.gmra.mrb[8].mxu0 %vm639_vm3, %v685_v22 }
 0x562   :  { %5106 = vmatpush3.bf16.xpose.msra.mxu0 %v839_v23  ;;  %5107 = vmatprep.mubr.msk.bf16.mxu0 %vm5842_vm1, %v5841_v34 }
 0x563   :  { %5117 = vmatprep.subr.bf16.mxu0 %v5841_v34 }
 0x569   :  { %5108 = vmatmul.mubr.msk.bf16.vlgmr.msra.gmra.mrb[12].mxu0 %vm540_vm2, %v831_v24 }
 0x56a   :  { %5119 = vmatprep.mubr.msk.bf16.mxu0 %vm5842_vm1, %v5841_v34 }
 0x5ff   :  { %v6191_v25 = vpop.f32.mrb[16].mxu1 }
 0x600   :  { %v5091_v26 = vpop.f32.mrb[17].mxu1 }
 0x601   :  { %v6193_v27 = vpop.f32.mrb[18].mxu1 }
 0x602   :  { %v5092_v28 = vpop.f32.mrb[19].mxu1 }
 0x629   :  { %v822_v29 = vpop.f32.mrb[20].mxu1 }
 0x62a   :  { %v882_v30 = vmul.f32 0.17677669, %v822_v29  ;;  %v5103_v31 = vpop.f32.mrb[21].mxu1 }
 0x62b   :  { %v825_v32 = vpop.f32.mrb[22].mxu1 }
 0x62c   :  { %v883_v33 = vmul.f32 0.17677669, %v825_v32  ;;  %v5104_v35 = vpop.f32.mrb[23].mxu1  ;;  %v886_v38 = vsel %vm639_vm3, %v882_v30, -inf }
 0x62d   :  { %887 = vmax.xlane.f32.xlu0 %v886_v38 }
 0x62e   :  { %v889_v40 = vsel %vm639_vm3, %v883_v33, -inf }
 0x62f   :  { %890 = vmax.xlane.f32.xlu1 %v889_v40 }
 0x634   :  { %v6197_v42 = vpop.f32.mrb[8].mxu0 }
 0x635   :  { %v5097_v43 = vpop.f32.mrb[9].mxu0 }
 0x636   :  { %v6199_v44 = vpop.f32.mrb[10].mxu0 }
 0x637   :  { %v5098_v45 = vpop.f32.mrb[11].mxu0 }
 0x63c   :  { %v875_v46 = vpop.f32.mrb[12].mxu0 }
 0x63d   :  { %v884_v47 = vmul.f32 0.17677669, %v875_v46  ;;  %v5109_v48 = vpop.f32.mrb[13].mxu0 }
 0x63e   :  { %v878_v49 = vpop.f32.mrb[14].mxu0 }
 0x63f   :  { %v885_v50 = vmul.f32 0.17677669, %v878_v49  ;;  %v5110_v51 = vpop.f32.mrb[15].mxu0  ;;  %v892_v52 = vsel %vm639_vm3, %v884_v47, -inf }
 0x640   :  { %893 = vmax.xlane.f32.xlu0 %v892_v52 }
 0x641   :  { %v895_v54 = vsel %vm639_vm3, %v885_v50, -inf }
 0x644   :  { %896 = vmax.xlane.f32.xlu0 %v895_v54 }
 0x6ba   :  { %v888_v57 = vpop.xlane.xlu0 %887 }
 0x6bb   :  { %v898_v58 = vsub.f32 %v882_v30, %v888_v57 }
 0x6bc   :  { %v891_v59 = vpop.xlane.xlu1 %890 }
 0x6bd   :  { %v902_v60 = vmul.f32 1.442695, %v898_v58  ;;  %v899_v61 = vsub.f32 %v883_v33, %v891_v59 }
 0x6bf   :  { %5640 = vpow2.f32 %v902_v60  ;;  %v904_v62 = vmul.f32 1.442695, %v899_v61 }
 0x6c1   :  { %5642 = vpow2.f32 %v904_v62 }
 0x6c9   :  { %v5641_v63 = vpop.eup %5640 }
 0x6ca   :  { %v910_v0 = vsel %vm639_vm3, %v5641_v63, 0.0 }
 0x6cb   :  { %v5643_v2 = vpop.eup %5642  ;;  %911 = vadd.xlane.f32.xlu0 %v910_v0 }
 0x6cc   :  { %v913_v4 = vsel %vm639_vm3, %v5643_v2, 0.0 }
 0x6cd   :  { %914 = vadd.xlane.f32.xlu1 %v913_v4  ;;  %v894_v5 = vpop.xlane.xlu0 %893 }
 0x6ce   :  { %v900_v6 = vsub.f32 %v884_v47, %v894_v5 }
 0x6d0   :  { %v906_v7 = vmul.f32 1.442695, %v900_v6 }
 0x6d1   :  { %v897_v12 = vpop.xlane.xlu0 %896 }
 0x6d2   :  { %5644 = vpow2.f32 %v906_v7  ;;  %v901_v14 = vsub.f32 %v885_v50, %v897_v12 }
 0x6d4   :  { %v908_v15 = vmul.f32 1.442695, %v901_v14 }
 0x6d6   :  { %5646 = vpow2.f32 %v908_v15 }
 0x6dc   :  { %v5645_v8 = vpop.eup %5644 }
 0x6dd   :  { %v916_v9 = vsel %vm639_vm3, %v5645_v8, 0.0 }
 0x6de   :  { %981 = vrot.lane.b32.xlu1 %v6135_v1, %s5843_s1  ;;  %917 = vadd.xlane.f32.xlu0 %v916_v9 }
 0x6e0   :  { %v5647_v17 = vpop.eup %5646 }
 0x6e1   :  { %v919_v18 = vsel %vm639_vm3, %v5647_v17, 0.0 }
 0x6e2   :  { %1030 = vrot.lane.b32.xlu1 %v6131_v55, %s5844_s5 }
 0x6f4   :  { %933 = vrot.lane.b32.xlu0 %v6137_v3, %s5843_s1 }
 0x6f8   :  { %1028 = vrot.lane.b32.xlu0 %v6129_v53, %s5844_s5 }
 0x706   :  { %920 = vadd.xlane.f32.xlu1 %v919_v18 }
 0x717   :  { %1081 = vrot.lane.b32.xlu1 %v6142_v11, %s5844_s5 }
 0x71b   :  { %1079 = vrot.lane.b32.xlu1 %v6140_v10, %s5844_s5 }
 0x758   :  { %v912_v23 = vpop.xlane.xlu0 %911 }
 0x75a   :  { %v915_v21 = vpop.xlane.xlu1 %914 }
 0x75b   :  { %5648 = vrcp.f32 %v915_v21 }
 0x75c   :  { %5650 = vrcp.f32 %v912_v23 }
 0x75e   :  { %v982_v22 = vpop.permute.xlu1 %981 }
 0x75f   :  { %5118 = vmatpush3.bf16.msra.mxu0 %v982_v22 }
 0x760   :  { %5129 = vmatprep.subr.bf16.mxu0 %v5841_v34 }
 0x762   :  { %v1031_v33 = vpop.permute.xlu1 %1030 }
 0x763   :  { %v1036_v35 = vsel %vm540_vm2, %v1031_v33, 0 }
 0x765   :  { %v5649_v24 = vpop.eup %5648 }
 0x766   :  { %v5651_v28 = vpop.eup %5650  ;;  %v927_v29 = vmul.f32 %v5649_v24, %v5643_v2 }
 0x767   :  { %v926_v30 = vmul.f32 %v5651_v28, %v5641_v63 }
 0x769   :  { %v930_v32 = vpack.c.bf16 %v927_v29, %v926_v30 }
 0x76b   :  { %v918_v26 = vpop.xlane.xlu0 %917 }
 0x76c   :  { %5652 = vrcp.f32 %v918_v26 }
 0x76f   :  { %v934_v31 = vpop.permute.xlu0 %933 }
 0x770   :  { %5112 = vmatpush3.bf16.msra.mxu1 %v934_v31 }
 0x771   :  { %5123 = vmatprep.subr.bf16.mxu1 %v5841_v34 }
 0x773   :  { %5114 = vmatmul.mubr.msk.bf16.vlgmr.msra.gmra.mrb[24].mxu1 %vm639_vm3, %v930_v32  ;;  %v1029_v38 = vpop.permute.xlu0 %1028 }
 0x774   :  { %5125 = vmatprep.mubr.msk.bf16.mxu1 %vm5842_vm1, %v5841_v34 }
 0x776   :  { %v5653_v43 = vpop.eup %5652 }
 0x777   :  { %v928_v46 = vmul.f32 %v5653_v43, %v5645_v8 }
 0x779   :  { %5124 = vmatpush3.bf16.xpose.msra.mxu1 %v1036_v35 }
 0x77a   :  { %5135 = vmatprep.subr.bf16.mxu1 %v5841_v34 }
 0x780   :  { %5126 = vmatmul.mubr.msk.bf16.vlgmr.msra.gmra.mrb[28].mxu1 %vm540_vm2, %v1029_v38 }
 0x781   :  { %5137 = vmatprep.mubr.msk.bf16.mxu1 %vm5842_vm1, %v5841_v34 }
 0x793   :  { %v921_v40 = vpop.xlane.xlu1 %920 }
 0x794   :  { %5654 = vrcp.f32 %v921_v40 }
 0x797   :  { %v1082_v48 = vpop.permute.xlu1 %1081 }
 0x798   :  { %v1087_v50 = vsel %vm540_vm2, %v1082_v48, 0 }
 0x79b   :  { %v1080_v51 = vpop.permute.xlu1 %1079 }
 0x79e   :  { %v5655_v45 = vpop.eup %5654 }
 0x79f   :  { %v929_v47 = vmul.f32 %v5655_v45, %v5647_v17 }
 0x7a1   :  { %v931_v49 = vpack.c.bf16 %v929_v47, %v928_v46 }
 0x7a3   :  { %5120 = vmatmul.mubr.msk.bf16.vlgmr.msra.gmra.mrb[16].mxu0 %vm639_vm3, %v931_v49 }
 0x7a4   :  { %5130 = vmatpush3.bf16.xpose.msra.mxu0 %v1087_v50  ;;  %5131 = vmatprep.mubr.msk.bf16.mxu0 %vm5842_vm1, %v5841_v34 }
 0x7a5   :  { %5141 = vmatprep.subr.bf16.mxu0 %v5841_v34 }
 0x7ab   :  { %5132 = vmatmul.mubr.msk.bf16.vlgmr.msra.gmra.mrb[20].mxu0 %vm540_vm2, %v1080_v51 }
 0x7ac   :  { %5143 = vmatprep.mubr.msk.bf16.mxu0 %vm5842_vm1, %v5841_v34 }
 0x846   :  { %v6237_v52 = vpop.f32.mrb[24].mxu1 }
 0x847   :  { %v5115_v54 = vpop.f32.mrb[25].mxu1 }
 0x848   :  { %v6239_v57 = vpop.f32.mrb[26].mxu1 }
 0x849   :  { %v5374_v58 = vpack.i.bf16 %v6239_v57, %v6237_v52  ;;  %v5116_v59 = vpop.f32.mrb[27].mxu1 }
 0x853   :  { %v1072_v60 = vpop.f32.mrb[28].mxu1 }
 0x854   :  { %v1130_v61 = vmul.f32 0.17677669, %v1072_v60  ;;  %v5127_v62 = vpop.f32.mrb[29].mxu1 }
 0x855   :  { %v1075_v63 = vpop.f32.mrb[30].mxu1 }
 0x856   :  { %v1131_v0 = vmul.f32 0.17677669, %v1075_v63  ;;  %v5128_v2 = vpop.f32.mrb[31].mxu1  ;;  %v1134_v4 = vsel %vm639_vm3, %v1130_v61, -inf }
 0x857   :  { %1135 = vmax.xlane.f32.xlu0 %v1134_v4 }
 0x858   :  { %v1137_v5 = vsel %vm639_vm3, %v1131_v0, -inf }
 0x859   :  { %1138 = vmax.xlane.f32.xlu1 %v1137_v5 }
 0x876   :  { %v6245_v6 = vpop.f32.mrb[16].mxu0 }
 0x877   :  { %v5121_v7 = vpop.f32.mrb[17].mxu0 }
 0x878   :  { %v6247_v8 = vpop.f32.mrb[18].mxu0 }
 0x879   :  { %v5379_v9 = vpack.i.bf16 %v6247_v8, %v6245_v6  ;;  %v5122_v12 = vpop.f32.mrb[19].mxu0 }
 0x87e   :  { %v1123_v14 = vpop.f32.mrb[20].mxu0 }
 0x87f   :  { %v1132_v15 = vmul.f32 0.17677669, %v1123_v14  ;;  %v5133_v17 = vpop.f32.mrb[21].mxu0 }
 0x880   :  { %v1126_v18 = vpop.f32.mrb[22].mxu0 }
 0x881   :  { %v1133_v21 = vmul.f32 0.17677669, %v1126_v18  ;;  %v5134_v22 = vpop.f32.mrb[23].mxu0  ;;  %v1140_v23 = vsel %vm639_vm3, %v1132_v15, -inf }
 0x882   :  { %1141 = vmax.xlane.f32.xlu0 %v1140_v23 }
 0x883   :  { %v1143_v24 = vsel %vm639_vm3, %v1133_v21, -inf }
 0x886   :  { %1144 = vmax.xlane.f32.xlu0 %v1143_v24 }
 0x8e4   :  { %v1136_v26 = vpop.xlane.xlu0 %1135 }
 0x8e5   :  { %v1146_v28 = vsub.f32 %v1130_v61, %v1136_v26 }
 0x8e6   :  { %v1139_v29 = vpop.xlane.xlu1 %1138 }
 0x8e7   :  { %v1150_v30 = vmul.f32 1.442695, %v1146_v28  ;;  %v1147_v31 = vsub.f32 %v1131_v0, %v1139_v29 }
 0x8e9   :  { %5656 = vpow2.f32 %v1150_v30  ;;  %v1152_v32 = vmul.f32 1.442695, %v1147_v31 }
 0x8eb   :  { %5658 = vpow2.f32 %v1152_v32 }
 0x8f3   :  { %v5657_v33 = vpop.eup %5656 }
 0x8f4   :  { %v1158_v35 = vsel %vm639_vm3, %v5657_v33, 0.0 }
 0x8f5   :  { %v5659_v38 = vpop.eup %5658  ;;  %1159 = vadd.xlane.f32.xlu0 %v1158_v35 }
 0x8f6   :  { %v1161_v40 = vsel %vm639_vm3, %v5659_v38, 0.0 }
 0x8f7   :  { %1162 = vadd.xlane.f32.xlu1 %v1161_v40 }
 0x908   :  { %1227 = vrot.lane.b32.xlu1 %v6135_v1, %s5844_s5 }
 0x90c   :  { %1276 = vrot.lane.b32.xlu1 %v6131_v55, %s7242_s6 }
 0x90f   :  { %v1142_v43 = vpop.xlane.xlu0 %1141 }
 0x910   :  { %v1148_v45 = vsub.f32 %v1132_v15, %v1142_v43 }
 0x912   :  { %v1154_v46 = vmul.f32 1.442695, %v1148_v45 }
 0x913   :  { %v1145_v47 = vpop.xlane.xlu0 %1144 }
 0x914   :  { %5660 = vpow2.f32 %v1154_v46  ;;  %v1149_v48 = vsub.f32 %v1133_v21, %v1145_v47 }
 0x916   :  { %v1156_v50 = vmul.f32 1.442695, %v1149_v48 }
 0x918   :  { %5662 = vpow2.f32 %v1156_v50 }
 0x91e   :  { %v5661_v49 = vpop.eup %5660 }
 0x91f   :  { %v1164_v51 = vsel %vm639_vm3, %v5661_v49, 0.0 }
 0x920   :  { %1165 = vadd.xlane.f32.xlu0 %v1164_v51 }
 0x922   :  { %v5663_v54 = vpop.eup %5662 }
 0x923   :  { %v1167_v59 = vsel %vm639_vm3, %v5663_v54, 0.0 }
 0x930   :  { %1168 = vadd.xlane.f32.xlu1 %v1167_v59 }
 0x936   :  { %1180 = vrot.lane.b32.xlu0 %v6137_v3, %s5844_s5 }
 0x93a   :  { %1274 = vrot.lane.b32.xlu0 %v6129_v53, %s7242_s6 }
 0x941   :  { %1327 = vrot.lane.b32.xlu1 %v6142_v11, %s7242_s6 }
 0x945   :  { %1325 = vrot.lane.b32.xlu1 %v6140_v10, %s7242_s6 }
 0x982   :  { %v1160_v61 = vpop.xlane.xlu0 %1159 }
 0x984   :  { %v1163_v55 = vpop.xlane.xlu1 %1162 }
 0x985   :  { %5664 = vrcp.f32 %v1163_v55 }
 0x986   :  { %5666 = vrcp.f32 %v1160_v61 }
 0x988   :  { %v1228_v60 = vpop.permute.xlu1 %1227 }
 0x989   :  { %5142 = vmatpush3.bf16.msra.mxu0 %v1228_v60 }
 0x98a   :  { %5153 = vmatprep.subr.bf16.mxu0 %v5841_v34 }
 0x98c   :  { %v1277_v10 = vpop.permute.xlu1 %1276 }
 0x98d   :  { %v1282_v11 = vsel %vm540_vm2, %v1277_v10, 0 }
 0x98f   :  { %v5665_v62 = vpop.eup %5664 }
 0x990   :  { %v5667_v0 = vpop.eup %5666  ;;  %v1175_v2 = vmul.f32 %v5665_v62, %v5659_v38 }
 0x991   :  { %v1174_v4 = vmul.f32 %v5667_v0, %v5657_v33 }
 0x993   :  { %v1178_v5 = vpack.c.bf16 %v1175_v2, %v1174_v4 }
 0x9ad   :  { %v1166_v63 = vpop.xlane.xlu0 %1165 }
 0x9ae   :  { %5668 = vrcp.f32 %v1166_v63 }
 0x9b1   :  { %v1181_v53 = vpop.permute.xlu0 %1180 }
 0x9b2   :  { %5136 = vmatpush3.bf16.msra.mxu1 %v1181_v53 }
 0x9b3   :  { %5147 = vmatprep.subr.bf16.mxu1 %v5841_v34 }
 0x9b5   :  { %5138 = vmatmul.mubr.msk.bf16.vlgmr.msra.gmra.mrb[32].mxu1 %vm639_vm3, %v1178_v5  ;;  %v1275_v12 = vpop.permute.xlu0 %1274 }
 0x9b6   :  { %5149 = vmatprep.mubr.msk.bf16.mxu1 %vm5842_vm1, %v5841_v34 }
 0x9b8   :  { %v5669_v14 = vpop.eup %5668 }
 0x9b9   :  { %v1176_v17 = vmul.f32 %v5669_v14, %v5661_v49 }
 0x9bb   :  { %5148 = vmatpush3.bf16.xpose.msra.mxu1 %v1282_v11 }
 0x9bc   :  { %5159 = vmatprep.subr.bf16.mxu1 %v5841_v34 }
 0x9bd   :  { %v1169_v7 = vpop.xlane.xlu1 %1168 }
 0x9be   :  { %5670 = vrcp.f32 %v1169_v7 }
 0x9c1   :  { %v1328_v21 = vpop.permute.xlu1 %1327 }
 0x9c2   :  { %5150 = vmatmul.mubr.msk.bf16.vlgmr.msra.gmra.mrb[36].mxu1 %vm540_vm2, %v1275_v12  ;;  %v1333_v23 = vsel %vm540_vm2, %v1328_v21, 0 }
 0x9c3   :  { %5161 = vmatprep.mubr.msk.bf16.mxu1 %vm5842_vm1, %v5841_v34 }
 0x9c5   :  { %v1326_v24 = vpop.permute.xlu1 %1325 }
 0x9c8   :  { %v5671_v15 = vpop.eup %5670 }
 0x9c9   :  { %v1177_v18 = vmul.f32 %v5671_v15, %v5663_v54 }
 0x9cb   :  { %v1179_v22 = vpack.c.bf16 %v1177_v18, %v1176_v17 }
 0x9cd   :  { %5144 = vmatmul.mubr.msk.bf16.vlgmr.msra.gmra.mrb[24].mxu0 %vm639_vm3, %v1179_v22 }
 0x9ce   :  { %5154 = vmatpush3.bf16.xpose.msra.mxu0 %v1333_v23  ;;  %5155 = vmatprep.mubr.msk.bf16.mxu0 %vm5842_vm1, %v5841_v34 }
 0x9cf   :  { %5165 = vmatprep.subr.bf16.mxu0 %v5841_v34 }
 0x9d5   :  { %5156 = vmatmul.mubr.msk.bf16.vlgmr.msra.gmra.mrb[28].mxu0 %vm540_vm2, %v1326_v24 }
 0x9d6   :  { %5167 = vmatprep.mubr.msk.bf16.mxu0 %vm5842_vm1, %v5841_v34 }
 0xa88   :  { %v1220_v26 = vpop.f32.mrb[32].mxu1 }
 0xa89   :  { %v5139_v28 = vpop.f32.mrb[33].mxu1 }
 0xa8a   :  { %v1223_v29 = vpop.f32.mrb[34].mxu1 }
 0xa8b   :  { %v5384_v30 = vpack.i.bf16 %v1223_v29, %v1220_v26  ;;  %v5140_v31 = vpop.f32.mrb[35].mxu1 }
 0xa95   :  { %v1318_v32 = vpop.f32.mrb[36].mxu1 }
 0xa96   :  { %v1376_v33 = vmul.f32 0.17677669, %v1318_v32  ;;  %v5151_v35 = vpop.f32.mrb[37].mxu1 }
 0xa97   :  { %v1321_v38 = vpop.f32.mrb[38].mxu1 }
 0xa98   :  { %v1377_v40 = vmul.f32 0.17677669, %v1321_v38  ;;  %v5152_v43 = vpop.f32.mrb[39].mxu1  ;;  %v1380_v45 = vsel %vm639_vm3, %v1376_v33, -inf }
 0xa99   :  { %1381 = vmax.xlane.f32.xlu0 %v1380_v45 }
 0xa9a   :  { %v1383_v46 = vsel %vm639_vm3, %v1377_v40, -inf }
 0xa9b   :  { %1384 = vmax.xlane.f32.xlu1 %v1383_v46  ;;  %v5472_v46 = vld [vmem:[%s7221_s8] sm:$0xff]  }
 0xaa0   :  { %v1267_v47 = vpop.f32.mrb[24].mxu0 }
 0xaa1   :  { %v5145_v48 = vpop.f32.mrb[25].mxu0 }
 0xaa2   :  { %v1270_v49 = vpop.f32.mrb[26].mxu0  ;;  %v5474_v48 = vld [vmem:[%s7221_s8 + $0x10] sm:$0xff]  }
 0xaa3   :  { %v5389_v50 = vpack.i.bf16 %v1270_v49, %v1267_v47  ;;  %v5146_v51 = vpop.f32.mrb[27].mxu0  ;;  %v5473_v47 = vld [vmem:[%s7221_s8 + $0x8] sm:$0xff]   ;;  %v5475_v49 = vld [vmem:[%s7221_s8 + $0x18] sm:$0xff]  }
 0xaa4   :  { %v5477_v51 = vld [vmem:[%s7221_s8 + $0x28] sm:$0xff]  }
 0xaa8   :  { %v1369_v54 = vpop.f32.mrb[28].mxu0 }
 0xaa9   :  { %v1378_v59 = vmul.f32 0.17677669, %v1369_v54  ;;  %v5157_v55 = vpop.f32.mrb[29].mxu0  ;;  %v5478_v54 = vld [vmem:[%s7221_s8 + $0x30] sm:$0xff]  }
 0xaaa   :  { %v1372_v60 = vpop.f32.mrb[30].mxu0 }
 0xaab   :  { %v1379_v61 = vmul.f32 0.17677669, %v1372_v60  ;;  %v5158_v62 = vpop.f32.mrb[31].mxu0  ;;  %v1386_v63 = vsel %vm639_vm3, %v1378_v59, -inf }
 0xaac   :  { %1387 = vmax.xlane.f32.xlu0 %v1386_v63  ;;  %v5479_v63 = vld [vmem:[%s7221_s8 + $0x38] sm:$0xff]  }
 0xaad   :  { %v1389_v0 = vsel %vm639_vm3, %v1379_v61, -inf }
 0xab0   :  { %1390 = vmax.xlane.f32.xlu0 %v1389_v0 }
 0xb26   :  { %v1382_v2 = vpop.xlane.xlu0 %1381 }
 0xb27   :  { %v1392_v4 = vsub.f32 %v1376_v33, %v1382_v2 }
 0xb28   :  { %v1385_v53 = vpop.xlane.xlu1 %1384 }
 0xb29   :  { %v1396_v5 = vmul.f32 1.442695, %v1392_v4  ;;  %v1393_v10 = vsub.f32 %v1377_v40, %v1385_v53 }
 0xb2b   :  { %5672 = vpow2.f32 %v1396_v5  ;;  %v1398_v11 = vmul.f32 1.442695, %v1393_v10 }
 0xb2d   :  { %5674 = vpow2.f32 %v1398_v11 }
 0xb35   :  { %v5673_v7 = vpop.eup %5672 }
 0xb36   :  { %v1404_v12 = vsel %vm639_vm3, %v5673_v7, 0.0 }
 0xb37   :  { %v5675_v14 = vpop.eup %5674  ;;  %1405 = vadd.xlane.f32.xlu0 %v1404_v12 }
 0xb38   :  { %v1407_v15 = vsel %vm639_vm3, %v5675_v14, 0.0 }
 0xb39   :  { %1408 = vadd.xlane.f32.xlu1 %v1407_v15  ;;  %v1388_v17 = vpop.xlane.xlu0 %1387 }
 0xb3a   :  { %v1394_v18 = vsub.f32 %v1378_v59, %v1388_v17 }
 0xb3c   :  { %v1400_v21 = vmul.f32 1.442695, %v1394_v18 }
 0xb3d   :  { %v1391_v22 = vpop.xlane.xlu0 %1390 }
 0xb3e   :  { %5676 = vpow2.f32 %v1400_v21  ;;  %v1395_v23 = vsub.f32 %v1379_v61, %v1391_v22 }
 0xb40   :  { %v1402_v24 = vmul.f32 1.442695, %v1395_v23 }
 0xb42   :  { %5678 = vpow2.f32 %v1402_v24 }
 0xb48   :  { %v5677_v26 = vpop.eup %5676 }
 0xb49   :  { %v1410_v28 = vsel %vm639_vm3, %v5677_v26, 0.0 }
 0xb4a   :  { %1411 = vadd.xlane.f32.xlu0 %v1410_v28 }
 0xb4c   :  { %v5679_v29 = vpop.eup %5678 }
 0xb4d   :  { %v1413_v31 = vsel %vm639_vm3, %v5679_v29, 0.0 }
 0xb4e   :  { %1414 = vadd.xlane.f32.xlu1 %v1413_v31 }
 0xb5f   :  { %1473 = vrot.lane.b32.xlu1 %v6135_v1, %s7242_s6 }
 0xb60   :  { %1426 = vrot.lane.b32.xlu0 %v6137_v3, %s7242_s6 }
 0xb63   :  { %5375 = vrot.lane.b32.xlu1 %v5374_v58, %s7242_s6 }
 0xb64   :  { %5385 = vrot.lane.b32.xlu0 %v5384_v30, %s5844_s5 }
 0xb67   :  { %5380 = vrot.lane.b32.xlu1 %v5379_v9, %s7242_s6 }
 0xb6b   :  { %5390 = vrot.lane.b32.xlu1 %v5389_v50, %s5844_s5  ;;  %v5476_v50 = vld [vmem:[%s7221_s8 + $0x20] sm:$0xff]  }
 0xbc4   :  { %v1406_v33 = vpop.xlane.xlu0 %1405 }
 0xbc6   :  { %v1409_v32 = vpop.xlane.xlu1 %1408 }
 0xbc7   :  { %5680 = vrcp.f32 %v1409_v32 }
 0xbc8   :  { %5682 = vrcp.f32 %v1406_v33 }
 0xbd1   :  { %v5681_v1 = vpop.eup %5680 }
 0xbd2   :  { %v5683_v35 = vpop.eup %5682  ;;  %v1421_v38 = vmul.f32 %v5681_v1, %v5675_v14 }
 0xbd3   :  { %v1420_v52 = vmul.f32 %v5683_v35, %v5673_v7 }
 0xbd5   :  { %v1424_v30 = vpack.c.bf16 %v1421_v38, %v1420_v52 }
 0xbd7   :  { %v1412_v3 = vpop.xlane.xlu0 %1411 }
 0xbd8   :  { %5684 = vrcp.f32 %v1412_v3 }
 0xbdb   :  { %v1415_v57 = vpop.xlane.xlu1 %1414  ;;  %v1427_v58 = vpop.permute.xlu0 %1426 }
 0xbdc   :  { %5686 = vrcp.f32 %v1415_v57  ;;  %5160 = vmatpush3.bf16.msra.mxu1 %v1427_v58 }
 0xbdd   :  { %5171 = vmatprep.subr.bf16.mxu1 %v5472_v46 }
 0xbdf   :  { %v1474_v40 = vpop.permute.xlu1 %1473  ;;  %5162 = vmatmul.mubr.msk.bf16.vlgmr.msra.gmra.mrb[40].mxu1 %vm639_vm3, %v1424_v30  ;;  %v5386_v12 = vpop.permute.xlu0 %5385 }
 0xbe0   :  { %5166 = vmatpush3.bf16.msra.mxu0 %v1474_v40  ;;  %5172 = vmatpush3.bf16.msra.mxu1 %v5472_v46  ;;  %v5388_v17 = vunpack.i.h.bf16 %v5386_v12  ;;  %v5387_v18 = vunpack.i.l.bf16 %v5386_v12 }
 0xbe1   :  { %5173 = vmatprep.subr.bf16.mxu1 %v5473_v47 }
 0xbe2   :  { %v5685_v6 = vpop.eup %5684 }
 0xbe3   :  { %v1422_v9 = vmul.f32 %v5685_v6, %v5677_v26  ;;  %v5376_v10 = vpop.permute.xlu1 %5375 }
 0xbe4   :  { %5174 = vmatpush3.bf16.msra.mxu1 %v5473_v47  ;;  %v5378_v11 = vunpack.i.h.bf16 %v5376_v10  ;;  %v5377_v7 = vunpack.i.l.bf16 %v5376_v10 }
 0xbe5   :  { %5175 = vmatprep.subr.bf16.mxu1 %v5474_v48 }
 0xbe6   :  { %v5687_v8 = vpop.eup %5686  ;;  %v1569_v14 = vsel %vm540_vm2, %v6193_v27, %v5378_v11  ;;  %v1568_v15 = vsel %vm540_vm2, %v6191_v25, %v5377_v7 }
 0xbe7   :  { %v1423_v43 = vmul.f32 %v5687_v8, %v5679_v29  ;;  %v5381_v22 = vpop.permute.xlu1 %5380  ;;  %v1572_v26 = vsel %vm126_vm0, %v1568_v15, %v5387_v18  ;;  %v1573_v28 = vsel %vm126_vm0, %v1569_v14, %v5388_v17  ;;  %v5488_v18 = vld [vmem:[%s7225_s12 + $0x24] ss:$8 sps:$4 sm:$0xff]  }
 0xbe8   :  { %5176 = vmatpush3.bf16.msra.mxu1 %v5474_v48  ;;  %v5383_v33 = vunpack.i.h.bf16 %v5381_v22  ;;  %v5382_v25 = vunpack.i.l.bf16 %v5381_v22  ;;  %v5491_v22 = vld [vmem:[%s7225_s12 + $0x34] ss:$8 sps:$4 sm:$0xff]  }
 0xbe9   :  { %v1425_v45 = vpack.c.bf16 %v1423_v43, %v1422_v9  ;;  %5177 = vmatprep.subr.bf16.mxu1 %v5475_v49  ;;  %v4605_v43 = vld [vmem:[%s7222_s9] ss:$0 sm:$0xff] }
 0xbea   :  { %v1571_v38 = vsel %vm540_vm2, %v6199_v44, %v5383_v33  ;;  %v1570_v52 = vsel %vm540_vm2, %v6197_v42, %v5382_v25  ;;  %v5501_v33 = vld [vmem:[%s7225_s12 + $0x70] ss:$8 sps:$4 sm:$0xff]  }
 0xbeb   :  { %5168 = vmatmul.mubr.msk.bf16.vlgmr.msra.gmra.mrb[32].mxu0 %vm639_vm3, %v1425_v45  ;;  %v5391_v27 = vpop.permute.xlu1 %5390 }
 0xbec   :  { %1915 = vmatprep.mubr.bf16.mxu0 %v5840_v56  ;;  %5178 = vmatpush3.bf16.msra.mxu1 %v5475_v49  ;;  %v5393_v1 = vunpack.i.h.bf16 %v5391_v27  ;;  %v5392_v3 = vunpack.i.l.bf16 %v5391_v27  ;;  %v5503_v27 = vld [vmem:[%s7225_s12 + $0x74] ss:$8 sps:$4 sm:$0xff]  }
 0xbed   :  { %5179 = vmatprep.subr.bf16.mxu1 %v5476_v50 }
 0xbee   :  { %v1574_v30 = vsel %vm126_vm0, %v1570_v52, %v5392_v3  ;;  %v1575_v40 = vsel %vm126_vm0, %v1571_v38, %v5393_v1 }
 0xbf0   :  { %5180 = vmatpush3.bf16.msra.mxu1 %v5476_v50 }
 0xbf1   :  { %5181 = vmatprep.subr.bf16.mxu1 %v5477_v51 }
 0xbf4   :  { %5182 = vmatpush3.bf16.msra.mxu1 %v5477_v51 }
 0xbf5   :  { %5183 = vmatprep.subr.bf16.mxu1 %v5478_v54 }
 0xbf8   :  { %5184 = vmatpush3.bf16.msra.mxu1 %v5478_v54 }
 0xbf9   :  { %5185 = vmatprep.subr.bf16.mxu1 %v5479_v63 }
 0xbfc   :  { %5186 = vmatpush3.bf16.msra.mxu1 %v5479_v63 }
 0xcb2   :  { %v1466_v59 = vpop.f32.mrb[40].mxu1 }
 0xcb3   :  { %v5163_v55 = vpop.f32.mrb[41].mxu1 }
 0xcb4   :  { %v1469_v60 = vpop.f32.mrb[42].mxu1 }
 0xcb5   :  { %v5394_v61 = vpack.i.bf16 %v1469_v60, %v1466_v59  ;;  %v5164_v62 = vpop.f32.mrb[43].mxu1 }
 0xcb7   :  { %5395 = vrot.lane.b32.xlu0 %v5394_v61, %s5843_s1 }
 0xcbe   :  { %v1513_v0 = vpop.f32.mrb[32].mxu0 }
 0xcbf   :  { %v5169_v2 = vpop.f32.mrb[33].mxu0 }
 0xcc0   :  { %v1516_v4 = vpop.f32.mrb[34].mxu0 }
 0xcc1   :  { %v5399_v53 = vpack.i.bf16 %v1516_v4, %v1513_v0  ;;  %v5170_v5 = vpop.f32.mrb[35].mxu0 }
 0xcc3   :  { %5400 = vrot.lane.b32.xlu1 %v5399_v53, %s5843_s1 }
 0xd29   :  { %v5396_v21 = vpop.permute.xlu0 %5395 }
 0xd2a   :  { %v5398_v23 = vunpack.i.h.bf16 %v5396_v21  ;;  %v5397_v24 = vunpack.i.l.bf16 %v5396_v21  ;;  %v5486_v21 = vld [vmem:[%s7225_s12 + $0x20] ss:$8 sps:$4 sm:$0xff]  }
 0xd2c   :  { %v1577_v29 = vsel %vm1576_vm4, %v1572_v26, %v5397_v24  ;;  %v1578_v31 = vsel %vm1576_vm4, %v1573_v28, %v5398_v23  ;;  %v5489_v23 = vld [vmem:[%s7225_s12 + $0x30] ss:$8 sps:$4 sm:$0xff]   ;;  %v5494_v24 = vld [vmem:[%s7225_s12 + $0x44] ss:$8 sps:$4 sm:$0xff]   ;;  %v5492_v26 = vld [vmem:[%s7225_s12 + $0x40] ss:$8 sps:$4 sm:$0xff]  }
 0xd2d   :  { %v1581_v32 = vpack.c.bf16 %v1578_v31, %v1577_v29  ;;  %v5497_v28 = vld [vmem:[%s7225_s12 + $0x54] ss:$8 sps:$4 sm:$0xff]   ;;  %v5495_v29 = vld [vmem:[%s7225_s12 + $0x50] ss:$8 sps:$4 sm:$0xff]   ;;  %v5500_v31 = vld [vmem:[%s7225_s12 + $0x64] ss:$8 sps:$4 sm:$0xff]  }
 0xd2f   :  { %5187 = vmatprep.mubr.bf16.mxu1 %v1581_v32  ;;  %v5498_v32 = vld [vmem:[%s7225_s12 + $0x60] ss:$8 sps:$4 sm:$0xff]  }
 0xd35   :  { %v5401_v35 = vpop.permute.xlu1 %5400 }
 0xd36   :  { %v5403_v57 = vunpack.i.h.bf16 %v5401_v35  ;;  %v5402_v58 = vunpack.i.l.bf16 %v5401_v35 }
 0xd38   :  { %v1580_v6 = vsel %vm1576_vm4, %v1575_v40, %v5403_v57  ;;  %v1579_v8 = vsel %vm1576_vm4, %v1574_v30, %v5402_v58 }
 0xd39   :  { %v1582_v9 = vpack.c.bf16 %v1580_v6, %v1579_v8 }
 0xd3b   :  { %5188 = vmatmul.mubr.bf16.vlgmr.msra.gmra.mrb[44].mxu1 %v1582_v9 }
 0xe0e   :  { %v5189_v44 = vpop.f32.mrb[44].mxu1 }
 0xe0f   :  { %v1688_v45 = vpop.f32.mrb[45].mxu1  ;;  %v1697_v48 = vadd.f32 %v5189_v44, %v4605_v43 }
 0xe10   :  { %v1689_v46 = vadd.f32 %v4605_v43, %v1688_v45  ;;  %v5190_v42 = vpop.f32.mrb[46].mxu1 }
 0xe11   :  { %v1691_v47 = vpop.f32.mrb[47].mxu1  ;;  %v6365_v54 = vadd.f32 %v1697_v48, %v5988_v13  ;;  %v1700_v59 = vadd.f32 %v5190_v42, %v4605_v43  ;;  %v5485_v13 = vld [vmem:[%s7225_s12 + $0x14] ss:$8 sps:$4 sm:$0xff]   ;;  %v4615_v48 = vld [vmem:[%s7224_s11] ss:$0 sm:$0xff] }
 0xe12   :  { %v6358_v49 = vadd.f32 %v1689_v46, %v5990_v16  ;;  %v1692_v50 = vadd.f32 %v4605_v43, %v1691_v47  ;;  %v5480_v16 = vld [vmem:[%s7225_s12] ss:$8 sps:$4 sm:$0xff]  }
 0xe13   :  { %v6370_v55 = vadd.f32 %v1700_v59, %v5997_v19  ;;  %v5483_v19 = vld [vmem:[%s7225_s12 + $0x10] ss:$8 sps:$4 sm:$0xff]   ;;  %v4614_v43 = vld [vmem:[%s7223_s10] ss:$0 sm:$0xff] }
 0xe14   :  { %v6361_v51 = vadd.f32 %v1692_v50, %v5999_v20  ;;  %1709 = vadd.xlane.f32.xlu0 %v6358_v49  ;;  %v5482_v20 = vld [vmem:[%s7225_s12 + $0x4] ss:$8 sps:$4 sm:$0xff]  }
 0xe15   :  { %1883 = vmatprep.subr.bf16.mxu0 %v5482_v20 }
 0xe16   :  { %1711 = vadd.xlane.f32.xlu1 %v6361_v51  ;;  %1884 = vmatpush1.bf16.msra.mxu0 %v5480_v16 }
 0xe17   :  { %1885 = vmatprep.subr.bf16.mxu0 %v5485_v13 }
 0xe18   :  { %1713 = vadd.xlane.f32.xlu0 %v6365_v54 }
 0xe1a   :  { %1886 = vmatpush1.bf16.msra.mxu0 %v5483_v19 }
 0xe1b   :  { %1887 = vmatprep.subr.bf16.mxu0 %v5488_v18  ;;  %v5514_v18 = vld [vmem:[%s7227_s14 + $0x68] sm:$0xff]  }
 0xe1c   :  { %1715 = vadd.xlane.f32.xlu0 %v6370_v55 }
 0xe1e   :  { %1888 = vmatpush1.bf16.msra.mxu0 %v5486_v21  ;;  %v5515_v21 = vld [vmem:[%s7227_s14 + $0x28] sm:$0xff]  }
 0xe1f   :  { %1889 = vmatprep.subr.bf16.mxu0 %v5491_v22  ;;  %v5516_v22 = vld [vmem:[%s7227_s14 + $0x70] sm:$0xff]  }
 0xe22   :  { %1890 = vmatpush1.bf16.msra.mxu0 %v5489_v23  ;;  %v5517_v23 = vld [vmem:[%s7227_s14 + $0x30] sm:$0xff]  }
 0xe23   :  { %1891 = vmatprep.subr.bf16.mxu0 %v5494_v24  ;;  %v5518_v24 = vld [vmem:[%s7227_s14 + $0x78] sm:$0xff]  }
 0xe26   :  { %1892 = vmatpush1.bf16.msra.mxu0 %v5492_v26  ;;  %v5519_v26 = vld [vmem:[%s7227_s14 + $0x38] sm:$0xff]  }
 0xe27   :  { %1893 = vmatprep.subr.bf16.mxu0 %v5497_v28  ;;  %v1791_v28 = vld [vmem:[%s7226_s13] sm:$0x3] }
 0xe2a   :  { %1894 = vmatpush1.bf16.msra.mxu0 %v5495_v29  ;;  %v1796_v29 = vrot.slane %v1791_v28, %v6116_v37 }
 0xe2b   :  { %1895 = vmatprep.subr.bf16.mxu0 %v5500_v31  ;;  %v1800_v31 = vrot.slane %v1791_v28, %v6122_v39 }
 0xe2e   :  { %1896 = vmatpush1.bf16.msra.mxu0 %v5498_v32 }
 0xe2f   :  { %1897 = vmatprep.subr.bf16.mxu0 %v5503_v27 }
 0xe32   :  { %1898 = vmatpush1.bf16.msra.mxu0 %v5501_v33 }
 0xea1   :  { %v1710_v60 = vpop.xlane.xlu0 %1709 }
 0xea2   :  { %v1717_v61 = vmul.f32 0.0078125, %v1710_v60 }
 0xea3   :  { %v1712_v62 = vpop.xlane.xlu1 %1711 }
 0xea4   :  { %v1721_v63 = vsub.f32 %v6358_v49, %v1717_v61  ;;  %v1718_v0 = vmul.f32 0.0078125, %v1712_v62 }
 0xea5   :  { %v1714_v2 = vpop.xlane.xlu0 %1713 }
 0xea6   :  { %v1722_v4 = vsub.f32 %v6361_v51, %v1718_v0  ;;  %v1719_v53 = vmul.f32 0.0078125, %v1714_v2  ;;  %v1725_v5 = vmul.f32 %v1721_v63, %v1721_v63 }
 0xea8   :  { %v1723_v10 = vsub.f32 %v6365_v54, %v1719_v53  ;;  %1729 = vadd.xlane.f32.xlu0 %v1725_v5  ;;  %v1726_v11 = vmul.f32 %v1722_v4, %v1722_v4  ;;  %v5505_v53 = vld [vmem:[%s7227_s14] sm:$0xff]   ;;  %v5506_v5 = vld [vmem:[%s7227_s14 + $0x48] sm:$0xff]  }
 0xea9   :  { %v1716_v7 = vpop.xlane.xlu0 %1715 }
 0xeaa   :  { %v1720_v12 = vmul.f32 0.0078125, %v1716_v7  ;;  %1731 = vadd.xlane.f32.xlu1 %v1726_v11  ;;  %v1727_v14 = vmul.f32 %v1723_v10, %v1723_v10  ;;  %v5508_v11 = vld [vmem:[%s7227_s14 + $0x50] sm:$0xff]  }
 0xeab   :  { %v5509_v7 = vld [vmem:[%s7227_s14 + $0x10] sm:$0xff]  }
 0xeac   :  { %v1724_v15 = vsub.f32 %v6370_v55, %v1720_v12  ;;  %1733 = vadd.xlane.f32.xlu0 %v1727_v14  ;;  %v5510_v12 = vld [vmem:[%s7227_s14 + $0x58] sm:$0xff]  }
 0xead   :  { %v5511_v14 = vld [vmem:[%s7227_s14 + $0x18] sm:$0xff]  }
 0xeae   :  { %v1728_v17 = vmul.f32 %v1724_v15, %v1724_v15 }
 0xeb0   :  { %1735 = vadd.xlane.f32.xlu1 %v1728_v17  ;;  %v5513_v17 = vld [vmem:[%s7227_s14 + $0x20] sm:$0xff]  }
 0xf35   :  { %v1730_v25 = vpop.xlane.xlu0 %1729 }
 0xf36   :  { %v1737_v1 = vmul.f32 0.0078125, %v1730_v25 }
 0xf37   :  { %v1732_v3 = vpop.xlane.xlu1 %1731 }
 0xf38   :  { %v1741_v35 = vadd.f32 1e-05, %v1737_v1  ;;  %v1738_v38 = vmul.f32 0.0078125, %v1732_v3 }
 0xf39   :  { %v1734_v52 = vpop.xlane.xlu0 %1733 }
 0xf3a   :  { %5688 = vrsqrt.f32 %v1741_v35  ;;  %v1742_v57 = vadd.f32 1e-05, %v1738_v38  ;;  %v1739_v58 = vmul.f32 0.0078125, %v1734_v52 }
 0xf3c   :  { %5690 = vrsqrt.f32 %v1742_v57  ;;  %v1743_v30 = vadd.f32 1e-05, %v1739_v58 }
 0xf3d   :  { %v1736_v40 = vpop.xlane.xlu1 %1735 }
 0xf3e   :  { %5692 = vrsqrt.f32 %v1743_v30  ;;  %v1740_v6 = vmul.f32 0.0078125, %v1736_v40 }
 0xf40   :  { %v1744_v8 = vadd.f32 1e-05, %v1740_v6 }
 0xf42   :  { %5694 = vrsqrt.f32 %v1744_v8 }
 0xf44   :  { %v5689_v9 = vpop.eup %5688 }
 0xf45   :  { %v1749_v44 = vmul.f32 %v5689_v9, %v1721_v63 }
 0xf46   :  { %v5691_v45 = vpop.eup %5690 }
 0xf47   :  { %v1750_v46 = vmul.f32 %v5691_v45, %v1722_v4  ;;  %v1759_v42 = vmul.f32 %v4614_v43, %v1749_v44  ;;  %v5504_v4 = vld [vmem:[%s7227_s14 + $0x40] sm:$0xff]  }
 0xf48   :  { %v5693_v47 = vpop.eup %5692  ;;  %4917 = vmatprep.subr.bf16.mxu1 %v5504_v4 }
 0xf49   :  { %v1760_v50 = vmul.f32 %v4614_v43, %v1750_v46  ;;  %v1769_v59 = vadd.f32 %v4615_v48, %v1759_v42  ;;  %v1751_v20 = vmul.f32 %v5693_v47, %v1723_v10  ;;  %4918 = vmatpush3.bf16.msra.mxu1 %v5505_v53  ;;  %v5507_v10 = vld [vmem:[%s7227_s14 + $0x8] sm:$0xff]  }
 0xf4a   :  { %4919 = vmatprep.subr.bf16.mxu1 %v5506_v5 }
 0xf4b   :  { %v1770_v16 = vadd.f32 %v4615_v48, %v1760_v50  ;;  %v1761_v61 = vmul.f32 %v4614_v43, %v1751_v20 }
 0xf4c   :  { %v5695_v13 = vpop.eup %5694 }
 0xf4d   :  { %v1773_v19 = vpack.c.bf16 %v1770_v16, %v1769_v59  ;;  %v1752_v60 = vmul.f32 %v5695_v13, %v1724_v15  ;;  %v1771_v0 = vadd.f32 %v4615_v48, %v1761_v61  ;;  %4920 = vmatpush3.bf16.msra.mxu1 %v5507_v10  ;;  %v5512_v15 = vld [vmem:[%s7227_s14 + $0x60] sm:$0xff]  }
 0xf4e   :  { %4921 = vmatprep.subr.bf16.mxu1 %v5508_v11 }
 0xf4f   :  { %1916 = vmatmul.mubr.bf16.vlgmr.msra.gmra.mrb[36].mxu0 %v1773_v19  ;;  %v1762_v62 = vmul.f32 %v4614_v43, %v1752_v60 }
 0xf50   :  { %1925 = vmatprep.mubr.bf16.mxu0 %v5840_v56 }
 0xf51   :  { %v1772_v63 = vadd.f32 %v4615_v48, %v1762_v62  ;;  %4922 = vmatpush3.bf16.msra.mxu1 %v5509_v7 }
 0xf52   :  { %4923 = vmatprep.subr.bf16.mxu1 %v5510_v12 }
 0xf53   :  { %v1774_v2 = vpack.c.bf16 %v1772_v63, %v1771_v0 }
 0xf55   :  { %4924 = vmatpush3.bf16.msra.mxu1 %v5511_v14 }
 0xf56   :  { %4925 = vmatprep.subr.bf16.mxu1 %v5512_v15 }
 0xf57   :  { %1926 = vmatmul.mubr.bf16.gmra.mrb[40].mxu0 %v1774_v2 }
 0xf58   :  { %2481 = vmatprep.mubr.bf16.mxu0 %v5840_v56 }
 0xf59   :  { %4926 = vmatpush3.bf16.msra.mxu1 %v5513_v17 }
 0xf5a   :  { %4927 = vmatprep.subr.bf16.mxu1 %v5514_v18 }
 0xf5d   :  { %4928 = vmatpush3.bf16.msra.mxu1 %v5515_v21 }
 0xf5e   :  { %4929 = vmatprep.subr.bf16.mxu1 %v5516_v22 }
 0xf61   :  { %4930 = vmatpush3.bf16.msra.mxu1 %v5517_v23 }
 0xf62   :  { %4931 = vmatprep.subr.bf16.mxu1 %v5518_v24 }
 0xf65   :  { %4932 = vmatpush3.bf16.msra.mxu1 %v5519_v26 }
0x1022   :  { %v1917_v32 = vpop.f32.mrb[36].mxu0 }
0x1023   :  { %v6486_v27 = vadd.f32 %v1917_v32, %v1796_v29  ;;  %v1919_v33 = vpop.f32.mrb[37].mxu0 }
0x1024   :  { %v6488_v25 = vadd.f32 %v1919_v33, %v1800_v31  ;;  %v1921_v1 = vpop.f32.mrb[38].mxu0 }
0x1025   :  { %v1936_v3 = vmul.f32 %v6486_v27, %v6486_v27  ;;  %v6492_v35 = vadd.f32 %v1921_v1, %v1796_v29  ;;  %v1923_v38 = vpop.f32.mrb[39].mxu0 }
0x1026   :  { %v1937_v52 = vmul.f32 %v6488_v25, %v6488_v25  ;;  %v6496_v57 = vadd.f32 %v1923_v38, %v1800_v31 }
0x1027   :  { %v1944_v58 = vmul.f32 %v1936_v3, %v6486_v27  ;;  %v1938_v30 = vmul.f32 %v6492_v35, %v6492_v35 }
0x1028   :  { %v1945_v40 = vmul.f32 %v1937_v52, %v6488_v25  ;;  %v1939_v6 = vmul.f32 %v6496_v57, %v6496_v57 }
0x1029   :  { %v1952_v8 = vmul.f32 0.044715, %v1944_v58  ;;  %v1946_v9 = vmul.f32 %v1938_v30, %v6492_v35 }
0x102a   :  { %v1953_v43 = vmul.f32 0.044715, %v1945_v40  ;;  %v1947_v44 = vmul.f32 %v1939_v6, %v6496_v57  ;;  %v1927_v45 = vpop.f32.mrb[40].mxu0 }
0x102b   :  { %v1960_v46 = vadd.f32 %v1952_v8, %v6486_v27  ;;  %v1954_v42 = vmul.f32 0.044715, %v1946_v9  ;;  %v6507_v47 = vadd.f32 %v1927_v45, %v1796_v29  ;;  %v1929_v48 = vpop.f32.mrb[41].mxu0 }
0x102c   :  { %v1961_v50 = vadd.f32 %v1953_v43, %v6488_v25  ;;  %v1955_v59 = vmul.f32 0.044715, %v1947_v44  ;;  %v6510_v16 = vadd.f32 %v1929_v48, %v1800_v31  ;;  %v1931_v20 = vpop.f32.mrb[42].mxu0 }
0x102d   :  { %v1968_v13 = vmul.f32 0.7978846, %v1960_v46  ;;  %v1962_v19 = vadd.f32 %v1954_v42, %v6492_v35  ;;  %v1940_v60 = vmul.f32 %v6507_v47, %v6507_v47  ;;  %v6515_v61 = vadd.f32 %v1931_v20, %v1796_v29  ;;  %v1933_v62 = vpop.f32.mrb[43].mxu0 }
0x102e   :  { %v1969_v63 = vmul.f32 0.7978846, %v1961_v50  ;;  %v1963_v0 = vadd.f32 %v1955_v59, %v6496_v57  ;;  %v1941_v2 = vmul.f32 %v6510_v16, %v6510_v16  ;;  %v6520_v4 = vadd.f32 %v1933_v62, %v1800_v31 }
0x102f   :  { %5696 = vtanh.f32 %v1968_v13  ;;  %v1970_v53 = vmul.f32 0.7978846, %v1962_v19  ;;  %v1948_v5 = vmul.f32 %v1940_v60, %v6507_v47  ;;  %v1942_v10 = vmul.f32 %v6515_v61, %v6515_v61 }
0x1030   :  { %5698 = vtanh.f32 %v1969_v63  ;;  %v1971_v11 = vmul.f32 0.7978846, %v1963_v0  ;;  %v1949_v7 = vmul.f32 %v1941_v2, %v6510_v16  ;;  %v1943_v12 = vmul.f32 %v6520_v4, %v6520_v4 }
0x1031   :  { %5700 = vtanh.f32 %v1970_v53  ;;  %v1956_v14 = vmul.f32 0.044715, %v1948_v5  ;;  %v1950_v15 = vmul.f32 %v1942_v10, %v6515_v61 }
0x1032   :  { %5702 = vtanh.f32 %v1971_v11  ;;  %v1957_v17 = vmul.f32 0.044715, %v1949_v7  ;;  %v1951_v18 = vmul.f32 %v1943_v12, %v6520_v4 }
0x1033   :  { %v1964_v21 = vadd.f32 %v1956_v14, %v6507_v47  ;;  %v1958_v22 = vmul.f32 0.044715, %v1950_v15  ;;  %v4632_v15 = vld [vmem:[%s7228_s15] ss:$0 sm:$0xff] }
0x1034   :  { %v1965_v23 = vadd.f32 %v1957_v17, %v6510_v16  ;;  %v1959_v24 = vmul.f32 0.044715, %v1951_v18 }
0x1035   :  { %v1972_v26 = vmul.f32 0.7978846, %v1964_v21  ;;  %v1966_v28 = vadd.f32 %v1958_v22, %v6515_v61 }
0x1036   :  { %v1973_v29 = vmul.f32 0.7978846, %v1965_v23  ;;  %v1967_v31 = vadd.f32 %v1959_v24, %v6520_v4 }
0x1037   :  { %5704 = vtanh.f32 %v1972_v26  ;;  %v1974_v32 = vmul.f32 0.7978846, %v1966_v28 }
0x1038   :  { %5706 = vtanh.f32 %v1973_v29  ;;  %v1975_v33 = vmul.f32 0.7978846, %v1967_v31 }
0x1039   :  { %v5697_v1 = vpop.eup %5696  ;;  %5708 = vtanh.f32 %v1974_v32 }
0x103a   :  { %v5699_v3 = vpop.eup %5698  ;;  %v1984_v38 = vadd.f32 1.0, %v5697_v1  ;;  %5710 = vtanh.f32 %v1975_v33 }
0x103b   :  { %v5701_v52 = vpop.eup %5700  ;;  %v1985_v58 = vadd.f32 1.0, %v5699_v3 }
0x103c   :  { %v5703_v30 = vpop.eup %5702  ;;  %v1992_v40 = vmul.f32 0.5, %v1984_v38  ;;  %v1986_v6 = vadd.f32 1.0, %v5701_v52  ;;  %v5522_v38 = vld [vmem:[%s7255_s24 + $0xc4] ss:$12 sps:$4 sm:$0xff]  }
0x103d   :  { %v1987_v8 = vadd.f32 1.0, %v5703_v30  ;;  %v1993_v9 = vmul.f32 0.5, %v1985_v58  ;;  %2449 = vmatprep.subr.bf16.mxu0 %v5522_v38 }
0x103e   :  { %v1994_v43 = vmul.f32 0.5, %v1986_v6  ;;  %v2000_v45 = vmul.f32 %v1992_v40, %v6486_v27 }
0x103f   :  { %v1995_v44 = vmul.f32 0.5, %v1987_v8  ;;  %v2001_v48 = vmul.f32 %v1993_v9, %v6488_v25 }
0x1040   :  { %v2002_v46 = vmul.f32 %v1994_v43, %v6492_v35 }
0x1041   :  { %v5705_v42 = vpop.eup %5704  ;;  %v2003_v50 = vmul.f32 %v1995_v44, %v6496_v57 }
0x1042   :  { %v5707_v59 = vpop.eup %5706  ;;  %v2008_v20 = vpack.c.bf16 %v2002_v46, %v2000_v45  ;;  %v1988_v13 = vadd.f32 1.0, %v5705_v42 }
0x1043   :  { %v5709_v19 = vpop.eup %5708  ;;  %v2009_v60 = vpack.c.bf16 %v2003_v50, %v2001_v48  ;;  %v1989_v62 = vadd.f32 1.0, %v5707_v59 }
0x1044   :  { %v5711_v63 = vpop.eup %5710  ;;  %v1990_v0 = vadd.f32 1.0, %v5709_v19  ;;  %v1996_v2 = vmul.f32 0.5, %v1988_v13  ;;  %v5528_v13 = vld [vmem:[%s7255_s24 + $0xf4] ss:$12 sps:$4 sm:$0xff]  }
0x1045   :  { %2179 = vmatprep.mubr.bf16.mxu1 %v2009_v60  ;;  %v1991_v53 = vadd.f32 1.0, %v5711_v63  ;;  %v1997_v5 = vmul.f32 0.5, %v1989_v62  ;;  %v5529_v19 = vld [vmem:[%s7255_s24 + $0xc8] ss:$12 sps:$4 sm:$0xff]   ;;  %v5526_v60 = vld [vmem:[%s7255_s24 + $0xf0] ss:$12 sps:$4 sm:$0xff]  }
0x1046   :  { %2180 = vmatmul.mubr.bf16.vlgmr.msra.gmra.mrb[48].mxu1 %v2008_v20  ;;  %v1998_v27 = vmul.f32 0.5, %v1990_v0  ;;  %v2004_v10 = vmul.f32 %v1996_v2, %v6507_v47  ;;  %5191 = vmatprep.subr.bf16.mxu1 %v5529_v19  ;;  %v5532_v62 = vld [vmem:[%s7255_s24 + $0x10c] ss:$12 sps:$4 sm:$0xff]   ;;  %v5530_v0 = vld [vmem:[%s7255_s24 + $0x108] ss:$12 sps:$4 sm:$0xff]  }
0x1047   :  { %v1999_v35 = vmul.f32 0.5, %v1991_v53  ;;  %v2005_v57 = vmul.f32 %v1997_v5, %v6510_v16  ;;  %5192 = vmatpush3.bf16.msra.mxu1 %v5529_v19  ;;  %v5533_v63 = vld [vmem:[%s7255_s24 + $0xe0] ss:$12 sps:$4 sm:$0xff]   ;;  %v5536_v2 = vld [vmem:[%s7255_s24 + $0x124] ss:$12 sps:$4 sm:$0xff]  }
0x1048   :  { %v2006_v25 = vmul.f32 %v1998_v27, %v6515_v61  ;;  %5193 = vmatprep.subr.bf16.mxu1 %v5533_v63  ;;  %v5537_v53 = vld [vmem:[%s7255_s24 + $0xf8] ss:$12 sps:$4 sm:$0xff]   ;;  %v5534_v5 = vld [vmem:[%s7255_s24 + $0x120] ss:$12 sps:$4 sm:$0xff]   ;;  %v5540_v27 = vld [vmem:[%s7255_s24 + $0x13c] ss:$12 sps:$4 sm:$0xff]  }
0x1049   :  { %v2007_v11 = vmul.f32 %v1999_v35, %v6520_v4  ;;  %v5541_v35 = vld [vmem:[%s7255_s24 + $0x110] ss:$12 sps:$4 sm:$0xff]  }
0x104a   :  { %v2010_v7 = vpack.c.bf16 %v2006_v25, %v2004_v10  ;;  %v5538_v10 = vld [vmem:[%s7255_s24 + $0x138] ss:$12 sps:$4 sm:$0xff]   ;;  %v5544_v25 = vld [vmem:[%s7255_s24 + $0x154] ss:$12 sps:$4 sm:$0xff]  }
0x104b   :  { %v2011_v12 = vpack.c.bf16 %v2007_v11, %v2005_v57  ;;  %5194 = vmatpush3.bf16.msra.mxu1 %v5533_v63  ;;  %v5545_v57 = vld [vmem:[%s7255_s24 + $0x128] ss:$12 sps:$4 sm:$0xff]   ;;  %v5542_v11 = vld [vmem:[%s7255_s24 + $0x150] ss:$12 sps:$4 sm:$0xff]  }
0x104c   :  { %5195 = vmatprep.subr.bf16.mxu1 %v5537_v53 }
0x104d   :  { %2187 = vmatprep.mubr.bf16.mxu1 %v2011_v12  ;;  %v5548_v12 = vld [vmem:[%s7255_s24 + $0x16c] ss:$12 sps:$4 sm:$0xff]  }
0x104e   :  { %2188 = vmatmul.mubr.bf16.gmra.mrb[52].mxu1 %v2010_v7  ;;  %v5546_v7 = vld [vmem:[%s7255_s24 + $0x168] ss:$12 sps:$4 sm:$0xff]  }
0x104f   :  { %5196 = vmatpush3.bf16.msra.mxu1 %v5537_v53 }
0x1050   :  { %5197 = vmatprep.subr.bf16.mxu1 %v5541_v35 }
0x1053   :  { %5198 = vmatpush3.bf16.msra.mxu1 %v5541_v35 }
0x1054   :  { %5199 = vmatprep.subr.bf16.mxu1 %v5545_v57 }
0x1057   :  { %5200 = vmatpush3.bf16.msra.mxu1 %v5545_v57 }
0x1119   :  { %v4933_v14 = vpop.f32.mrb[48].mxu1 }
0x111a   :  { %v4934_v17 = vpop.f32.mrb[49].mxu1 }
0x111b   :  { %v4935_v18 = vadd.f32 %v4934_v17, %v4933_v14  ;;  %v4936_v21 = vpop.f32.mrb[50].mxu1  ;;  %v5549_v14 = vld [vmem:[%s7255_s24 + $0x140] ss:$12 sps:$4 sm:$0xff]   ;;  %v5551_v17 = vld [vmem:[%s7255_s24 + $0x170] ss:$12 sps:$4 sm:$0xff]  }
0x111c   :  { %v4937_v22 = vpop.f32.mrb[51].mxu1  ;;  %5201 = vmatprep.subr.bf16.mxu1 %v5549_v14 }
0x111d   :  { %v2182_v47 = vadd.f32 %v4935_v18, %v4632_v15  ;;  %v4938_v23 = vadd.f32 %v4937_v22, %v4936_v21  ;;  %5202 = vmatpush3.bf16.msra.mxu1 %v5549_v14 }
0x111f   :  { %v2185_v61 = vadd.f32 %v4938_v23, %v4632_v15  ;;  %v6546_v16 = vadd.f32 %v2182_v47, %v6358_v49 }
0x1121   :  { %v4939_v4 = vpop.f32.mrb[52].mxu1  ;;  %2204 = vadd.xlane.f32.xlu0 %v6546_v16  ;;  %v6550_v24 = vadd.f32 %v2185_v61, %v6361_v51  ;;  %v5520_v51 = vld [vmem:[%s7255_s24 + $0xc0] ss:$12 sps:$4 sm:$0xff]  }
0x1122   :  { %v4940_v26 = vpop.f32.mrb[53].mxu1  ;;  %2450 = vmatpush1.bf16.msra.mxu0 %v5520_v51 }
0x1123   :  { %v4941_v28 = vadd.f32 %v4940_v26, %v4939_v4  ;;  %v4942_v29 = vpop.f32.mrb[54].mxu1  ;;  %2206 = vadd.xlane.f32.xlu1 %v6550_v24 }
0x1124   :  { %v4943_v31 = vpop.f32.mrb[55].mxu1 }
0x1125   :  { %v2190_v32 = vadd.f32 %v4941_v28, %v4632_v15  ;;  %v4944_v33 = vadd.f32 %v4943_v31, %v4942_v29 }
0x1127   :  { %v2193_v1 = vadd.f32 %v4944_v33, %v4632_v15  ;;  %v6554_v3 = vadd.f32 %v2190_v32, %v6365_v54  ;;  %v5525_v54 = vld [vmem:[%s7255_s24 + $0xdc] ss:$12 sps:$4 sm:$0xff]   ;;  %v5550_v15 = vld [vmem:[%s7255_s24 + $0x158] ss:$12 sps:$4 sm:$0xff]  }
0x1128   :  { %2451 = vmatprep.subr.bf16.mxu0 %v5525_v54  ;;  %5203 = vmatprep.subr.bf16.mxu1 %v5550_v15 }
0x1129   :  { %2208 = vadd.xlane.f32.xlu0 %v6554_v3  ;;  %v6558_v49 = vadd.f32 %v2193_v1, %v6370_v55  ;;  %v5523_v55 = vld [vmem:[%s7255_s24 + $0xd8] ss:$12 sps:$4 sm:$0xff]   ;;  %5204 = vmatpush3.bf16.msra.mxu1 %v5550_v15  ;;  %v4651_v1 = vld [vmem:[%s7256_s28 + $0x1] ss:$0 sm:$0xff] }
0x112a   :  { %2452 = vmatpush1.bf16.msra.mxu0 %v5523_v55  ;;  %5205 = vmatprep.subr.bf16.mxu1 %v5551_v17 }
0x112b   :  { %2210 = vadd.xlane.f32.xlu1 %v6558_v49  ;;  %2453 = vmatprep.subr.bf16.mxu0 %v5528_v13 }
0x112d   :  { %5206 = vmatpush3.bf16.msra.mxu1 %v5551_v17 }
0x112e   :  { %2454 = vmatpush1.bf16.msra.mxu0 %v5526_v60  ;;  %5229 = vmatprep.subr.bf16.mxu1 %v5841_v34 }
0x112f   :  { %2455 = vmatprep.subr.bf16.mxu0 %v5532_v62 }
0x1132   :  { %2456 = vmatpush1.bf16.msra.mxu0 %v5530_v0 }
0x1133   :  { %2457 = vmatprep.subr.bf16.mxu0 %v5536_v2 }
0x1136   :  { %2458 = vmatpush1.bf16.msra.mxu0 %v5534_v5 }
0x1137   :  { %2459 = vmatprep.subr.bf16.mxu0 %v5540_v27 }
0x113a   :  { %2460 = vmatpush1.bf16.msra.mxu0 %v5538_v10 }
0x113b   :  { %2461 = vmatprep.subr.bf16.mxu0 %v5544_v25 }
0x113e   :  { %2462 = vmatpush1.bf16.msra.mxu0 %v5542_v11 }
0x113f   :  { %2463 = vmatprep.subr.bf16.mxu0 %v5548_v12 }
0x1142   :  { %2464 = vmatpush1.bf16.msra.mxu0 %v5546_v7 }
0x1143   :  { %5211 = vmatprep.subr.bf16.mxu0 %v5841_v34 }
0x11ae   :  { %v2205_v52 = vpop.xlane.xlu0 %2204 }
0x11af   :  { %v2212_v58 = vmul.f32 0.0078125, %v2205_v52  ;;  %v4652_v52 = vld [vmem:[%s7257_s4 + $0x1] ss:$0 sm:$0xff] }
0x11b0   :  { %v2207_v30 = vpop.xlane.xlu1 %2206 }
0x11b1   :  { %v6574_v40 = vsub.f32 %v6546_v16, %v2212_v58  ;;  %v2213_v6 = vmul.f32 0.0078125, %v2207_v30 }
0x11b3   :  { %v6577_v8 = vsub.f32 %v6550_v24, %v2213_v6  ;;  %v2220_v9 = vmul.f32 %v6574_v40, %v6574_v40 }
0x11b5   :  { %2224 = vadd.xlane.f32.xlu0 %v2220_v9  ;;  %v2221_v43 = vmul.f32 %v6577_v8, %v6577_v8 }
0x11b6   :  { %v2209_v44 = vpop.xlane.xlu0 %2208 }
0x11b7   :  { %v2214_v45 = vmul.f32 0.0078125, %v2209_v44  ;;  %2226 = vadd.xlane.f32.xlu1 %v2221_v43 }
0x11b8   :  { %v2211_v46 = vpop.xlane.xlu1 %2210 }
0x11b9   :  { %v6584_v42 = vsub.f32 %v6554_v3, %v2214_v45  ;;  %v2215_v48 = vmul.f32 0.0078125, %v2211_v46 }
0x11bb   :  { %v6587_v50 = vsub.f32 %v6558_v49, %v2215_v48  ;;  %v2222_v59 = vmul.f32 %v6584_v42, %v6584_v42 }
0x11bd   :  { %2228 = vadd.xlane.f32.xlu0 %v2222_v59  ;;  %v2223_v20 = vmul.f32 %v6587_v50, %v6587_v50 }
0x11bf   :  { %2230 = vadd.xlane.f32.xlu1 %v2223_v20 }
0x1242   :  { %v2225_v18 = vpop.xlane.xlu0 %2224 }
0x1243   :  { %v2232_v21 = vmul.f32 0.0078125, %v2225_v18 }
0x1244   :  { %v2227_v22 = vpop.xlane.xlu1 %2226 }
0x1245   :  { %v2236_v47 = vadd.f32 1e-05, %v2232_v21  ;;  %v2233_v23 = vmul.f32 0.0078125, %v2227_v22 }
0x1247   :  { %5712 = vrsqrt.f32 %v2236_v47  ;;  %v2237_v61 = vadd.f32 1e-05, %v2233_v23 }
0x1249   :  { %5714 = vrsqrt.f32 %v2237_v61 }
0x124a   :  { %v2229_v4 = vpop.xlane.xlu0 %2228 }
0x124b   :  { %v2234_v26 = vmul.f32 0.0078125, %v2229_v4 }
0x124c   :  { %v2231_v28 = vpop.xlane.xlu1 %2230 }
0x124d   :  { %v2238_v29 = vadd.f32 1e-05, %v2234_v26  ;;  %v2235_v31 = vmul.f32 0.0078125, %v2231_v28 }
0x124f   :  { %5716 = vrsqrt.f32 %v2238_v29  ;;  %v2239_v32 = vadd.f32 1e-05, %v2235_v31 }
0x1251   :  { %v5713_v33 = vpop.eup %5712  ;;  %5718 = vrsqrt.f32 %v2239_v32 }
0x1252   :  { %v2244_v51 = vmul.f32 %v5713_v33, %v6574_v40 }
0x1253   :  { %v5715_v38 = vpop.eup %5714 }
0x1254   :  { %v2254_v54 = vmul.f32 %v4651_v1, %v2244_v51  ;;  %v2245_v55 = vmul.f32 %v5715_v38, %v6577_v8 }
0x1256   :  { %v2255_v58 = vmul.f32 %v4651_v1, %v2245_v55  ;;  %v2264_v30 = vadd.f32 %v4652_v52, %v2254_v54 }
0x1258   :  { %v2265_v6 = vadd.f32 %v4652_v52, %v2255_v58 }
0x1259   :  { %v5717_v9 = vpop.eup %5716 }
0x125a   :  { %v2268_v43 = vpack.c.bf16 %v2265_v6, %v2264_v30  ;;  %v2246_v44 = vmul.f32 %v5717_v9, %v6584_v42  ;;  %v4685_v42 = vld [vmem:[%s7220_s7 + $0x3] sm:$0x7]  ;;  %s7258_s7 = smov 32  }
0x125b   :  { %v5719_v45 = vpop.eup %5718  ;;  %v2313_v19 = vrot.slane %v4685_v42, %v6122_v39  ;;  %v2317_v10 = vrot.slane %v4685_v42, %v301_v41 }
0x125c   :  { %2482 = vmatmul.mubr.bf16.vlgmr.msra.gmra.mrb[44].mxu0 %v2268_v43  ;;  %5207 = vmatprep.mubr.bf16.mxu1 %v2268_v43  ;;  %v2247_v40 = vmul.f32 %v5719_v45, %v6587_v50  ;;  %v2256_v46 = vmul.f32 %v4651_v1, %v2246_v44  ;;  %v2309_v50 = vrot.slane %v4685_v42, %v6116_v37 }
0x125d   :  { %2491 = vmatprep.mubr.bf16.mxu0 %v5840_v56 }
0x125e   :  { %v2257_v8 = vmul.f32 %v4651_v1, %v2247_v40  ;;  %v2266_v48 = vadd.f32 %v4652_v52, %v2256_v46 }
0x1260   :  { %v2267_v59 = vadd.f32 %v4652_v52, %v2257_v8 }
0x1262   :  { %v2269_v20 = vpack.c.bf16 %v2267_v59, %v2266_v48 }
0x1264   :  { %2492 = vmatmul.mubr.bf16.gmra.mrb[48].mxu0 %v2269_v20  ;;  %5208 = vmatmul.mubr.bf16.vlgmr.msra.gmra.mrb[56].mxu1 %v2269_v20 }
0x1265   :  { %5213 = vmatprep.mubr.msk.bf16.mxu0 %vm5842_vm1, %v5841_v34  ;;  %5231 = vmatprep.mubr.msk.bf16.mxu1 %vm5842_vm1, %v5841_v34 }
0x132f   :  { %v2483_v13 = vpop.f32.mrb[44].mxu0 }
0x1330   :  { %v2485_v60 = vpop.f32.mrb[45].mxu0  ;;  %v2484_v63 = vadd.f32 %v2483_v13, %v2309_v50 }
0x1331   :  { %v2487_v62 = vpop.f32.mrb[46].mxu0  ;;  %v2486_v53 = vadd.f32 %v2485_v60, %v2313_v19 }
0x1332   :  { %v2488_v0 = vadd.f32 %v2487_v62, %v2309_v50  ;;  %v2489_v2 = vpop.f32.mrb[47].mxu0 }
0x1333   :  { %v2490_v5 = vadd.f32 %v2489_v2, %v2313_v19 }
0x1334   :  { %v6675_v27 = vpack.c.bf16 %v2488_v0, %v2484_v63 }
0x1335   :  { %v6677_v35 = vpack.c.bf16 %v2490_v5, %v2486_v53 }
0x1337   :  { %v2493_v25 = vpop.f32.mrb[48].mxu0  ;;  %v5209_v57 = vpop.f32.mrb[56].mxu1  ;;  %v2559_v11 = vsel %vm540_vm2, %v6677_v35, 0 }
0x1338   :  { %v2495_v7 = vpop.f32.mrb[49].mxu0  ;;  %v2536_v12 = vpop.f32.mrb[57].mxu1  ;;  %5212 = vmatpush3.bf16.xpose.msra.mxu0 %v2559_v11  ;;  %v2494_v17 = vadd.f32 %v2493_v25, %v2309_v50  ;;  %v2545_v18 = vadd.f32 %v5209_v57, %v2317_v10 }
0x1339   :  { %v2497_v14 = vpop.f32.mrb[50].mxu0  ;;  %v5210_v15 = vpop.f32.mrb[58].mxu1  ;;  %5217 = vmatprep.subr.bf16.mxu0 %v5841_v34  ;;  %v2496_v36 = vadd.f32 %v2495_v7, %v2313_v19  ;;  %v2537_v41 = vadd.f32 %v2536_v12, %v2317_v10 }
0x133a   :  { %v2498_v21 = vadd.f32 %v2497_v14, %v2309_v50  ;;  %v2548_v22 = vadd.f32 %v5210_v15, %v2317_v10  ;;  %v2499_v47 = vpop.f32.mrb[51].mxu0  ;;  %v2539_v23 = vpop.f32.mrb[59].mxu1 }
0x133b   :  { %v2500_v61 = vadd.f32 %v2499_v47, %v2313_v19  ;;  %v2540_v4 = vadd.f32 %v2539_v23, %v2317_v10 }
0x133c   :  { %v6684_v26 = vpack.c.bf16 %v2498_v21, %v2494_v17  ;;  %v6686_v28 = vpack.c.bf16 %v2548_v22, %v2545_v18 }
0x133d   :  { %v6688_v29 = vpack.c.bf16 %v2500_v61, %v2496_v36  ;;  %v6690_v31 = vpack.c.bf16 %v2540_v4, %v2537_v41 }
0x133e   :  { %5230 = vmatpush3.bf16.msra.mxu1 %v6686_v28 }
0x133f   :  { %5214 = vmatmul.mubr.msk.bf16.vlgmr.msra.gmra.mrb[52].mxu0 %vm540_vm2, %v6675_v27  ;;  %v2606_v32 = vsel %vm540_vm2, %v6688_v29, 0  ;;  %5241 = vmatprep.subr.bf16.mxu1 %v5841_v34 }
0x1340   :  { %5218 = vmatpush3.bf16.xpose.msra.mxu0 %v2606_v32  ;;  %5219 = vmatprep.mubr.msk.bf16.mxu0 %vm5842_vm1, %v5841_v34 }
0x1341   :  { %5223 = vmatprep.subr.bf16.mxu0 %v5841_v34 }
0x1347   :  { %5220 = vmatmul.mubr.msk.bf16.vlgmr.msra.gmra.mrb[56].mxu0 %vm540_vm2, %v6684_v26 }
0x1348   :  { %5224 = vmatpush3.bf16.msra.mxu0 %v6690_v31  ;;  %5225 = vmatprep.mubr.msk.bf16.mxu0 %vm5842_vm1, %v5841_v34 }
0x1349   :  { %5235 = vmatprep.subr.bf16.mxu0 %v5841_v34 }
0x1412   :  { %v2595_v33 = vpop.f32.mrb[52].mxu0 }
0x1413   :  { %v2649_v1 = vmul.f32 0.17677669, %v2595_v33  ;;  %v5215_v51 = vpop.f32.mrb[53].mxu0 }
0x1414   :  { %v2598_v38 = vpop.f32.mrb[54].mxu0 }
0x1415   :  { %v2650_v54 = vmul.f32 0.17677669, %v2598_v38  ;;  %v5216_v55 = vpop.f32.mrb[55].mxu0  ;;  %v2653_v52 = vsel %vm639_vm3, %v2649_v1, -inf }
0x1416   :  { %2654 = vmax.xlane.f32.xlu0 %v2653_v52 }
0x1417   :  { %v2656_v58 = vsel %vm639_vm3, %v2650_v54, -inf }
0x1418   :  { %2657 = vmax.xlane.f32.xlu1 %v2656_v58 }
0x141a   :  { %v2642_v30 = vpop.f32.mrb[56].mxu0 }
0x141b   :  { %v2651_v6 = vmul.f32 0.17677669, %v2642_v30  ;;  %v5221_v9 = vpop.f32.mrb[57].mxu0 }
0x141c   :  { %v2645_v43 = vpop.f32.mrb[58].mxu0 }
0x141d   :  { %v2652_v44 = vmul.f32 0.17677669, %v2645_v43  ;;  %v5222_v45 = vpop.f32.mrb[59].mxu0  ;;  %v2659_v40 = vsel %vm639_vm3, %v2651_v6, -inf }
0x141e   :  { %2660 = vmax.xlane.f32.xlu0 %v2659_v40 }
0x141f   :  { %v2662_v46 = vsel %vm639_vm3, %v2652_v44, -inf }
0x1420   :  { %2663 = vmax.xlane.f32.xlu1 %v2662_v46 }
0x14a3   :  { %v2655_v8 = vpop.xlane.xlu0 %2654 }
0x14a4   :  { %v2665_v48 = vsub.f32 %v2649_v1, %v2655_v8 }
0x14a5   :  { %v2658_v59 = vpop.xlane.xlu1 %2657 }
0x14a6   :  { %v2669_v20 = vmul.f32 1.442695, %v2665_v48  ;;  %v2666_v42 = vsub.f32 %v2650_v54, %v2658_v59 }
0x14a8   :  { %5720 = vpow2.f32 %v2669_v20  ;;  %v2671_v50 = vmul.f32 1.442695, %v2666_v42 }
0x14aa   :  { %5722 = vpow2.f32 %v2671_v50 }
0x14ab   :  { %v2661_v13 = vpop.xlane.xlu0 %2660 }
0x14ac   :  { %v2667_v19 = vsub.f32 %v2651_v6, %v2661_v13 }
0x14ad   :  { %v2664_v10 = vpop.xlane.xlu1 %2663 }
0x14ae   :  { %v2673_v60 = vmul.f32 1.442695, %v2667_v19  ;;  %v2668_v25 = vsub.f32 %v2652_v44, %v2664_v10 }
0x14b0   :  { %5724 = vpow2.f32 %v2673_v60  ;;  %v2675_v57 = vmul.f32 1.442695, %v2668_v25 }
0x14b2   :  { %v5721_v62 = vpop.eup %5720  ;;  %5726 = vpow2.f32 %v2675_v57 }
0x14b3   :  { %v2677_v63 = vsel %vm639_vm3, %v5721_v62, 0.0 }
0x14b4   :  { %v5723_v0 = vpop.eup %5722  ;;  %2678 = vadd.xlane.f32.xlu0 %v2677_v63 }
0x14b5   :  { %v2680_v2 = vsel %vm639_vm3, %v5723_v0, 0.0 }
0x14b6   :  { %2681 = vadd.xlane.f32.xlu1 %v2680_v2 }
0x14ba   :  { %v5725_v53 = vpop.eup %5724 }
0x14bb   :  { %v2683_v5 = vsel %vm639_vm3, %v5725_v53, 0.0 }
0x14bc   :  { %2684 = vadd.xlane.f32.xlu0 %v2683_v5  ;;  %v5727_v11 = vpop.eup %5726 }
0x14bd   :  { %v2686_v7 = vsel %vm639_vm3, %v5727_v11, 0.0 }
0x14c7   :  { %2846 = vrot.lane.b32.xlu1 %v6688_v29, %s5843_s1 }
0x14d2   :  { %2793 = vrot.lane.b32.xlu0 %v6677_v35, %s5843_s1 }
0x14eb   :  { %2687 = vadd.xlane.f32.xlu1 %v2686_v7 }
0x14fc   :  { %2790 = vrot.lane.b32.xlu1 %v6675_v27, %s5843_s1 }
0x1500   :  { %2843 = vrot.lane.b32.xlu1 %v6684_v26, %s5843_s1 }
0x1541   :  { %v2679_v12 = vpop.xlane.xlu0 %2678 }
0x1542   :  { %5728 = vrcp.f32 %v2679_v12 }
0x1543   :  { %v2682_v14 = vpop.xlane.xlu1 %2681 }
0x1544   :  { %5730 = vrcp.f32 %v2682_v14 }
0x1547   :  { %v2847_v41 = vpop.permute.xlu1 %2846 }
0x1548   :  { %v2852_v54 = vsel %vm540_vm2, %v2847_v41, 0 }
0x1549   :  { %v2685_v15 = vpop.xlane.xlu0 %2684 }
0x154a   :  { %5732 = vrcp.f32 %v2685_v15 }
0x154c   :  { %v5729_v17 = vpop.eup %5728 }
0x154d   :  { %v2693_v21 = vmul.f32 %v5729_v17, %v5721_v62  ;;  %v2794_v47 = vpop.permute.xlu0 %2793 }
0x154e   :  { %v5731_v18 = vpop.eup %5730  ;;  %v2799_v36 = vsel %vm540_vm2, %v2794_v47, 0 }
0x154f   :  { %v2694_v22 = vmul.f32 %v5731_v18, %v5723_v0 }
0x1551   :  { %v2697_v23 = vpack.c.bf16 %v2694_v22, %v2693_v21 }
0x1553   :  { %5226 = vmatmul.mubr.msk.bf16.vlgmr.msra.gmra.mrb[60].mxu0 %vm639_vm3, %v2697_v23 }
0x1554   :  { %5236 = vmatpush3.bf16.xpose.msra.mxu0 %v2799_v36  ;;  %5237 = vmatprep.mubr.msk.bf16.mxu0 %vm5842_vm1, %v5841_v34  ;;  %v5733_v32 = vpop.eup %5732 }
0x1555   :  { %5247 = vmatprep.subr.bf16.mxu0 %v5841_v34  ;;  %v2695_v1 = vmul.f32 %v5733_v32, %v5725_v53 }
0x1578   :  { %v2688_v61 = vpop.xlane.xlu1 %2687 }
0x1579   :  { %5734 = vrcp.f32 %v2688_v61 }
0x157c   :  { %v2791_v4 = vpop.permute.xlu1 %2790 }
0x157d   :  { %5238 = vmatmul.mubr.msk.bf16.vlgmr.msra.gmra.mrb[64].mxu0 %vm540_vm2, %v2791_v4 }
0x157e   :  { %5249 = vmatprep.mubr.msk.bf16.mxu0 %vm5842_vm1, %v5841_v34 }
0x1580   :  { %v2844_v55 = vpop.permute.xlu1 %2843 }
0x1583   :  { %v5735_v33 = vpop.eup %5734 }
0x1584   :  { %v2696_v51 = vmul.f32 %v5735_v33, %v5727_v11 }
0x1586   :  { %v2698_v38 = vpack.c.bf16 %v2696_v51, %v2695_v1 }
0x1588   :  { %5232 = vmatmul.mubr.msk.bf16.vlgmr.msra.gmra.mrb[60].mxu1 %vm639_vm3, %v2698_v38 }
0x1589   :  { %5242 = vmatpush3.bf16.xpose.msra.mxu1 %v2852_v54  ;;  %5243 = vmatprep.mubr.msk.bf16.mxu1 %vm5842_vm1, %v5841_v34 }
0x158a   :  { %5253 = vmatprep.subr.bf16.mxu1 %v5841_v34 }
0x1590   :  { %5244 = vmatmul.mubr.msk.bf16.vlgmr.msra.gmra.mrb[64].mxu1 %vm540_vm2, %v2844_v55 }
0x1591   :  { %5255 = vmatprep.mubr.msk.bf16.mxu1 %vm5842_vm1, %v5841_v34 }
0x1626   :  { %v6739_v52 = vpop.f32.mrb[60].mxu0 }
0x1627   :  { %v5227_v58 = vpop.f32.mrb[61].mxu0 }
0x1628   :  { %v6741_v30 = vpop.f32.mrb[62].mxu0 }
0x1629   :  { %v5228_v6 = vpop.f32.mrb[63].mxu0 }
0x1650   :  { %v2835_v9 = vpop.f32.mrb[64].mxu0 }
0x1651   :  { %v2895_v43 = vmul.f32 0.17677669, %v2835_v9  ;;  %v5239_v44 = vpop.f32.mrb[65].mxu0 }
0x1652   :  { %v2838_v45 = vpop.f32.mrb[66].mxu0 }
0x1653   :  { %v2896_v40 = vmul.f32 0.17677669, %v2838_v45  ;;  %v5240_v46 = vpop.f32.mrb[67].mxu0  ;;  %v2899_v8 = vsel %vm639_vm3, %v2895_v43, -inf }
0x1654   :  { %2900 = vmax.xlane.f32.xlu0 %v2899_v8 }
0x1655   :  { %v2902_v48 = vsel %vm639_vm3, %v2896_v40, -inf }
0x1656   :  { %2903 = vmax.xlane.f32.xlu1 %v2902_v48 }
0x165b   :  { %v6745_v59 = vpop.f32.mrb[60].mxu1 }
0x165c   :  { %v5233_v20 = vpop.f32.mrb[61].mxu1 }
0x165d   :  { %v6747_v42 = vpop.f32.mrb[62].mxu1 }
0x165e   :  { %v5234_v50 = vpop.f32.mrb[63].mxu1 }
0x1663   :  { %v2888_v13 = vpop.f32.mrb[64].mxu1 }
0x1664   :  { %v2897_v19 = vmul.f32 0.17677669, %v2888_v13  ;;  %v5245_v60 = vpop.f32.mrb[65].mxu1 }
0x1665   :  { %v2891_v62 = vpop.f32.mrb[66].mxu1 }
0x1666   :  { %v2898_v63 = vmul.f32 0.17677669, %v2891_v62  ;;  %v5246_v0 = vpop.f32.mrb[67].mxu1  ;;  %v2905_v2 = vsel %vm639_vm3, %v2897_v19, -inf }
0x1667   :  { %2906 = vmax.xlane.f32.xlu0 %v2905_v2 }
0x1668   :  { %v2908_v53 = vsel %vm639_vm3, %v2898_v63, -inf }
0x166b   :  { %2909 = vmax.xlane.f32.xlu0 %v2908_v53 }
0x16e1   :  { %v2901_v5 = vpop.xlane.xlu0 %2900 }
0x16e2   :  { %v2911_v10 = vsub.f32 %v2895_v43, %v2901_v5 }
0x16e3   :  { %v2904_v25 = vpop.xlane.xlu1 %2903 }
0x16e4   :  { %v2915_v57 = vmul.f32 1.442695, %v2911_v10  ;;  %v2912_v11 = vsub.f32 %v2896_v40, %v2904_v25 }
0x16e6   :  { %5736 = vpow2.f32 %v2915_v57  ;;  %v2917_v7 = vmul.f32 1.442695, %v2912_v11 }
0x16e8   :  { %5738 = vpow2.f32 %v2917_v7 }
0x16f0   :  { %v5737_v12 = vpop.eup %5736 }
0x16f1   :  { %v2923_v14 = vsel %vm639_vm3, %v5737_v12, 0.0 }
0x16f2   :  { %v5739_v15 = vpop.eup %5738  ;;  %2924 = vadd.xlane.f32.xlu0 %v2923_v14 }
0x16f3   :  { %v2926_v17 = vsel %vm639_vm3, %v5739_v15, 0.0 }
0x16f4   :  { %v2907_v18 = vpop.xlane.xlu0 %2906  ;;  %2927 = vadd.xlane.f32.xlu1 %v2926_v17 }
0x16f5   :  { %v2913_v21 = vsub.f32 %v2897_v19, %v2907_v18 }
0x16f7   :  { %v2919_v22 = vmul.f32 1.442695, %v2913_v21 }
0x16f8   :  { %v2910_v36 = vpop.xlane.xlu0 %2909 }
0x16f9   :  { %5740 = vpow2.f32 %v2919_v22  ;;  %v2914_v41 = vsub.f32 %v2898_v63, %v2910_v36 }
0x16fb   :  { %v2921_v61 = vmul.f32 1.442695, %v2914_v41 }
0x16fd   :  { %5742 = vpow2.f32 %v2921_v61 }
0x1703   :  { %v5741_v47 = vpop.eup %5740 }
0x1704   :  { %v2929_v23 = vsel %vm639_vm3, %v5741_v47, 0.0 }
0x1705   :  { %2930 = vadd.xlane.f32.xlu0 %v2929_v23  ;;  %2994 = vrot.lane.b32.xlu1 %v6686_v28, %s5843_s1 }
0x1707   :  { %v5743_v4 = vpop.eup %5742 }
0x1708   :  { %v2932_v32 = vsel %vm639_vm3, %v5743_v4, 0.0 }
0x1709   :  { %3043 = vrot.lane.b32.xlu1 %v6677_v35, %s5844_s5 }
0x171b   :  { %2946 = vrot.lane.b32.xlu0 %v6690_v31, %s5843_s1 }
0x171f   :  { %3041 = vrot.lane.b32.xlu0 %v6675_v27, %s5844_s5 }
0x172d   :  { %2933 = vadd.xlane.f32.xlu1 %v2932_v32 }
0x173e   :  { %3094 = vrot.lane.b32.xlu1 %v6688_v29, %s5844_s5 }
0x1742   :  { %3092 = vrot.lane.b32.xlu1 %v6684_v26, %s5844_s5 }
0x177f   :  { %v2925_v51 = vpop.xlane.xlu0 %2924 }
0x1781   :  { %v2928_v33 = vpop.xlane.xlu1 %2927 }
0x1782   :  { %5744 = vrcp.f32 %v2928_v33 }
0x1783   :  { %5746 = vrcp.f32 %v2925_v51 }
0x1785   :  { %v2995_v1 = vpop.permute.xlu1 %2994 }
0x1786   :  { %5254 = vmatpush3.bf16.msra.mxu1 %v2995_v1 }
0x1787   :  { %5265 = vmatprep.subr.bf16.mxu1 %v5841_v34 }
0x1789   :  { %v3044_v44 = vpop.permute.xlu1 %3043 }
0x178a   :  { %v3049_v45 = vsel %vm540_vm2, %v3044_v44, 0 }
0x178c   :  { %v5745_v38 = vpop.eup %5744 }
0x178d   :  { %v5747_v55 = vpop.eup %5746  ;;  %v2940_v58 = vmul.f32 %v5745_v38, %v5739_v15 }
0x178e   :  { %v2939_v6 = vmul.f32 %v5747_v55, %v5737_v12 }
0x1790   :  { %v2943_v43 = vpack.c.bf16 %v2940_v58, %v2939_v6 }
0x1792   :  { %v2931_v54 = vpop.xlane.xlu0 %2930 }
0x1793   :  { %5748 = vrcp.f32 %v2931_v54 }
0x1796   :  { %v2947_v9 = vpop.permute.xlu0 %2946 }
0x1797   :  { %5248 = vmatpush3.bf16.msra.mxu0 %v2947_v9 }
0x1798   :  { %5259 = vmatprep.subr.bf16.mxu0 %v5841_v34 }
0x179a   :  { %5250 = vmatmul.mubr.msk.bf16.vlgmr.msra.gmra.mrb[68].mxu0 %vm639_vm3, %v2943_v43  ;;  %v3042_v40 = vpop.permute.xlu0 %3041 }
0x179b   :  { %5261 = vmatprep.mubr.msk.bf16.mxu0 %vm5842_vm1, %v5841_v34 }
0x179d   :  { %v5749_v8 = vpop.eup %5748 }
0x179e   :  { %v2941_v20 = vmul.f32 %v5749_v8, %v5741_v47 }
0x17a0   :  { %5260 = vmatpush3.bf16.xpose.msra.mxu0 %v3049_v45 }
0x17a1   :  { %5271 = vmatprep.subr.bf16.mxu0 %v5841_v34 }
0x17a7   :  { %5262 = vmatmul.mubr.msk.bf16.vlgmr.msra.gmra.mrb[72].mxu0 %vm540_vm2, %v3042_v40 }
0x17a8   :  { %5273 = vmatprep.mubr.msk.bf16.mxu0 %vm5842_vm1, %v5841_v34 }
0x17ba   :  { %v2934_v46 = vpop.xlane.xlu1 %2933 }
0x17bb   :  { %5750 = vrcp.f32 %v2934_v46 }
0x17be   :  { %v3095_v13 = vpop.permute.xlu1 %3094 }
0x17bf   :  { %v3100_v60 = vsel %vm540_vm2, %v3095_v13, 0 }
0x17c2   :  { %v3093_v62 = vpop.permute.xlu1 %3092 }
0x17c5   :  { %v5751_v48 = vpop.eup %5750 }
0x17c6   :  { %v2942_v50 = vmul.f32 %v5751_v48, %v5743_v4 }
0x17c8   :  { %v2944_v19 = vpack.c.bf16 %v2942_v50, %v2941_v20 }
0x17ca   :  { %5256 = vmatmul.mubr.msk.bf16.vlgmr.msra.gmra.mrb[68].mxu1 %vm639_vm3, %v2944_v19 }
0x17cb   :  { %5266 = vmatpush3.bf16.xpose.msra.mxu1 %v3100_v60  ;;  %5267 = vmatprep.mubr.msk.bf16.mxu1 %vm5842_vm1, %v5841_v34 }
0x17cc   :  { %5277 = vmatprep.subr.bf16.mxu1 %v5841_v34 }
0x17d2   :  { %5268 = vmatmul.mubr.msk.bf16.vlgmr.msra.gmra.mrb[72].mxu1 %vm540_vm2, %v3093_v62 }
0x17d3   :  { %5279 = vmatprep.mubr.msk.bf16.mxu1 %vm5842_vm1, %v5841_v34 }
0x186d   :  { %v6785_v63 = vpop.f32.mrb[68].mxu0 }
0x186e   :  { %v5251_v0 = vpop.f32.mrb[69].mxu0 }
0x186f   :  { %v6787_v2 = vpop.f32.mrb[70].mxu0 }
0x1870   :  { %v5404_v53 = vpack.i.bf16 %v6787_v2, %v6785_v63  ;;  %v5252_v5 = vpop.f32.mrb[71].mxu0 }
0x187a   :  { %v3085_v10 = vpop.f32.mrb[72].mxu0 }
0x187b   :  { %v3143_v25 = vmul.f32 0.17677669, %v3085_v10  ;;  %v5263_v57 = vpop.f32.mrb[73].mxu0 }
0x187c   :  { %v3088_v11 = vpop.f32.mrb[74].mxu0 }
0x187d   :  { %v3144_v7 = vmul.f32 0.17677669, %v3088_v11  ;;  %v5264_v12 = vpop.f32.mrb[75].mxu0  ;;  %v3147_v14 = vsel %vm639_vm3, %v3143_v25, -inf }
0x187e   :  { %3148 = vmax.xlane.f32.xlu0 %v3147_v14 }
0x187f   :  { %v3150_v15 = vsel %vm639_vm3, %v3144_v7, -inf }
0x1880   :  { %3151 = vmax.xlane.f32.xlu1 %v3150_v15 }
0x189d   :  { %v6793_v17 = vpop.f32.mrb[68].mxu1 }
0x189e   :  { %v5257_v18 = vpop.f32.mrb[69].mxu1 }
0x189f   :  { %v6795_v21 = vpop.f32.mrb[70].mxu1 }
0x18a0   :  { %v5409_v22 = vpack.i.bf16 %v6795_v21, %v6793_v17  ;;  %v5258_v47 = vpop.f32.mrb[71].mxu1 }
0x18a5   :  { %v3136_v23 = vpop.f32.mrb[72].mxu1 }
0x18a6   :  { %v3145_v36 = vmul.f32 0.17677669, %v3136_v23  ;;  %v5269_v41 = vpop.f32.mrb[73].mxu1 }
0x18a7   :  { %v3139_v61 = vpop.f32.mrb[74].mxu1 }
0x18a8   :  { %v3146_v4 = vmul.f32 0.17677669, %v3139_v61  ;;  %v5270_v32 = vpop.f32.mrb[75].mxu1  ;;  %v3153_v33 = vsel %vm639_vm3, %v3145_v36, -inf }
0x18a9   :  { %3154 = vmax.xlane.f32.xlu0 %v3153_v33 }
0x18aa   :  { %v3156_v1 = vsel %vm639_vm3, %v3146_v4, -inf }
0x18ad   :  { %3157 = vmax.xlane.f32.xlu0 %v3156_v1 }
0x190b   :  { %v3149_v51 = vpop.xlane.xlu0 %3148 }
0x190c   :  { %v3159_v38 = vsub.f32 %v3143_v25, %v3149_v51 }
0x190d   :  { %v3152_v54 = vpop.xlane.xlu1 %3151 }
0x190e   :  { %v3163_v55 = vmul.f32 1.442695, %v3159_v38  ;;  %v3160_v58 = vsub.f32 %v3144_v7, %v3152_v54 }
0x1910   :  { %5752 = vpow2.f32 %v3163_v55  ;;  %v3165_v6 = vmul.f32 1.442695, %v3160_v58 }
0x1912   :  { %5754 = vpow2.f32 %v3165_v6 }
0x191a   :  { %v5753_v9 = vpop.eup %5752 }
0x191b   :  { %v3171_v43 = vsel %vm639_vm3, %v5753_v9, 0.0 }
0x191c   :  { %v5755_v44 = vpop.eup %5754  ;;  %3172 = vadd.xlane.f32.xlu0 %v3171_v43 }
0x191d   :  { %v3174_v45 = vsel %vm639_vm3, %v5755_v44, 0.0 }
0x191e   :  { %3175 = vadd.xlane.f32.xlu1 %v3174_v45 }
0x192f   :  { %3240 = vrot.lane.b32.xlu1 %v6686_v28, %s5844_s5 }
0x1933   :  { %3289 = vrot.lane.b32.xlu1 %v6677_v35, %s7258_s7 }
0x1936   :  { %v3155_v40 = vpop.xlane.xlu0 %3154 }
0x1937   :  { %v3161_v46 = vsub.f32 %v3145_v36, %v3155_v40 }
0x1939   :  { %v3167_v8 = vmul.f32 1.442695, %v3161_v46 }
0x193a   :  { %v3158_v48 = vpop.xlane.xlu0 %3157 }
0x193b   :  { %5756 = vpow2.f32 %v3167_v8  ;;  %v3162_v20 = vsub.f32 %v3146_v4, %v3158_v48 }
0x193d   :  { %v3169_v13 = vmul.f32 1.442695, %v3162_v20 }
0x193f   :  { %5758 = vpow2.f32 %v3169_v13 }
0x1945   :  { %v5757_v50 = vpop.eup %5756 }
0x1946   :  { %v3177_v19 = vsel %vm639_vm3, %v5757_v50, 0.0 }
0x1947   :  { %3178 = vadd.xlane.f32.xlu0 %v3177_v19 }
0x1949   :  { %v5759_v60 = vpop.eup %5758 }
0x194a   :  { %v3180_v62 = vsel %vm639_vm3, %v5759_v60, 0.0 }
0x1957   :  { %3181 = vadd.xlane.f32.xlu1 %v3180_v62 }
0x195d   :  { %3193 = vrot.lane.b32.xlu0 %v6690_v31, %s5844_s5 }
0x1961   :  { %3287 = vrot.lane.b32.xlu0 %v6675_v27, %s7258_s7 }
0x1968   :  { %3340 = vrot.lane.b32.xlu1 %v6688_v29, %s7258_s7 }
0x196c   :  { %3338 = vrot.lane.b32.xlu1 %v6684_v26, %s7258_s7 }
0x19a9   :  { %v3173_v5 = vpop.xlane.xlu0 %3172 }
0x19ab   :  { %v3176_v35 = vpop.xlane.xlu1 %3175 }
0x19ac   :  { %5760 = vrcp.f32 %v3176_v35 }
0x19ad   :  { %5762 = vrcp.f32 %v3173_v5 }
0x19af   :  { %v3241_v0 = vpop.permute.xlu1 %3240 }
0x19b0   :  { %5278 = vmatpush3.bf16.msra.mxu1 %v3241_v0 }
0x19b1   :  { %5289 = vmatprep.subr.bf16.mxu1 %v5841_v34 }
0x19b3   :  { %v3290_v26 = vpop.permute.xlu1 %3289 }
0x19b4   :  { %v3295_v29 = vsel %vm540_vm2, %v3290_v26, 0 }
0x19b6   :  { %v5761_v10 = vpop.eup %5760 }
0x19b7   :  { %v5763_v57 = vpop.eup %5762  ;;  %v3188_v11 = vmul.f32 %v5761_v10, %v5755_v44 }
0x19b8   :  { %v3187_v7 = vmul.f32 %v5763_v57, %v5753_v9 }
0x19ba   :  { %v3191_v12 = vpack.c.bf16 %v3188_v11, %v3187_v7 }
0x19d4   :  { %v3179_v25 = vpop.xlane.xlu0 %3178 }
0x19d5   :  { %5764 = vrcp.f32 %v3179_v25 }
0x19d8   :  { %v3194_v27 = vpop.permute.xlu0 %3193 }
0x19d9   :  { %5272 = vmatpush3.bf16.msra.mxu0 %v3194_v27 }
0x19da   :  { %5283 = vmatprep.subr.bf16.mxu0 %v5841_v34 }
0x19dc   :  { %5274 = vmatmul.mubr.msk.bf16.vlgmr.msra.gmra.mrb[76].mxu0 %vm639_vm3, %v3191_v12  ;;  %v3288_v15 = vpop.permute.xlu0 %3287 }
0x19dd   :  { %5285 = vmatprep.mubr.msk.bf16.mxu0 %vm5842_vm1, %v5841_v34 }
0x19df   :  { %v5765_v18 = vpop.eup %5764 }
0x19e0   :  { %v3189_v23 = vmul.f32 %v5765_v18, %v5757_v50 }
0x19e2   :  { %5284 = vmatpush3.bf16.xpose.msra.mxu0 %v3295_v29 }
0x19e3   :  { %5295 = vmatprep.subr.bf16.mxu0 %v5841_v34 }
0x19e4   :  { %v3182_v14 = vpop.xlane.xlu1 %3181 }
0x19e5   :  { %5766 = vrcp.f32 %v3182_v14 }
0x19e8   :  { %v3341_v41 = vpop.permute.xlu1 %3340 }
0x19e9   :  { %5286 = vmatmul.mubr.msk.bf16.vlgmr.msra.gmra.mrb[80].mxu0 %vm540_vm2, %v3288_v15  ;;  %v3346_v4 = vsel %vm540_vm2, %v3341_v41, 0 }
0x19ea   :  { %5297 = vmatprep.mubr.msk.bf16.mxu0 %vm5842_vm1, %v5841_v34 }
0x19ec   :  { %v3339_v32 = vpop.permute.xlu1 %3338 }
0x19ef   :  { %v5767_v47 = vpop.eup %5766 }
0x19f0   :  { %v3190_v36 = vmul.f32 %v5767_v47, %v5759_v60 }
0x19f2   :  { %v3192_v61 = vpack.c.bf16 %v3190_v36, %v3189_v23 }
0x19f4   :  { %5280 = vmatmul.mubr.msk.bf16.vlgmr.msra.gmra.mrb[76].mxu1 %vm639_vm3, %v3192_v61 }
0x19f5   :  { %5290 = vmatpush3.bf16.xpose.msra.mxu1 %v3346_v4  ;;  %5291 = vmatprep.mubr.msk.bf16.mxu1 %vm5842_vm1, %v5841_v34 }
0x19f6   :  { %5301 = vmatprep.subr.bf16.mxu1 %v5841_v34 }
0x19fc   :  { %5292 = vmatmul.mubr.msk.bf16.vlgmr.msra.gmra.mrb[80].mxu1 %vm540_vm2, %v3339_v32 }
0x19fd   :  { %5303 = vmatprep.mubr.msk.bf16.mxu1 %vm5842_vm1, %v5841_v34 }
0x1aaf   :  { %v3233_v33 = vpop.f32.mrb[76].mxu0 }
0x1ab0   :  { %v5275_v1 = vpop.f32.mrb[77].mxu0 }
0x1ab1   :  { %v3236_v51 = vpop.f32.mrb[78].mxu0 }
0x1ab2   :  { %v5414_v38 = vpack.i.bf16 %v3236_v51, %v3233_v33  ;;  %v5276_v54 = vpop.f32.mrb[79].mxu0 }
0x1abc   :  { %v3331_v55 = vpop.f32.mrb[80].mxu0 }
0x1abd   :  { %v3389_v58 = vmul.f32 0.17677669, %v3331_v55  ;;  %v5287_v6 = vpop.f32.mrb[81].mxu0 }
0x1abe   :  { %v3334_v9 = vpop.f32.mrb[82].mxu0 }
0x1abf   :  { %v3390_v43 = vmul.f32 0.17677669, %v3334_v9  ;;  %v5288_v44 = vpop.f32.mrb[83].mxu0  ;;  %v3393_v45 = vsel %vm639_vm3, %v3389_v58, -inf }
0x1ac0   :  { %3394 = vmax.xlane.f32.xlu0 %v3393_v45  ;;  %v5552_v44 = vld [vmem:[%s7221_s8 + $0x40] sm:$0xff]   ;;  %v5553_v45 = vld [vmem:[%s7221_s8 + $0x48] sm:$0xff]  }
0x1ac1   :  { %v3396_v40 = vsel %vm639_vm3, %v3390_v43, -inf }
0x1ac2   :  { %3397 = vmax.xlane.f32.xlu1 %v3396_v40  ;;  %v5554_v40 = vld [vmem:[%s7221_s8 + $0x50] sm:$0xff]  }
0x1ac7   :  { %v3280_v46 = vpop.f32.mrb[76].mxu1 }
0x1ac8   :  { %v5281_v8 = vpop.f32.mrb[77].mxu1 }
0x1ac9   :  { %v3283_v48 = vpop.f32.mrb[78].mxu1  ;;  %v5556_v8 = vld [vmem:[%s7221_s8 + $0x60] sm:$0xff]  }
0x1aca   :  { %v5419_v20 = vpack.i.bf16 %v3283_v48, %v3280_v46  ;;  %v5282_v50 = vpop.f32.mrb[79].mxu1  ;;  %v5555_v46 = vld [vmem:[%s7221_s8 + $0x58] sm:$0xff]   ;;  %v5557_v48 = vld [vmem:[%s7221_s8 + $0x68] sm:$0xff]  }
0x1acf   :  { %v3382_v13 = vpop.f32.mrb[80].mxu1 }
0x1ad0   :  { %v3391_v19 = vmul.f32 0.17677669, %v3382_v13  ;;  %v5293_v60 = vpop.f32.mrb[81].mxu1 }
0x1ad1   :  { %v3385_v62 = vpop.f32.mrb[82].mxu1 }
0x1ad2   :  { %v3392_v35 = vmul.f32 0.17677669, %v3385_v62  ;;  %v5294_v0 = vpop.f32.mrb[83].mxu1  ;;  %v3399_v5 = vsel %vm639_vm3, %v3391_v19, -inf }
0x1ad3   :  { %3400 = vmax.xlane.f32.xlu0 %v3399_v5 }
0x1ad4   :  { %v3402_v10 = vsel %vm639_vm3, %v3392_v35, -inf }
0x1ad7   :  { %3403 = vmax.xlane.f32.xlu0 %v3402_v10 }
0x1b4d   :  { %v3395_v25 = vpop.xlane.xlu0 %3394 }
0x1b4e   :  { %v3405_v57 = vsub.f32 %v3389_v58, %v3395_v25 }
0x1b4f   :  { %v3398_v11 = vpop.xlane.xlu1 %3397 }
0x1b50   :  { %v3409_v7 = vmul.f32 1.442695, %v3405_v57  ;;  %v3406_v27 = vsub.f32 %v3390_v43, %v3398_v11 }
0x1b52   :  { %5768 = vpow2.f32 %v3409_v7  ;;  %v3411_v12 = vmul.f32 1.442695, %v3406_v27 }
0x1b54   :  { %5770 = vpow2.f32 %v3411_v12 }
0x1b5c   :  { %v5769_v26 = vpop.eup %5768 }
0x1b5d   :  { %v3417_v29 = vsel %vm639_vm3, %v5769_v26, 0.0 }
0x1b5e   :  { %v5771_v14 = vpop.eup %5770  ;;  %3418 = vadd.xlane.f32.xlu0 %v3417_v29 }
0x1b5f   :  { %v3420_v15 = vsel %vm639_vm3, %v5771_v14, 0.0 }
0x1b60   :  { %v3401_v18 = vpop.xlane.xlu0 %3400  ;;  %3421 = vadd.xlane.f32.xlu1 %v3420_v15 }
0x1b61   :  { %v3407_v47 = vsub.f32 %v3391_v19, %v3401_v18 }
0x1b63   :  { %v3413_v23 = vmul.f32 1.442695, %v3407_v47 }
0x1b64   :  { %v3404_v36 = vpop.xlane.xlu0 %3403 }
0x1b65   :  { %5772 = vpow2.f32 %v3413_v23  ;;  %v3408_v41 = vsub.f32 %v3392_v35, %v3404_v36  ;;  %v5559_v35 = vld [vmem:[%s7221_s8 + $0x78] sm:$0xff]  }
0x1b67   :  { %v3415_v61 = vmul.f32 1.442695, %v3408_v41 }
0x1b69   :  { %5774 = vpow2.f32 %v3415_v61 }
0x1b6f   :  { %v5773_v4 = vpop.eup %5772 }
0x1b70   :  { %v3423_v32 = vsel %vm639_vm3, %v5773_v4, 0.0 }
0x1b71   :  { %3424 = vadd.xlane.f32.xlu0 %v3423_v32 }
0x1b73   :  { %v5775_v33 = vpop.eup %5774 }
0x1b74   :  { %v3426_v1 = vsel %vm639_vm3, %v5775_v33, 0.0 }
0x1b75   :  { %3427 = vadd.xlane.f32.xlu1 %v3426_v1 }
0x1b86   :  { %3486 = vrot.lane.b32.xlu1 %v6686_v28, %s7258_s7 }
0x1b87   :  { %3439 = vrot.lane.b32.xlu0 %v6690_v31, %s7258_s7 }
0x1b8a   :  { %5405 = vrot.lane.b32.xlu1 %v5404_v53, %s7258_s7 }
0x1b8b   :  { %5415 = vrot.lane.b32.xlu0 %v5414_v38, %s5844_s5 }
0x1b8e   :  { %5410 = vrot.lane.b32.xlu1 %v5409_v22, %s7258_s7 }
0x1b92   :  { %5420 = vrot.lane.b32.xlu1 %v5419_v20, %s5844_s5  ;;  %v5558_v20 = vld [vmem:[%s7221_s8 + $0x70] sm:$0xff]  }
0x1beb   :  { %v3419_v54 = vpop.xlane.xlu0 %3418 }
0x1bed   :  { %v3422_v51 = vpop.xlane.xlu1 %3421 }
0x1bee   :  { %5776 = vrcp.f32 %v3422_v51 }
0x1bef   :  { %5778 = vrcp.f32 %v3419_v54 }
0x1bf8   :  { %v5777_v28 = vpop.eup %5776 }
0x1bf9   :  { %v5779_v55 = vpop.eup %5778  ;;  %v3434_v58 = vmul.f32 %v5777_v28, %v5771_v14 }
0x1bfa   :  { %v3433_v63 = vmul.f32 %v5779_v55, %v5769_v26 }
0x1bfc   :  { %v3437_v38 = vpack.c.bf16 %v3434_v58, %v3433_v63 }
0x1bfe   :  { %v3425_v31 = vpop.xlane.xlu0 %3424 }
0x1bff   :  { %5780 = vrcp.f32 %v3425_v31 }
0x1c02   :  { %v3440_v2 = vpop.permute.xlu0 %3439  ;;  %v3428_v53 = vpop.xlane.xlu1 %3427 }
0x1c03   :  { %5782 = vrcp.f32 %v3428_v53  ;;  %5296 = vmatpush3.bf16.msra.mxu0 %v3440_v2 }
0x1c04   :  { %5307 = vmatprep.subr.bf16.mxu0 %v5552_v44 }
0x1c06   :  { %5298 = vmatmul.mubr.msk.bf16.vlgmr.msra.gmra.mrb[84].mxu0 %vm639_vm3, %v3437_v38  ;;  %v3487_v17 = vpop.permute.xlu1 %3486  ;;  %v5416_v12 = vpop.permute.xlu0 %5415 }
0x1c07   :  { %5302 = vmatpush3.bf16.msra.mxu1 %v3487_v17  ;;  %5308 = vmatpush3.bf16.msra.mxu0 %v5552_v44  ;;  %v5418_v14 = vunpack.i.h.bf16 %v5416_v12  ;;  %v5417_v15 = vunpack.i.l.bf16 %v5416_v12 }
0x1c08   :  { %5309 = vmatprep.subr.bf16.mxu0 %v5553_v45 }
0x1c09   :  { %v5781_v21 = vpop.eup %5780 }
0x1c0a   :  { %v3435_v6 = vmul.f32 %v5781_v21, %v5773_v4  ;;  %v5406_v11 = vpop.permute.xlu1 %5405 }
0x1c0b   :  { %5310 = vmatpush3.bf16.msra.mxu0 %v5553_v45  ;;  %v5408_v7 = vunpack.i.h.bf16 %v5406_v11  ;;  %v5407_v27 = vunpack.i.l.bf16 %v5406_v11 }
0x1c0c   :  { %5311 = vmatprep.subr.bf16.mxu0 %v5554_v40 }
0x1c0d   :  { %v5783_v22 = vpop.eup %5782  ;;  %v3582_v26 = vsel %vm540_vm2, %v6741_v30, %v5408_v7  ;;  %v3581_v29 = vsel %vm540_vm2, %v6739_v52, %v5407_v27 }
0x1c0e   :  { %v3436_v9 = vmul.f32 %v5783_v22, %v5775_v33  ;;  %v5411_v47 = vpop.permute.xlu1 %5410  ;;  %v3585_v41 = vsel %vm126_vm0, %v3581_v29, %v5417_v15  ;;  %v3586_v61 = vsel %vm126_vm0, %v3582_v26, %v5418_v14  ;;  %v4743_v22 = vld [vmem:[%s7222_s9 + $0x1] ss:$0 sm:$0xff]  ;;  %v5568_v29 = vld [vmem:[%s7225_s12 + $0xa4] ss:$8 sps:$4 sm:$0xff]   ;;  %v5571_v15 = vld [vmem:[%s7225_s12 + $0xb4] ss:$8 sps:$4 sm:$0xff]  }
0x1c0f   :  { %5312 = vmatpush3.bf16.msra.mxu0 %v5554_v40  ;;  %v5413_v1 = vunpack.i.h.bf16 %v5411_v47  ;;  %v5412_v51 = vunpack.i.l.bf16 %v5411_v47  ;;  %v5566_v14 = vld [vmem:[%s7225_s12 + $0xa0] ss:$8 sps:$4 sm:$0xff]   ;;  %v5574_v47 = vld [vmem:[%s7225_s12 + $0xc4] ss:$8 sps:$4 sm:$0xff]  }
0x1c10   :  { %v3438_v43 = vpack.c.bf16 %v3436_v9, %v3435_v6  ;;  %5313 = vmatprep.subr.bf16.mxu0 %v5555_v46 }
0x1c11   :  { %v3584_v31 = vsel %vm540_vm2, %v6747_v42, %v5413_v1  ;;  %v3583_v55 = vsel %vm540_vm2, %v6745_v59, %v5412_v51 }
0x1c12   :  { %5304 = vmatmul.mubr.msk.bf16.vlgmr.msra.gmra.mrb[84].mxu1 %vm639_vm3, %v3438_v43  ;;  %v5421_v30 = vpop.permute.xlu1 %5420 }
0x1c13   :  { %3933 = vmatprep.mubr.bf16.mxu1 %v5840_v56  ;;  %5314 = vmatpush3.bf16.msra.mxu0 %v5555_v46  ;;  %v5423_v52 = vunpack.i.h.bf16 %v5421_v30  ;;  %v5422_v54 = vunpack.i.l.bf16 %v5421_v30 }
0x1c14   :  { %5315 = vmatprep.subr.bf16.mxu0 %v5556_v8 }
0x1c15   :  { %v3587_v2 = vsel %vm126_vm0, %v3583_v55, %v5422_v54  ;;  %v3588_v53 = vsel %vm126_vm0, %v3584_v31, %v5423_v52 }
0x1c17   :  { %5316 = vmatpush3.bf16.msra.mxu0 %v5556_v8 }
0x1c18   :  { %5317 = vmatprep.subr.bf16.mxu0 %v5557_v48 }
0x1c1b   :  { %5318 = vmatpush3.bf16.msra.mxu0 %v5557_v48 }
0x1c1c   :  { %5319 = vmatprep.subr.bf16.mxu0 %v5558_v20 }
0x1c1f   :  { %5320 = vmatpush3.bf16.msra.mxu0 %v5558_v20 }
0x1c20   :  { %5321 = vmatprep.subr.bf16.mxu0 %v5559_v35 }
0x1c23   :  { %5322 = vmatpush3.bf16.msra.mxu0 %v5559_v35 }
0x1cd9   :  { %v3479_v50 = vpop.f32.mrb[84].mxu0 }
0x1cda   :  { %v5299_v13 = vpop.f32.mrb[85].mxu0 }
0x1cdb   :  { %v3482_v19 = vpop.f32.mrb[86].mxu0 }
0x1cdc   :  { %v5424_v60 = vpack.i.bf16 %v3482_v19, %v3479_v50  ;;  %v5300_v62 = vpop.f32.mrb[87].mxu0 }
0x1cde   :  { %5425 = vrot.lane.b32.xlu0 %v5424_v60, %s5843_s1 }
0x1ce5   :  { %v3526_v0 = vpop.f32.mrb[84].mxu1 }
0x1ce6   :  { %v5305_v5 = vpop.f32.mrb[85].mxu1 }
0x1ce7   :  { %v3529_v10 = vpop.f32.mrb[86].mxu1 }
0x1ce8   :  { %v5429_v25 = vpack.i.bf16 %v3529_v10, %v3526_v0  ;;  %v5306_v57 = vpop.f32.mrb[87].mxu1 }
0x1cea   :  { %5430 = vrot.lane.b32.xlu1 %v5429_v25, %s5843_s1 }
0x1d50   :  { %v5426_v18 = vpop.permute.xlu0 %5425 }
0x1d51   :  { %v5428_v23 = vunpack.i.h.bf16 %v5426_v18  ;;  %v5427_v36 = vunpack.i.l.bf16 %v5426_v18  ;;  %v5569_v18 = vld [vmem:[%s7225_s12 + $0xb0] ss:$8 sps:$4 sm:$0xff]  }
0x1d53   :  { %v3589_v4 = vsel %vm1576_vm4, %v3585_v41, %v5427_v36  ;;  %v3590_v32 = vsel %vm1576_vm4, %v3586_v61, %v5428_v23  ;;  %v5572_v23 = vld [vmem:[%s7225_s12 + $0xc0] ss:$8 sps:$4 sm:$0xff]   ;;  %v5577_v36 = vld [vmem:[%s7225_s12 + $0xd4] ss:$8 sps:$4 sm:$0xff]   ;;  %v5575_v41 = vld [vmem:[%s7225_s12 + $0xd0] ss:$8 sps:$4 sm:$0xff]  }
0x1d54   :  { %v3593_v33 = vpack.c.bf16 %v3590_v32, %v3589_v4  ;;  %v5580_v61 = vld [vmem:[%s7225_s12 + $0xe4] ss:$8 sps:$4 sm:$0xff]   ;;  %v5578_v4 = vld [vmem:[%s7225_s12 + $0xe0] ss:$8 sps:$4 sm:$0xff]   ;;  %v5583_v32 = vld [vmem:[%s7225_s12 + $0xf4] ss:$8 sps:$4 sm:$0xff]  }
0x1d56   :  { %5323 = vmatprep.mubr.bf16.mxu0 %v3593_v33  ;;  %v5581_v33 = vld [vmem:[%s7225_s12 + $0xf0] ss:$8 sps:$4 sm:$0xff]  }
0x1d5c   :  { %v5431_v28 = vpop.permute.xlu1 %5430 }
0x1d5d   :  { %v5433_v58 = vunpack.i.h.bf16 %v5431_v28  ;;  %v5432_v63 = vunpack.i.l.bf16 %v5431_v28 }
0x1d5f   :  { %v3591_v38 = vsel %vm1576_vm4, %v3587_v2, %v5432_v63  ;;  %v3592_v17 = vsel %vm1576_vm4, %v3588_v53, %v5433_v58 }
0x1d60   :  { %v3594_v21 = vpack.c.bf16 %v3592_v17, %v3591_v38  ;;  %v4754_v17 = vld [vmem:[%s7223_s10 + $0x1] ss:$0 sm:$0xff] }
0x1d62   :  { %5324 = vmatmul.mubr.bf16.vlgmr.msra.gmra.mrb[88].mxu0 %v3594_v21 }
0x1e35   :  { %v5325_v42 = vpop.f32.mrb[88].mxu0 }
0x1e36   :  { %v3702_v6 = vpop.f32.mrb[89].mxu0  ;;  %v3711_v44 = vadd.f32 %v5325_v42, %v4743_v22 }
0x1e37   :  { %v3703_v9 = vadd.f32 %v4743_v22, %v3702_v6  ;;  %v5326_v59 = vpop.f32.mrb[90].mxu0 }
0x1e38   :  { %v3705_v43 = vpop.f32.mrb[91].mxu0  ;;  %v6913_v8 = vadd.f32 %v3711_v44, %v6554_v3  ;;  %v3714_v48 = vadd.f32 %v5326_v59, %v4743_v22  ;;  %v5565_v3 = vld [vmem:[%s7225_s12 + $0x94] ss:$8 sps:$4 sm:$0xff]   ;;  %v4755_v59 = vld [vmem:[%s7224_s11 + $0x1] ss:$0 sm:$0xff] }
0x1e39   :  { %v6906_v45 = vadd.f32 %v3703_v9, %v6546_v16  ;;  %v3706_v40 = vadd.f32 %v4743_v22, %v3705_v43  ;;  %v5560_v16 = vld [vmem:[%s7225_s12 + $0x80] ss:$8 sps:$4 sm:$0xff]  }
0x1e3a   :  { %v6918_v20 = vadd.f32 %v3714_v48, %v6558_v49  ;;  %v5563_v49 = vld [vmem:[%s7225_s12 + $0x90] ss:$8 sps:$4 sm:$0xff]  }
0x1e3b   :  { %v6909_v46 = vadd.f32 %v3706_v40, %v6550_v24  ;;  %3725 = vadd.xlane.f32.xlu0 %v6906_v45  ;;  %v5562_v24 = vld [vmem:[%s7225_s12 + $0x84] ss:$8 sps:$4 sm:$0xff]  }
0x1e3c   :  { %3901 = vmatprep.subr.bf16.mxu1 %v5562_v24 }
0x1e3d   :  { %3727 = vadd.xlane.f32.xlu1 %v6909_v46  ;;  %3902 = vmatpush1.bf16.msra.mxu1 %v5560_v16 }
0x1e3e   :  { %3903 = vmatprep.subr.bf16.mxu1 %v5565_v3 }
0x1e3f   :  { %3729 = vadd.xlane.f32.xlu0 %v6913_v8 }
0x1e41   :  { %3904 = vmatpush1.bf16.msra.mxu1 %v5563_v49 }
0x1e42   :  { %3905 = vmatprep.subr.bf16.mxu1 %v5568_v29  ;;  %v5597_v29 = vld [vmem:[%s7227_s14 + $0xb0] sm:$0xff]  }
0x1e43   :  { %3731 = vadd.xlane.f32.xlu0 %v6918_v20 }
0x1e45   :  { %3906 = vmatpush1.bf16.msra.mxu1 %v5566_v14  ;;  %v5598_v14 = vld [vmem:[%s7227_s14 + $0xf8] sm:$0xff]  }
0x1e46   :  { %3907 = vmatprep.subr.bf16.mxu1 %v5571_v15  ;;  %v5599_v15 = vld [vmem:[%s7227_s14 + $0xb8] sm:$0xff]  }
0x1e49   :  { %3908 = vmatpush1.bf16.msra.mxu1 %v5569_v18  ;;  %v4772_v18 = vld [vmem:[%s7226_s13 + $0x2] sm:$0x3] }
0x1e4a   :  { %3909 = vmatprep.subr.bf16.mxu1 %v5574_v47  ;;  %v3814_v47 = vrot.slane %v4772_v18, %v6116_v37 }
0x1e4d   :  { %3910 = vmatpush1.bf16.msra.mxu1 %v5572_v23  ;;  %v3818_v23 = vrot.slane %v4772_v18, %v6122_v39 }
0x1e4e   :  { %3911 = vmatprep.subr.bf16.mxu1 %v5577_v36 }
0x1e51   :  { %3912 = vmatpush1.bf16.msra.mxu1 %v5575_v41 }
0x1e52   :  { %3913 = vmatprep.subr.bf16.mxu1 %v5580_v61 }
0x1e55   :  { %3914 = vmatpush1.bf16.msra.mxu1 %v5578_v4 }
0x1e56   :  { %3915 = vmatprep.subr.bf16.mxu1 %v5583_v32 }
0x1e59   :  { %3916 = vmatpush1.bf16.msra.mxu1 %v5581_v33 }
0x1e5a   :  { %5327 = vmatprep.subr.bf16.mxu1 %v5841_v34 }
0x1ec8   :  { %v3726_v50 = vpop.xlane.xlu0 %3725 }
0x1ec9   :  { %v3733_v13 = vmul.f32 0.0078125, %v3726_v50 }
0x1eca   :  { %v3728_v19 = vpop.xlane.xlu1 %3727 }
0x1ecb   :  { %v3737_v60 = vsub.f32 %v6906_v45, %v3733_v13  ;;  %v3734_v62 = vmul.f32 0.0078125, %v3728_v19 }
0x1ecc   :  { %v3730_v35 = vpop.xlane.xlu0 %3729 }
0x1ecd   :  { %v3738_v0 = vsub.f32 %v6909_v46, %v3734_v62  ;;  %v3735_v5 = vmul.f32 0.0078125, %v3730_v35  ;;  %v3741_v10 = vmul.f32 %v3737_v60, %v3737_v60  ;;  %v5584_v62 = vld [vmem:[%s7227_s14 + $0xc0] sm:$0xff]  }
0x1ece   :  { %v5585_v35 = vld [vmem:[%s7227_s14 + $0x80] sm:$0xff]   ;;  %4997 = vmatprep.subr.bf16.mxu0 %v5584_v62 }
0x1ecf   :  { %v6936_v25 = vsub.f32 %v6913_v8, %v3735_v5  ;;  %3745 = vadd.xlane.f32.xlu0 %v3741_v10  ;;  %v3742_v57 = vmul.f32 %v3738_v0, %v3738_v0  ;;  %4998 = vmatpush3.bf16.msra.mxu0 %v5585_v35  ;;  %v5588_v5 = vld [vmem:[%s7227_s14 + $0xd0] sm:$0xff]  }
0x1ed0   :  { %v3732_v11 = vpop.xlane.xlu0 %3731  ;;  %v5589_v10 = vld [vmem:[%s7227_s14 + $0x90] sm:$0xff]  }
0x1ed1   :  { %v3736_v7 = vmul.f32 0.0078125, %v3732_v11  ;;  %3747 = vadd.xlane.f32.xlu1 %v3742_v57  ;;  %v3743_v27 = vmul.f32 %v6936_v25, %v6936_v25  ;;  %v5591_v57 = vld [vmem:[%s7227_s14 + $0x98] sm:$0xff]   ;;  %v5592_v11 = vld [vmem:[%s7227_s14 + $0xe0] sm:$0xff]  }
0x1ed3   :  { %v3740_v12 = vsub.f32 %v6918_v20, %v3736_v7  ;;  %3749 = vadd.xlane.f32.xlu0 %v3743_v27  ;;  %v5593_v7 = vld [vmem:[%s7227_s14 + $0xa0] sm:$0xff]   ;;  %v5594_v27 = vld [vmem:[%s7227_s14 + $0xe8] sm:$0xff]  }
0x1ed5   :  { %v3744_v26 = vmul.f32 %v3740_v12, %v3740_v12 }
0x1ed7   :  { %3751 = vadd.xlane.f32.xlu1 %v3744_v26  ;;  %v5596_v26 = vld [vmem:[%s7227_s14 + $0xf0] sm:$0xff]  }
0x1f5c   :  { %v3746_v30 = vpop.xlane.xlu0 %3745 }
0x1f5d   :  { %v3753_v1 = vmul.f32 0.0078125, %v3746_v30 }
0x1f5e   :  { %v3748_v51 = vpop.xlane.xlu1 %3747 }
0x1f5f   :  { %v3757_v52 = vadd.f32 1e-05, %v3753_v1  ;;  %v3754_v54 = vmul.f32 0.0078125, %v3748_v51 }
0x1f60   :  { %v3750_v28 = vpop.xlane.xlu0 %3749 }
0x1f61   :  { %5784 = vrsqrt.f32 %v3757_v52  ;;  %v3758_v31 = vadd.f32 1e-05, %v3754_v54  ;;  %v3755_v55 = vmul.f32 0.0078125, %v3750_v28 }
0x1f63   :  { %5786 = vrsqrt.f32 %v3758_v31  ;;  %v3759_v58 = vadd.f32 1e-05, %v3755_v55 }
0x1f64   :  { %v3752_v63 = vpop.xlane.xlu1 %3751 }
0x1f65   :  { %5788 = vrsqrt.f32 %v3759_v58  ;;  %v3756_v2 = vmul.f32 0.0078125, %v3752_v63 }
0x1f67   :  { %v3760_v53 = vadd.f32 1e-05, %v3756_v2 }
0x1f69   :  { %5790 = vrsqrt.f32 %v3760_v53 }
0x1f6b   :  { %v5785_v38 = vpop.eup %5784 }
0x1f6c   :  { %v3765_v21 = vmul.f32 %v5785_v38, %v3737_v60 }
0x1f6d   :  { %v5787_v22 = vpop.eup %5786 }
0x1f6e   :  { %v3766_v42 = vmul.f32 %v5787_v22, %v3738_v0  ;;  %v3775_v6 = vmul.f32 %v4754_v17, %v3765_v21  ;;  %v5587_v0 = vld [vmem:[%s7227_s14 + $0x88] sm:$0xff]  }
0x1f6f   :  { %v5789_v9 = vpop.eup %5788 }
0x1f70   :  { %v3776_v43 = vmul.f32 %v4754_v17, %v3766_v42  ;;  %v3785_v44 = vadd.f32 %v4755_v59, %v3775_v6  ;;  %v3767_v48 = vmul.f32 %v5789_v9, %v6936_v25  ;;  %v5590_v25 = vld [vmem:[%s7227_s14 + $0xd8] sm:$0xff]  }
0x1f72   :  { %v3786_v40 = vadd.f32 %v4755_v59, %v3776_v43  ;;  %v3777_v49 = vmul.f32 %v4754_v17, %v3767_v48 }
0x1f73   :  { %v5791_v16 = vpop.eup %5790 }
0x1f74   :  { %v3789_v24 = vpack.c.bf16 %v3786_v40, %v3785_v44  ;;  %v3768_v3 = vmul.f32 %v5791_v16, %v3740_v12  ;;  %v3787_v19 = vadd.f32 %v4755_v59, %v3777_v49  ;;  %v5595_v12 = vld [vmem:[%s7227_s14 + $0xa8] sm:$0xff]  }
0x1f76   :  { %3934 = vmatmul.mubr.bf16.vlgmr.msra.gmra.mrb[88].mxu1 %v3789_v24  ;;  %v3778_v50 = vmul.f32 %v4754_v17, %v3768_v3 }
0x1f77   :  { %3943 = vmatprep.mubr.bf16.mxu1 %v5840_v56  ;;  %v5586_v56 = vld [vmem:[%s7227_s14 + $0xc8] sm:$0xff]  }
0x1f78   :  { %v3788_v13 = vadd.f32 %v4755_v59, %v3778_v50  ;;  %4999 = vmatprep.subr.bf16.mxu0 %v5586_v56 }
0x1f79   :  { %5000 = vmatpush3.bf16.msra.mxu0 %v5587_v0 }
0x1f7a   :  { %v3790_v60 = vpack.c.bf16 %v3788_v13, %v3787_v19  ;;  %5001 = vmatprep.subr.bf16.mxu0 %v5588_v5 }
0x1f7d   :  { %5002 = vmatpush3.bf16.msra.mxu0 %v5589_v10 }
0x1f7e   :  { %3944 = vmatmul.mubr.bf16.gmra.mrb[92].mxu1 %v3790_v60  ;;  %5003 = vmatprep.subr.bf16.mxu0 %v5590_v25 }
0x1f7f   :  { %5343 = vmatprep.mubr.msk.bf16.mxu1 %vm5842_vm1, %v5841_v34 }
0x1f81   :  { %5004 = vmatpush3.bf16.msra.mxu0 %v5591_v57 }
0x1f82   :  { %5005 = vmatprep.subr.bf16.mxu0 %v5592_v11 }
0x1f85   :  { %5006 = vmatpush3.bf16.msra.mxu0 %v5593_v7 }
0x1f86   :  { %5007 = vmatprep.subr.bf16.mxu0 %v5594_v27 }
0x1f89   :  { %5008 = vmatpush3.bf16.msra.mxu0 %v5595_v12 }
0x1f8a   :  { %5009 = vmatprep.subr.bf16.mxu0 %v5596_v26 }
0x1f8d   :  { %5010 = vmatpush3.bf16.msra.mxu0 %v5597_v29 }
0x1f8e   :  { %5011 = vmatprep.subr.bf16.mxu0 %v5598_v14 }
0x1f91   :  { %5012 = vmatpush3.bf16.msra.mxu0 %v5599_v15 }
0x1f92   :  { %5347 = vmatprep.subr.bf16.mxu0 %v5841_v34 }
0x2049   :  { %v3935_v36 = vpop.f32.mrb[88].mxu1 }
0x204a   :  { %v7042_v41 = vadd.f32 %v3935_v36, %v3814_v47  ;;  %v3937_v61 = vpop.f32.mrb[89].mxu1 }
0x204b   :  { %v7044_v4 = vadd.f32 %v3937_v61, %v3818_v23  ;;  %v3939_v32 = vpop.f32.mrb[90].mxu1 }
0x204c   :  { %v3954_v33 = vmul.f32 %v7042_v41, %v7042_v41  ;;  %v7048_v30 = vadd.f32 %v3939_v32, %v3814_v47  ;;  %v3941_v1 = vpop.f32.mrb[91].mxu1 }
0x204d   :  { %v3955_v51 = vmul.f32 %v7044_v4, %v7044_v4  ;;  %v7052_v52 = vadd.f32 %v3941_v1, %v3818_v23 }
0x204e   :  { %v3962_v37 = vmul.f32 %v3954_v33, %v7042_v41  ;;  %v3956_v39 = vmul.f32 %v7048_v30, %v7048_v30 }
0x204f   :  { %v3963_v54 = vmul.f32 %v3955_v51, %v7044_v4  ;;  %v3957_v28 = vmul.f32 %v7052_v52, %v7052_v52 }
0x2050   :  { %v3970_v31 = vmul.f32 0.044715, %v3962_v37  ;;  %v3964_v55 = vmul.f32 %v3956_v39, %v7048_v30 }
0x2051   :  { %v3971_v58 = vmul.f32 0.044715, %v3963_v54  ;;  %v3965_v63 = vmul.f32 %v3957_v28, %v7052_v52  ;;  %v3945_v2 = vpop.f32.mrb[92].mxu1 }
0x2052   :  { %v3978_v53 = vadd.f32 %v3970_v31, %v7042_v41  ;;  %v3972_v38 = vmul.f32 0.044715, %v3964_v55  ;;  %v7063_v17 = vadd.f32 %v3945_v2, %v3814_v47  ;;  %v3947_v21 = vpop.f32.mrb[93].mxu1 }
0x2053   :  { %v3979_v22 = vadd.f32 %v3971_v58, %v7044_v4  ;;  %v3973_v42 = vmul.f32 0.044715, %v3965_v63  ;;  %v7066_v6 = vadd.f32 %v3947_v21, %v3818_v23  ;;  %v3949_v9 = vpop.f32.mrb[94].mxu1 }
0x2054   :  { %v3986_v59 = vmul.f32 0.7978846, %v3978_v53  ;;  %v3980_v43 = vadd.f32 %v3972_v38, %v7048_v30  ;;  %v3958_v44 = vmul.f32 %v7063_v17, %v7063_v17  ;;  %v7071_v40 = vadd.f32 %v3949_v9, %v3814_v47  ;;  %v3951_v48 = vpop.f32.mrb[95].mxu1 }
0x2055   :  { %v3987_v16 = vmul.f32 0.7978846, %v3979_v22  ;;  %v3981_v24 = vadd.f32 %v3973_v42, %v7052_v52  ;;  %v3959_v3 = vmul.f32 %v7066_v6, %v7066_v6  ;;  %v7076_v49 = vadd.f32 %v3951_v48, %v3818_v23 }
0x2056   :  { %5792 = vtanh.f32 %v3986_v59  ;;  %v3988_v50 = vmul.f32 0.7978846, %v3980_v43  ;;  %v3966_v13 = vmul.f32 %v3958_v44, %v7063_v17  ;;  %v3960_v19 = vmul.f32 %v7071_v40, %v7071_v40 }
0x2057   :  { %5794 = vtanh.f32 %v3987_v16  ;;  %v3989_v60 = vmul.f32 0.7978846, %v3981_v24  ;;  %v3967_v62 = vmul.f32 %v3959_v3, %v7066_v6  ;;  %v3961_v35 = vmul.f32 %v7076_v49, %v7076_v49 }
0x2058   :  { %5796 = vtanh.f32 %v3988_v50  ;;  %v3974_v56 = vmul.f32 0.044715, %v3966_v13  ;;  %v3968_v0 = vmul.f32 %v3960_v19, %v7071_v40  ;;  %v4822_v19 = vld [vmem:[%s7228_s15 + $0x1] ss:$0 sm:$0xff] }
0x2059   :  { %5798 = vtanh.f32 %v3989_v60  ;;  %v3975_v5 = vmul.f32 0.044715, %v3967_v62  ;;  %v3969_v10 = vmul.f32 %v3961_v35, %v7076_v49 }
0x205a   :  { %v3982_v25 = vadd.f32 %v3974_v56, %v7063_v17  ;;  %v3976_v57 = vmul.f32 0.044715, %v3968_v0 }
0x205b   :  { %v3983_v11 = vadd.f32 %v3975_v5, %v7066_v6  ;;  %v3977_v7 = vmul.f32 0.044715, %v3969_v10 }
0x205c   :  { %v3990_v27 = vmul.f32 0.7978846, %v3982_v25  ;;  %v3984_v12 = vadd.f32 %v3976_v57, %v7071_v40 }
0x205d   :  { %v3991_v26 = vmul.f32 0.7978846, %v3983_v11  ;;  %v3985_v29 = vadd.f32 %v3977_v7, %v7076_v49 }
0x205e   :  { %5800 = vtanh.f32 %v3990_v27  ;;  %v3992_v14 = vmul.f32 0.7978846, %v3984_v12 }
0x205f   :  { %5802 = vtanh.f32 %v3991_v26  ;;  %v3993_v15 = vmul.f32 0.7978846, %v3985_v29 }
0x2060   :  { %v5793_v18 = vpop.eup %5792  ;;  %5804 = vtanh.f32 %v3992_v14 }
0x2061   :  { %v5795_v47 = vpop.eup %5794  ;;  %v4002_v23 = vadd.f32 1.0, %v5793_v18  ;;  %5806 = vtanh.f32 %v3993_v15 }
0x2062   :  { %v5797_v36 = vpop.eup %5796  ;;  %v4003_v61 = vadd.f32 1.0, %v5795_v47 }
0x2063   :  { %v5799_v32 = vpop.eup %5798  ;;  %v4010_v33 = vmul.f32 0.5, %v4002_v23  ;;  %v4004_v1 = vadd.f32 1.0, %v5797_v36 }
0x2064   :  { %v4005_v51 = vadd.f32 1.0, %v5799_v32  ;;  %v4011_v37 = vmul.f32 0.5, %v4003_v61 }
0x2065   :  { %v4012_v39 = vmul.f32 0.5, %v4004_v1  ;;  %v4018_v28 = vmul.f32 %v4010_v33, %v7042_v41 }
0x2066   :  { %v4013_v54 = vmul.f32 0.5, %v4005_v51  ;;  %v4019_v58 = vmul.f32 %v4011_v37, %v7044_v4 }
0x2067   :  { %v4020_v31 = vmul.f32 %v4012_v39, %v7048_v30  ;;  %v5600_v39 = vld [vmem:[%s7231_s18] sm:$0xff]  }
0x2068   :  { %v5801_v55 = vpop.eup %5800  ;;  %v4021_v63 = vmul.f32 %v4013_v54, %v7052_v52  ;;  %5328 = vmatpush3.bf16.msra.mxu1 %v5600_v39  ;;  %v5601_v54 = vld [vmem:[%s7231_s18 + $0x8] sm:$0xff]  }
0x2069   :  { %v5803_v2 = vpop.eup %5802  ;;  %v4026_v53 = vpack.c.bf16 %v4020_v31, %v4018_v28  ;;  %v4006_v38 = vadd.f32 1.0, %v5801_v55  ;;  %5329 = vmatprep.subr.bf16.mxu1 %v5841_v34  ;;  %v5602_v28 = vld [vmem:[%s7231_s18 + $0x10] sm:$0xff]   ;;  %v5603_v31 = vld [vmem:[%s7231_s18 + $0x18] sm:$0xff]   ;;  %v5604_v55 = vld [vmem:[%s7231_s18 + $0x20] sm:$0xff]  }
0x206a   :  { %v5805_v21 = vpop.eup %5804  ;;  %v4027_v22 = vpack.c.bf16 %v4021_v63, %v4019_v58  ;;  %v4007_v42 = vadd.f32 1.0, %v5803_v2  ;;  %v5605_v58 = vld [vmem:[%s7231_s18 + $0x28] sm:$0xff]   ;;  %v5606_v63 = vld [vmem:[%s7231_s18 + $0x30] sm:$0xff]   ;;  %v5607_v2 = vld [vmem:[%s7231_s18 + $0x38] sm:$0xff]  }
0x206b   :  { %v5807_v9 = vpop.eup %5806  ;;  %v4008_v59 = vadd.f32 1.0, %v5805_v21  ;;  %v4014_v43 = vmul.f32 0.5, %v4006_v38  ;;  %v5609_v38 = vld [vmem:[%s7233_s20 + $0x8] sm:$0xff]   ;;  %v5610_v21 = vld [vmem:[%s7233_s20 + $0x10] sm:$0xff]  }
0x206c   :  { %4199 = vmatprep.mubr.bf16.mxu0 %v4027_v22  ;;  %v4009_v44 = vadd.f32 1.0, %v5807_v9  ;;  %v4015_v48 = vmul.f32 0.5, %v4007_v42  ;;  %5330 = vmatpush3.bf16.msra.mxu1 %v5601_v54  ;;  %v5611_v22 = vld [vmem:[%s7233_s20 + $0x18] sm:$0xff]   ;;  %v5612_v42 = vld [vmem:[%s7233_s20 + $0x20] sm:$0xff]   ;;  %v5613_v9 = vld [vmem:[%s7233_s20 + $0x28] sm:$0xff]  }
0x206d   :  { %4200 = vmatmul.mubr.bf16.vlgmr.msra.gmra.mrb[92].mxu0 %v4026_v53  ;;  %v4016_v41 = vmul.f32 0.5, %v4008_v59  ;;  %v4022_v16 = vmul.f32 %v4014_v43, %v7063_v17  ;;  %5331 = vmatprep.subr.bf16.mxu1 %v5841_v34  ;;  %v5608_v53 = vld [vmem:[%s7233_s20] sm:$0xff]  }
0x206e   :  { %v4017_v30 = vmul.f32 0.5, %v4009_v44  ;;  %v4023_v52 = vmul.f32 %v4015_v48, %v7066_v6  ;;  %5348 = vmatpush3.bf16.msra.mxu0 %v5608_v53 }
0x206f   :  { %v4024_v4 = vmul.f32 %v4016_v41, %v7071_v40  ;;  %5349 = vmatprep.subr.bf16.mxu0 %v5841_v34 }
0x2070   :  { %v4025_v24 = vmul.f32 %v4017_v30, %v7076_v49  ;;  %5332 = vmatpush3.bf16.msra.mxu1 %v5602_v28 }
0x2071   :  { %v4028_v3 = vpack.c.bf16 %v4024_v4, %v4022_v16  ;;  %5333 = vmatprep.subr.bf16.mxu1 %v5841_v34 }
0x2072   :  { %v4029_v50 = vpack.c.bf16 %v4025_v24, %v4023_v52  ;;  %5350 = vmatpush3.bf16.msra.mxu0 %v5609_v38 }
0x2073   :  { %5351 = vmatprep.subr.bf16.mxu0 %v5841_v34 }
0x2074   :  { %4207 = vmatprep.mubr.bf16.mxu0 %v4029_v50  ;;  %5334 = vmatpush3.bf16.msra.mxu1 %v5603_v31  ;;  %v5614_v31 = vld [vmem:[%s7233_s20 + $0x30] sm:$0xff]  }
0x2075   :  { %4208 = vmatmul.mubr.bf16.gmra.mrb[96].mxu0 %v4028_v3  ;;  %5335 = vmatprep.subr.bf16.mxu1 %v5841_v34 }
0x2076   :  { %5363 = vmatprep.mubr.msk.bf16.mxu0 %vm5842_vm1, %v5841_v34  ;;  %5352 = vmatpush3.bf16.msra.mxu0 %v5610_v21 }
0x2077   :  { %5353 = vmatprep.subr.bf16.mxu0 %v5841_v34 }
0x2078   :  { %5336 = vmatpush3.bf16.msra.mxu1 %v5604_v55  ;;  %v5615_v55 = vld [vmem:[%s7233_s20 + $0x38] sm:$0xff]   ;;  %s5846_s20 = smov [#allocation2]  }
0x2079   :  { %5337 = vmatprep.subr.bf16.mxu1 %v5841_v34  ;;  %s4546_s3 = sshll.u32 %s5846_s20, 4  ;;  %s4547_s3 = int_to_ptr.vmem [resolvable:$true] %s4546_s3 }
0x207a   :  { %5354 = vmatpush3.bf16.msra.mxu0 %v5611_v22  ;;  %p5821_p1 = scmp.lt.s32.totalorder %s4547_s3, %s4547_s3 }
0x207b   :  { %5355 = vmatprep.subr.bf16.mxu0 %v5841_v34 }
0x207c   :  { %5338 = vmatpush3.bf16.msra.mxu1 %v5605_v58  ;;  %v4841_v58 = vld [vmem:[%s7232_s19] ss:$0 sm:$0xff]  ;;  %s5816_s19 = scalar_lea.vmem %s4547_s3, 32 }
0x207d   :  { %5339 = vmatprep.subr.bf16.mxu1 %v5841_v34  ;;  %p5817_p0 = scmp.ne.s32.totalorder %s4547_s3, %s5816_s19  ;;  %p5822_p2 = scmp.lt.s32.totalorder %s5816_s19, %s5816_s19 }
0x207e   :  { %5356 = vmatpush3.bf16.msra.mxu0 %v5612_v42 }
0x207f   :  { %5357 = vmatprep.subr.bf16.mxu0 %v5841_v34  ;;  %p5823_p3 = por %p5822_p2, %p5821_p1 }
0x2080   :  { %5340 = vmatpush3.bf16.msra.mxu1 %v5606_v63 }
0x2081   :  { %5341 = vmatprep.subr.bf16.mxu1 %v5841_v34  ;;  %p5824_p4 = pnand %p5823_p3, %p5817_p0 }
0x2082   :  { %5358 = vmatpush3.bf16.msra.mxu0 %v5613_v9 }
0x2083   :  { %5359 = vmatprep.subr.bf16.mxu0 %v5841_v34 }
0x2084   :  { %5342 = vmatpush3.bf16.msra.mxu1 %v5607_v2 }
0x2086   :  { %5360 = vmatpush3.bf16.msra.mxu0 %v5614_v31 }
0x2087   :  { %5361 = vmatprep.subr.bf16.mxu0 %v5841_v34  ;;  %v4850_v34 = vld [vmem:[%s7234_s21] ss:$0 sm:$0xff] }
0x208a   :  { %5362 = vmatpush3.bf16.msra.mxu0 %v5615_v55 }
0x2140   :  { %v5013_v13 = vpop.f32.mrb[92].mxu0 }
0x2141   :  { %v5014_v60 = vpop.f32.mrb[93].mxu0 }
0x2142   :  { %v5015_v17 = vadd.f32 %v5014_v60, %v5013_v13  ;;  %v5016_v62 = vpop.f32.mrb[94].mxu0 }
0x2143   :  { %v5017_v40 = vpop.f32.mrb[95].mxu0 }
0x2144   :  { %v4202_v35 = vadd.f32 %v5015_v17, %v4822_v19  ;;  %v5018_v6 = vadd.f32 %v5017_v40, %v5016_v62 }
0x2146   :  { %v4205_v56 = vadd.f32 %v5018_v6, %v4822_v19  ;;  %v4216_v49 = vadd.f32 %v4202_v35, %v6906_v45  ;;  %v4840_v35 = vld [vmem:[%s7230_s17] ss:$0 sm:$0xff] }
0x2148   :  { %4222 = vadd.xlane.f32.xlu0 %v4216_v49  ;;  %v5019_v0 = vpop.f32.mrb[96].mxu0  ;;  %v4217_v5 = vadd.f32 %v4205_v56, %v6909_v46 }
0x2149   :  { %v5020_v10 = vpop.f32.mrb[97].mxu0 }
0x214a   :  { %v5021_v25 = vadd.f32 %v5020_v10, %v5019_v0  ;;  %4224 = vadd.xlane.f32.xlu1 %v4217_v5  ;;  %v5022_v57 = vpop.f32.mrb[98].mxu0 }
0x214b   :  { %v5023_v11 = vpop.f32.mrb[99].mxu0 }
0x214c   :  { %v4210_v7 = vadd.f32 %v5021_v25, %v4822_v19  ;;  %v5024_v27 = vadd.f32 %v5023_v11, %v5022_v57 }
0x214e   :  { %v4213_v12 = vadd.f32 %v5024_v27, %v4822_v19  ;;  %v4218_v26 = vadd.f32 %v4210_v7, %v6913_v8  ;;  %v4839_v19 = vld [vmem:[%s7229_s16] ss:$0 sm:$0xff] }
0x2150   :  { %4226 = vadd.xlane.f32.xlu0 %v4218_v26  ;;  %v4219_v29 = vadd.f32 %v4213_v12, %v6918_v20 }
0x2152   :  { %4228 = vadd.xlane.f32.xlu1 %v4219_v29 }
0x21d5   :  { %v4223_v14 = vpop.xlane.xlu0 %4222 }
0x21d6   :  { %v4230_v45 = vmul.f32 0.0078125, %v4223_v14 }
0x21d7   :  { %v4225_v15 = vpop.xlane.xlu1 %4224 }
0x21d8   :  { %v7107_v18 = vsub.f32 %v4216_v49, %v4230_v45  ;;  %v4231_v46 = vmul.f32 0.0078125, %v4225_v15 }
0x21da   :  { %v7109_v47 = vsub.f32 %v4217_v5, %v4231_v46  ;;  %v4238_v23 = vmul.f32 %v7107_v18, %v7107_v18 }
0x21dc   :  { %4242 = vadd.xlane.f32.xlu0 %v4238_v23  ;;  %v4239_v36 = vmul.f32 %v7109_v47, %v7109_v47 }
0x21dd   :  { %v4227_v8 = vpop.xlane.xlu0 %4226 }
0x21de   :  { %v4232_v61 = vmul.f32 0.0078125, %v4227_v8  ;;  %4244 = vadd.xlane.f32.xlu1 %v4239_v36 }
0x21df   :  { %v4229_v20 = vpop.xlane.xlu1 %4228 }
0x21e0   :  { %v7115_v32 = vsub.f32 %v4218_v26, %v4232_v61  ;;  %v4233_v33 = vmul.f32 0.0078125, %v4229_v20 }
0x21e2   :  { %v7117_v1 = vsub.f32 %v4219_v29, %v4233_v33  ;;  %v4240_v51 = vmul.f32 %v7115_v32, %v7115_v32 }
0x21e4   :  { %4246 = vadd.xlane.f32.xlu0 %v4240_v51  ;;  %v4241_v37 = vmul.f32 %v7117_v1, %v7117_v1 }
0x21e6   :  { %4248 = vadd.xlane.f32.xlu1 %v4241_v37 }
0x2269   :  { %v4243_v59 = vpop.xlane.xlu0 %4242 }
0x226a   :  { %v4250_v43 = vmul.f32 0.0078125, %v4243_v59 }
0x226b   :  { %v4245_v44 = vpop.xlane.xlu1 %4244 }
0x226c   :  { %v4254_v48 = vadd.f32 1e-05, %v4250_v43  ;;  %v4251_v41 = vmul.f32 0.0078125, %v4245_v44 }
0x226e   :  { %5808 = vrsqrt.f32 %v4254_v48  ;;  %v4255_v30 = vadd.f32 1e-05, %v4251_v41 }
0x2270   :  { %5810 = vrsqrt.f32 %v4255_v30 }
0x2271   :  { %v4247_v16 = vpop.xlane.xlu0 %4246 }
0x2272   :  { %v4252_v4 = vmul.f32 0.0078125, %v4247_v16 }
0x2273   :  { %v4249_v52 = vpop.xlane.xlu1 %4248 }
0x2274   :  { %v4256_v24 = vadd.f32 1e-05, %v4252_v4  ;;  %v4253_v3 = vmul.f32 0.0078125, %v4249_v52 }
0x2276   :  { %5812 = vrsqrt.f32 %v4256_v24  ;;  %v4257_v50 = vadd.f32 1e-05, %v4253_v3 }
0x2278   :  { %v5809_v13 = vpop.eup %5808  ;;  %5814 = vrsqrt.f32 %v4257_v50 }
0x2279   :  { %v4262_v60 = vmul.f32 %v5809_v13, %v7107_v18 }
0x227a   :  { %v5811_v17 = vpop.eup %5810 }
0x227b   :  { %v4272_v62 = vmul.f32 %v4839_v19, %v4262_v60  ;;  %v4263_v40 = vmul.f32 %v5811_v17, %v7109_v47 }
0x227d   :  { %v4273_v6 = vmul.f32 %v4839_v19, %v4263_v40  ;;  %v4282_v56 = vadd.f32 %v4840_v35, %v4272_v62 }
0x227f   :  { %v4283_v49 = vadd.f32 %v4840_v35, %v4273_v6 }
0x2280   :  { %v5813_v0 = vpop.eup %5812 }
0x2281   :  { %v4286_v5 = vadd.f32 %v4283_v49, %v4282_v56  ;;  %v4264_v10 = vmul.f32 %v5813_v0, %v7115_v32 }
0x2282   :  { %v5815_v25 = vpop.eup %5814 }
0x2283   :  { %v4287_v57 = vrot.slane %v4286_v5, 4  ;;  %v4274_v11 = vmul.f32 %v4839_v19, %v4264_v10  ;;  %v4265_v7 = vmul.f32 %v5815_v25, %v7117_v1 }
0x2285   :  { %v4288_v27 = vadd.f32 %v4287_v57, %v4286_v5  ;;  %v4275_v12 = vmul.f32 %v4839_v19, %v4265_v7  ;;  %v4284_v26 = vadd.f32 %v4840_v35, %v4274_v11 }
0x2287   :  { %v4285_v29 = vadd.f32 %v4840_v35, %v4275_v12  ;;  %v4289_v14 = vrot.slane %v4288_v27, 2 }
0x2289   :  { %v4293_v45 = vadd.f32 %v4285_v29, %v4284_v26  ;;  %v4290_v15 = vadd.f32 %v4289_v14, %v4288_v27 }
0x228b   :  { %v4294_v18 = vrot.slane %v4293_v45, 4  ;;  %v4291_v46 = vrot.slane %v4290_v15, 1 }
0x228d   :  { %v4295_v47 = vadd.f32 %v4294_v18, %v4293_v45  ;;  %v4292_v36 = vadd.f32 %v4291_v46, %v4290_v15 }
0x228f   :  { %v4296_v23 = vrot.slane %v4295_v47, 2  ;;  %v4301_v20 = vmul.f32 0.0625, %v4292_v36 }
0x2291   :  { %v4297_v8 = vadd.f32 %v4296_v23, %v4295_v47  ;;  %v4303_v51 = vpack.c.bf16 %v4301_v20, %v4301_v20 }
0x2293   :  { %v4298_v61 = vrot.slane %v4297_v8, 1  ;;  %v4330_v1 = vunpack.c.l.b16 %v4303_v51 }
0x2295   :  { %v4299_v32 = vadd.f32 %v4298_v61, %v4297_v8 }
0x2297   :  { %v4302_v33 = vmul.f32 0.0625, %v4299_v32 }
0x2299   :  { %v4304_v37 = vpack.c.bf16 %v4302_v33, %v4302_v33 }
0x229b   :  { %v4331_v39 = vunpack.c.l.b16 %v4304_v37 }
0x229d   :  { %v4333_v54 = vsel %vm4332_vm5, %v4331_v39, %v4330_v1 }
0x229e   :  { %v4334_v28 = vpack.c.b16 %v4333_v54, %v4333_v54 }
0x22a0   :  { %5344 = vmatmul.mubr.bf16.vlgmr.msra.gmra.mrb[96].mxu1 %v4334_v28 }
0x2373   :  { %v4418_v63 = vpop.f32.mrb[96].mxu1 }
0x2374   :  { %v4419_v2 = vadd.f32 %v4841_v58, %v4418_v63  ;;  %v5345_v53 = vpop.f32.mrb[97].mxu1 }
0x2375   :  { %v4421_v38 = vpop.f32.mrb[98].mxu1 }
0x2376   :  { %vm4424_vm6 = vcmp.gt.f32.partialorder %v4419_v2, 0.0  ;;  %v4425_v21 = vmul.f32 0.01, %v4419_v2  ;;  %v5346_v22 = vpop.f32.mrb[99].mxu1 }
0x2378   :  { %v4426_v42 = vsel %vm4424_vm6, %v4419_v2, %v4425_v21 }
0x2379   :  { %v4427_v9 = vpack.c.bf16 %v4426_v42, %v4426_v42 }
0x237b   :  { %5364 = vmatmul.mubr.bf16.vlgmr.msra.gmra.mrb[100].mxu0 %v4427_v9 }
0x244e   :  { %v4533_v59 = vpop.f32.mrb[100].mxu0 }
0x244f   :  { %v4534_v43 = vadd.f32 %v4850_v34, %v4533_v59  ;;  %v5365_v44 = vpop.f32.mrb[101].mxu0 }
0x2450   :  { %v4536_v48 = vpop.f32.mrb[102].mxu0 }
0x2451   :  { %4539 = vst [vmem:[#allocation2] sm:$0x3] %v4534_v43  ;;  %v5366_v41 = vpop.f32.mrb[103].mxu0 }
0x2452   :  { %5827 = shalt.err (!%p5824_p4)
}
0x2453   :  { %s5828_s21 = scalar_lea.hbm %s7235_s22, 32 }
0x2454   :  { %p5829_p5 = scmp.ne.s32.totalorder %s7235_s22, %s5828_s21  ;;  %p5832_p6 = scmp.lt.u32.totalorder %s5828_s21, %s7235_s22 }
0x2456   :  { %p5834_p7 = pnand %p5832_p6, %p5829_p5 }
0x2458   :  { %5837 = shalt.err (!%p5834_p7)
}
0x2459   :  { %4549 = dma.vmem_to_hbm [thread:$0]  %s4547_s3, 32, %s7235_s22, [#allocation3]  }
0x245a   :  { %5838 = dma.done.wait [#allocation3], 32  }
0x245b   :  { %5839 = vsyncadd [#allocation3], 4294967264 }
0x245c   :  { %4553 = vsyncpa [#allocation3], 1 }

</bundles_post_ra>
